<compile_context>
chip_gen: v6e
topology: v6e:2x2x1
jax: 0.10.0
libtpu: 0.0.40
codegen_flags: <defaults>
</compile_context>

<pallas_src>
import jax
import jax.numpy as jnp
from jax.experimental import pallas as pl
from jax.experimental.pallas import tpu as pltpu

H = W = 16
HW = H * W
C_IN = 6            # concat of x (3 ch) and xbar (3 ch)
C_MID = 32
C_OUT = 3
K1, K2, K3 = 7, 5, 3
C1P = 8             # conv1 input channels padded 6 -> 8 (sublane alignment)
C3P = 8             # conv3 output rows padded 3 -> 8 (full-tile stores)
PAD = 128           # lane halo of flat/colw buffers; must be >= (max_k//2)*W = 48


def _make_kernel(bb, ch):
    n = bb * HW          # lanes: batch-block * H * W
    nch = n // ch        # lane chunks per layer

    def zero_halos(ref, rows):
        ref[:, 0:PAD] = jnp.zeros((rows, PAD), jnp.float32)
        ref[:, PAD + n:PAD + n + PAD] = jnp.zeros((rows, PAD), jnp.float32)

    def build_colw(flat, colw, mh_ref, k, cin):
        """colw[kw*cin + c, PAD + l] = flat[c, PAD + l + (kw - k//2)] * hmask_kw[l]."""
        p = k // 2
        zero_halos(colw, k * cin)
        for kw in range(k):
            dw = kw - p
            patch = flat[:, PAD + dw:PAD + dw + n]
            if dw == 0:                                   # centre column: mask == 1
                colw[kw * cin:(kw + 1) * cin, PAD:PAD + n] = patch
            else:
                colw[kw * cin:(kw + 1) * cin, PAD:PAD + n] = patch * mh_ref[kw, :, :]

    def conv_layer(colw, w_ref, b_ref, mv_ref, k, dst, dst_off):
        """dst[:, dst_off:dst_off+n] = relu(conv + bias), chunked over lanes."""
        p = k // 2
        cout = b_ref.shape[0]
        bias = b_ref[...]                                 # (cout, 1)
        for c in range(nch):
            c0 = c * ch
            acc = jnp.zeros((cout, ch), jnp.float32)
            for kh in range(k):
                s = PAD + (kh - p) * W + c0
                r = jnp.dot(w_ref[kh], colw[:, s:s + ch],
                            preferred_element_type=jnp.float32)
                acc = acc + mv_ref[kh, :, c0:c0 + ch] * r
            dst[:, dst_off + c0:dst_off + c0 + ch] = jnp.maximum(acc + bias, 0.0)

    def kernel(xin_ref, w1_ref, b1_ref, mh1_ref, mv1_ref,
               w2_ref, b2_ref, mh2_ref, mv2_ref,
               w3_ref, b3_ref, mh3_ref, mv3_ref,
               out_ref, flat0, colw1, flat1, colw2, flat2, colw3):
        # Zero only the lane halos; interiors are fully overwritten each step.
        # Kept unconditional so it stays correct when the "parallel" grid axis
        # is split across TensorCores.
        zero_halos(flat0, C1P)
        zero_halos(flat1, C_MID)
        zero_halos(flat2, C_MID)

        # conv1 input: one full-tile lane-dense store (channel rows 6,7 are
        # already zero from host-side padding).
        flat0[:, PAD:PAD + n] = xin_ref[...]

        # conv1: 6 -> 32, k=7, 'same', ReLU
        build_colw(flat0, colw1, mh1_ref, K1, C1P)
        conv_layer(colw1, w1_ref, b1_ref, mv1_ref, K1, flat1, PAD)

        # conv2: 32 -> 32, k=5, 'same', ReLU
        build_colw(flat1, colw2, mh2_ref, K2, C_MID)
        conv_layer(colw2, w2_ref, b2_ref, mv2_ref, K2, flat2, PAD)

        # conv3: 32 -> 3 (rows padded to 8), k=3, 'same', ReLU
        build_colw(flat2, colw3, mh3_ref, K3, C_MID)
        conv_layer(colw3, w3_ref, b3_ref, mv3_ref, K3, out_ref, 0)

    return kernel


def _pick_batch_block(batch, max_bb=16):
    """Prefer >=2 grid steps (v7x: both TensorCores busy); cap bb for VMEM."""
    target = max(batch // 2, 1) if batch >= 2 else 1
    bb = min(target, max_bb)
    while batch % bb:
        bb -= 1
    return max(bb, 1)


def _build_masks(k, n):
    """Per-kw horizontal and per-kh vertical {0,1} masks over the lane axis."""
    p = k // 2
    lane = jnp.arange(n)
    row = (lane % HW) // W
    col = lane % W
    d = (jnp.arange(k) - p)[:, None]
    mh = ((col[None, :] + d >= 0) & (col[None, :] + d < W)).astype(jnp.float32)
    mv = ((row[None, :] + d >= 0) & (row[None, :] + d < H)).astype(jnp.float32)
    return mh[:, None, :], mv[:, None, :]                # each (k, 1, n)


def _pack_w(w_hwio, cin_p, cout_p):
    """HWIO (k,k,cin,cout) -> (k, cout_p, k*cin_p): W_kh[cout, kw*cin_p + cin]."""
    k, _, cin, cout = w_hwio.shape
    w = jnp.transpose(w_hwio, (0, 3, 1, 2))              # (kh, cout, kw, cin)
    w = jnp.pad(w, ((0, 0), (0, cout_p - cout), (0, 0), (0, cin_p - cin)))
    return w.reshape(k, cout_p, k * cin_p).astype(jnp.float32)


def _pack_params(params):
    w1, b1, w2, b2, w3, b3 = params
    w1p = _pack_w(w1, C1P, C_MID)                        # (7, 32, 56)
    w2p = _pack_w(w2, C_MID, C_MID)                      # (5, 32, 160)
    w3p = _pack_w(w3, C_MID, C3P)                        # (3, 8, 96)
    b1p = b1.reshape(C_MID, 1).astype(jnp.float32)
    b2p = b2.reshape(C_MID, 1).astype(jnp.float32)
    b3p = jnp.pad(b3, (0, C3P - C_OUT)).reshape(C3P, 1).astype(jnp.float32)
    return w1p, b1p, w2p, b2p, w3p, b3p


def refiner_forward(x, xbar, params):
    """x, xbar: (B, 3, H, W) float32 (NCHW, like the PyTorch module)."""
    batch = x.shape[0]
    bb = _pick_batch_block(batch)
    grid = batch // bb
    n = bb * HW
    ch = 512 if n % 512 == 0 else 256                    # lane chunk (vreg pressure)

    # Host-side layout: channels on sublanes (padded 6->8), batch*spatial on lanes.
    xin = jnp.concatenate([x, xbar], axis=1).astype(jnp.float32)
    xin = xin.reshape(batch, C_IN, HW).transpose(1, 0, 2).reshape(C_IN, batch * HW)
    xin = jnp.pad(xin, ((0, C1P - C_IN), (0, 0)))        # (8, B*HW)

    w1p, b1p, w2p, b2p, w3p, b3p = _pack_params(params)
    mh1, mv1 = _build_masks(K1, n)
    mh2, mv2 = _build_masks(K2, n)
    mh3, mv3 = _build_masks(K3, n)

    out2d = pl.pallas_call(
        _make_kernel(bb, ch),
        out_shape=jax.ShapeDtypeStruct((C3P, batch * HW), jnp.float32),
        grid_spec=pltpu.PrefetchScalarGridSpec(
            num_scalar_prefetch=0,
            grid=(grid,),
            in_specs=[
                pl.BlockSpec((C1P, n), lambda g: (0, g)),                    # xin
                pl.BlockSpec((K1, C_MID, K1 * C1P), lambda g: (0, 0, 0)),    # w1
                pl.BlockSpec((C_MID, 1), lambda g: (0, 0)),                  # b1
                pl.BlockSpec((K1, 1, n), lambda g: (0, 0, 0)),               # mh1
                pl.BlockSpec((K1, 1, n), lambda g: (0, 0, 0)),               # mv1
                pl.BlockSpec((K2, C_MID, K2 * C_MID), lambda g: (0, 0, 0)),  # w2
                pl.BlockSpec((C_MID, 1), lambda g: (0, 0)),                  # b2
                pl.BlockSpec((K2, 1, n), lambda g: (0, 0, 0)),               # mh2
                pl.BlockSpec((K2, 1, n), lambda g: (0, 0, 0)),               # mv2
                pl.BlockSpec((K3, C3P, K3 * C_MID), lambda g: (0, 0, 0)),    # w3
                pl.BlockSpec((C3P, 1), lambda g: (0, 0)),                    # b3
                pl.BlockSpec((K3, 1, n), lambda g: (0, 0, 0)),               # mh3
                pl.BlockSpec((K3, 1, n), lambda g: (0, 0, 0)),               # mv3
            ],
            out_specs=pl.BlockSpec((C3P, n), lambda g: (0, g)),
            scratch_shapes=[
                pltpu.VMEM((C1P, n + 2 * PAD), jnp.float32),                 # flat0
                pltpu.VMEM((K1 * C1P, n + 2 * PAD), jnp.float32),            # colw1
                pltpu.VMEM((C_MID, n + 2 * PAD), jnp.float32),               # flat1
                pltpu.VMEM((K2 * C_MID, n + 2 * PAD), jnp.float32),          # colw2
                pltpu.VMEM((C_MID, n + 2 * PAD), jnp.float32),               # flat2
                pltpu.VMEM((K3 * C_MID, n + 2 * PAD), jnp.float32),          # colw3
            ],
        ),
        compiler_params=pltpu.CompilerParams(
            dimension_semantics=("parallel",),
            vmem_limit_bytes=32 * 1024 * 1024),
    )(xin, w1p, b1p, mh1, mv1, w2p, b2p, mh2, mv2, w3p, b3p, mh3, mv3)

    # (8, B*HW) -> (B, 3, H, W)
    return out2d[:C_OUT].reshape(C_OUT, batch, H, W).transpose(1, 0, 2, 3)


def init_params(key):
    """Deterministic synthetic init (PyTorch-like uniform bounds), HWIO weights."""
    ks = jax.random.split(key, 6)

    def conv_init(kw_, kb_, k, cin, cout):
        fan_in = cin * k * k
        bound = 1.0 / (fan_in ** 0.5)
        w = jax.random.uniform(kw_, (k, k, cin, cout), jnp.float32, -bound, bound)
        b = jax.random.uniform(kb_, (cout,), jnp.float32, -bound, bound)
        return w, b

    w1, b1 = conv_init(ks[0], ks[1], K1, C_IN, C_MID)
    w2, b2 = conv_init(ks[2], ks[3], K2, C_MID, C_MID)
    w3, b3 = conv_init(ks[4], ks[5], K3, C_MID, C_OUT)
    return (w1, b1, w2, b2, w3, b3)


def refiner_reference(x, xbar, params):
    """Pure-JAX reference (lax.conv, NCHW) for correctness checking."""
    w1, b1, w2, b2, w3, b3 = params
    a = jnp.concatenate([x, xbar], axis=1)

    def conv(a, w, b):
        y = jax.lax.conv_general_dilated(
            a, w, window_strides=(1, 1), padding='SAME',
            dimension_numbers=('NCHW', 'HWIO', 'NCHW'))
        return jax.nn.relu(y + b.reshape(1, -1, 1, 1))

    a = conv(a, w1, b1)
    a = conv(a, w2, b2)
    a = conv(a, w3, b3)
    return a


if __name__ == "__main__":
    key = jax.random.PRNGKey(0)
    kx, kxb, kp = jax.random.split(key, 3)
    B = 2
    x = jax.random.normal(kx, (B, 3, H, W), jnp.float32)
    xbar = jax.random.normal(kxb, (B, 3, H, W), jnp.float32)
    params = init_params(kp)

    out = jax.block_until_ready(refiner_forward(x, xbar, params))
    ref = jax.block_until_ready(refiner_reference(x, xbar, params))

    assert out.shape == (B, 3, H, W), out.shape
    max_err = float(jnp.max(jnp.abs(out - ref)))
    assert jnp.allclose(out, ref, atol=1e-3, rtol=1e-3), max_err
    print("KERNEL_OK")
</pallas_src>

<mosaic_0001>
module attributes {stable_mosaic.version = 11 : i64} {
  func.func @kernel(%arg0: i32, %arg1: memref<8x256xf32, #tpu.memory_space<vmem>>, %arg2: memref<7x32x56xf32, #tpu.memory_space<vmem>>, %arg3: memref<32x1xf32, #tpu.memory_space<vmem>>, %arg4: memref<7x1x256xf32, #tpu.memory_space<vmem>>, %arg5: memref<7x1x256xf32, #tpu.memory_space<vmem>>, %arg6: memref<5x32x160xf32, #tpu.memory_space<vmem>>, %arg7: memref<32x1xf32, #tpu.memory_space<vmem>>, %arg8: memref<5x1x256xf32, #tpu.memory_space<vmem>>, %arg9: memref<5x1x256xf32, #tpu.memory_space<vmem>>, %arg10: memref<3x8x96xf32, #tpu.memory_space<vmem>>, %arg11: memref<8x1xf32, #tpu.memory_space<vmem>>, %arg12: memref<3x1x256xf32, #tpu.memory_space<vmem>>, %arg13: memref<3x1x256xf32, #tpu.memory_space<vmem>>, %arg14: memref<8x256xf32, #tpu.memory_space<vmem>>, %arg15: memref<8x512xf32, #tpu.memory_space<vmem>>, %arg16: memref<56x512xf32, #tpu.memory_space<vmem>>, %arg17: memref<32x512xf32, #tpu.memory_space<vmem>>, %arg18: memref<160x512xf32, #tpu.memory_space<vmem>>, %arg19: memref<32x512xf32, #tpu.memory_space<vmem>>, %arg20: memref<96x512xf32, #tpu.memory_space<vmem>>) attributes {dimension_semantics = [#tpu.dimension_semantics<parallel>], iteration_bounds = array<i64: 2>, scalar_prefetch = 0 : i64, scratch_operands = 6 : i64, tpu.core_type = #tpu.core_type<tc>, window_params = [{transform_indices = @transform_0, window_bounds = array<i64: 8, 256>}, {pipeline_mode = #tpu.pipeline_mode<synchronous>, transform_indices = @transform_1, window_bounds = array<i64: 7, 32, 56>}, {pipeline_mode = #tpu.pipeline_mode<synchronous>, transform_indices = @transform_2, window_bounds = array<i64: 32, 1>}, {pipeline_mode = #tpu.pipeline_mode<synchronous>, transform_indices = @transform_3, window_bounds = array<i64: 7, 1, 256>}, {pipeline_mode = #tpu.pipeline_mode<synchronous>, transform_indices = @transform_4, window_bounds = array<i64: 7, 1, 256>}, {pipeline_mode = #tpu.pipeline_mode<synchronous>, transform_indices = @transform_5, window_bounds = array<i64: 5, 32, 160>}, {pipeline_mode = #tpu.pipeline_mode<synchronous>, transform_indices = @transform_6, window_bounds = array<i64: 32, 1>}, {pipeline_mode = #tpu.pipeline_mode<synchronous>, transform_indices = @transform_7, window_bounds = array<i64: 5, 1, 256>}, {pipeline_mode = #tpu.pipeline_mode<synchronous>, transform_indices = @transform_8, window_bounds = array<i64: 5, 1, 256>}, {pipeline_mode = #tpu.pipeline_mode<synchronous>, transform_indices = @transform_9, window_bounds = array<i64: 3, 8, 96>}, {pipeline_mode = #tpu.pipeline_mode<synchronous>, transform_indices = @transform_10, window_bounds = array<i64: 8, 1>}, {pipeline_mode = #tpu.pipeline_mode<synchronous>, transform_indices = @transform_11, window_bounds = array<i64: 3, 1, 256>}, {pipeline_mode = #tpu.pipeline_mode<synchronous>, transform_indices = @transform_12, window_bounds = array<i64: 3, 1, 256>}, {transform_indices = @transform_13, window_bounds = array<i64: 8, 256>}]} {
    %cst = arith.constant 0.000000e+00 : f32
    %0 = vector.broadcast %cst : f32 to vector<8x128xf32>
    %c0 = arith.constant 0 : index
    %c0_0 = arith.constant 0 : index
    %1 = vector.load %arg15[%c0, %c0_0] : memref<8x512xf32, #tpu.memory_space<vmem>>, vector<8x128xf32>
    tpu.vector_store %arg15[%c0, %c0_0], %0 {strides = array<i32>} : memref<8x512xf32, #tpu.memory_space<vmem>>, vector<8x128xf32>,
    %cst_1 = arith.constant 0.000000e+00 : f32
    %2 = vector.broadcast %cst_1 : f32 to vector<8x128xf32>
    %c0_2 = arith.constant 0 : index
    %c384 = arith.constant 384 : index
    %3 = vector.load %arg15[%c0_2, %c384] : memref<8x512xf32, #tpu.memory_space<vmem>>, vector<8x128xf32>
    tpu.vector_store %arg15[%c0_2, %c384], %2 {strides = array<i32>} : memref<8x512xf32, #tpu.memory_space<vmem>>, vector<8x128xf32>,
    %cst_3 = arith.constant 0.000000e+00 : f32
    %4 = vector.broadcast %cst_3 : f32 to vector<32x128xf32>
    %c0_4 = arith.constant 0 : index
    %c0_5 = arith.constant 0 : index
    %5 = vector.load %arg17[%c0_4, %c0_5] : memref<32x512xf32, #tpu.memory_space<vmem>>, vector<32x128xf32>
    tpu.vector_store %arg17[%c0_4, %c0_5], %4 {strides = array<i32>} : memref<32x512xf32, #tpu.memory_space<vmem>>, vector<32x128xf32>,
    %cst_6 = arith.constant 0.000000e+00 : f32
    %6 = vector.broadcast %cst_6 : f32 to vector<32x128xf32>
    %c0_7 = arith.constant 0 : index
    %c384_8 = arith.constant 384 : index
    %7 = vector.load %arg17[%c0_7, %c384_8] : memref<32x512xf32, #tpu.memory_space<vmem>>, vector<32x128xf32>
    tpu.vector_store %arg17[%c0_7, %c384_8], %6 {strides = array<i32>} : memref<32x512xf32, #tpu.memory_space<vmem>>, vector<32x128xf32>,
    %cst_9 = arith.constant 0.000000e+00 : f32
    %8 = vector.broadcast %cst_9 : f32 to vector<32x128xf32>
    %c0_10 = arith.constant 0 : index
    %c0_11 = arith.constant 0 : index
    %9 = vector.load %arg19[%c0_10, %c0_11] : memref<32x512xf32, #tpu.memory_space<vmem>>, vector<32x128xf32>
    tpu.vector_store %arg19[%c0_10, %c0_11], %8 {strides = array<i32>} : memref<32x512xf32, #tpu.memory_space<vmem>>, vector<32x128xf32>,
    %cst_12 = arith.constant 0.000000e+00 : f32
    %10 = vector.broadcast %cst_12 : f32 to vector<32x128xf32>
    %c0_13 = arith.constant 0 : index
    %c384_14 = arith.constant 384 : index
    %11 = vector.load %arg19[%c0_13, %c384_14] : memref<32x512xf32, #tpu.memory_space<vmem>>, vector<32x128xf32>
    tpu.vector_store %arg19[%c0_13, %c384_14], %10 {strides = array<i32>} : memref<32x512xf32, #tpu.memory_space<vmem>>, vector<32x128xf32>,
    %c0_15 = arith.constant 0 : index
    %c0_16 = arith.constant 0 : index
    %12 = vector.load %arg1[%c0_15, %c0_16] : memref<8x256xf32, #tpu.memory_space<vmem>>, vector<8x256xf32>
    %c0_17 = arith.constant 0 : index
    %c128 = arith.constant 128 : index
    %13 = vector.load %arg15[%c0_17, %c128] : memref<8x512xf32, #tpu.memory_space<vmem>>, vector<8x256xf32>
    tpu.vector_store %arg15[%c0_17, %c128], %12 {strides = array<i32>} : memref<8x512xf32, #tpu.memory_space<vmem>>, vector<8x256xf32>,
    %cst_18 = arith.constant 0.000000e+00 : f32
    %14 = vector.broadcast %cst_18 : f32 to vector<56x128xf32>
    %c0_19 = arith.constant 0 : index
    %c0_20 = arith.constant 0 : index
    %15 = vector.load %arg16[%c0_19, %c0_20] : memref<56x512xf32, #tpu.memory_space<vmem>>, vector<56x128xf32>
    tpu.vector_store %arg16[%c0_19, %c0_20], %14 {strides = array<i32>} : memref<56x512xf32, #tpu.memory_space<vmem>>, vector<56x128xf32>,
    %cst_21 = arith.constant 0.000000e+00 : f32
    %16 = vector.broadcast %cst_21 : f32 to vector<56x128xf32>
    %c0_22 = arith.constant 0 : index
    %c384_23 = arith.constant 384 : index
    %17 = vector.load %arg16[%c0_22, %c384_23] : memref<56x512xf32, #tpu.memory_space<vmem>>, vector<56x128xf32>
    tpu.vector_store %arg16[%c0_22, %c384_23], %16 {strides = array<i32>} : memref<56x512xf32, #tpu.memory_space<vmem>>, vector<56x128xf32>,
    %c0_24 = arith.constant 0 : index
    %c125 = arith.constant 125 : index
    %18 = vector.load %arg15[%c0_24, %c125] : memref<8x512xf32, #tpu.memory_space<vmem>>, vector<8x256xf32>
    %c0_25 = arith.constant 0 : index
    %c0_26 = arith.constant 0 : index
    %c0_27 = arith.constant 0 : index
    %19 = vector.load %arg4[%c0_25, %c0_26, %c0_27] : memref<7x1x256xf32, #tpu.memory_space<vmem>>, vector<1x1x256xf32>
    %20 = vector.shape_cast %19 : vector<1x1x256xf32> to vector<1x256xf32>
    %21 = vector.broadcast %20 : vector<1x256xf32> to vector<8x256xf32>
    %22 = arith.mulf %18, %21 : vector<8x256xf32>
    %c0_28 = arith.constant 0 : index
    %c128_29 = arith.constant 128 : index
    %23 = vector.load %arg16[%c0_28, %c128_29] : memref<56x512xf32, #tpu.memory_space<vmem>>, vector<8x256xf32>
    tpu.vector_store %arg16[%c0_28, %c128_29], %22 {strides = array<i32>} : memref<56x512xf32, #tpu.memory_space<vmem>>, vector<8x256xf32>,
    %c0_30 = arith.constant 0 : index
    %c126 = arith.constant 126 : index
    %24 = vector.load %arg15[%c0_30, %c126] : memref<8x512xf32, #tpu.memory_space<vmem>>, vector<8x256xf32>
    %c1 = arith.constant 1 : index
    %c0_31 = arith.constant 0 : index
    %c0_32 = arith.constant 0 : index
    %25 = vector.load %arg4[%c1, %c0_31, %c0_32] : memref<7x1x256xf32, #tpu.memory_space<vmem>>, vector<1x1x256xf32>
    %26 = vector.shape_cast %25 : vector<1x1x256xf32> to vector<1x256xf32>
    %27 = vector.broadcast %26 : vector<1x256xf32> to vector<8x256xf32>
    %28 = arith.mulf %24, %27 : vector<8x256xf32>
    %c8 = arith.constant 8 : index
    %c128_33 = arith.constant 128 : index
    %29 = vector.load %arg16[%c8, %c128_33] : memref<56x512xf32, #tpu.memory_space<vmem>>, vector<8x256xf32>
    tpu.vector_store %arg16[%c8, %c128_33], %28 {strides = array<i32>} : memref<56x512xf32, #tpu.memory_space<vmem>>, vector<8x256xf32>,
    %c0_34 = arith.constant 0 : index
    %c127 = arith.constant 127 : index
    %30 = vector.load %arg15[%c0_34, %c127] : memref<8x512xf32, #tpu.memory_space<vmem>>, vector<8x256xf32>
    %c2 = arith.constant 2 : index
    %c0_35 = arith.constant 0 : index
    %c0_36 = arith.constant 0 : index
    %31 = vector.load %arg4[%c2, %c0_35, %c0_36] : memref<7x1x256xf32, #tpu.memory_space<vmem>>, vector<1x1x256xf32>
    %32 = vector.shape_cast %31 : vector<1x1x256xf32> to vector<1x256xf32>
    %33 = vector.broadcast %32 : vector<1x256xf32> to vector<8x256xf32>
    %34 = arith.mulf %30, %33 : vector<8x256xf32>
    %c16 = arith.constant 16 : index
    %c128_37 = arith.constant 128 : index
    %35 = vector.load %arg16[%c16, %c128_37] : memref<56x512xf32, #tpu.memory_space<vmem>>, vector<8x256xf32>
    tpu.vector_store %arg16[%c16, %c128_37], %34 {strides = array<i32>} : memref<56x512xf32, #tpu.memory_space<vmem>>, vector<8x256xf32>,
    %c0_38 = arith.constant 0 : index
    %c128_39 = arith.constant 128 : index
    %36 = vector.load %arg15[%c0_38, %c128_39] : memref<8x512xf32, #tpu.memory_space<vmem>>, vector<8x256xf32>
    %c24 = arith.constant 24 : index
    %c128_40 = arith.constant 128 : index
    %37 = vector.load %arg16[%c24, %c128_40] : memref<56x512xf32, #tpu.memory_space<vmem>>, vector<8x256xf32>
    tpu.vector_store %arg16[%c24, %c128_40], %36 {strides = array<i32>} : memref<56x512xf32, #tpu.memory_space<vmem>>, vector<8x256xf32>,
    %c0_41 = arith.constant 0 : index
    %c129 = arith.constant 129 : index
    %38 = vector.load %arg15[%c0_41, %c129] : memref<8x512xf32, #tpu.memory_space<vmem>>, vector<8x256xf32>
    %c4 = arith.constant 4 : index
    %c0_42 = arith.constant 0 : index
    %c0_43 = arith.constant 0 : index
    %39 = vector.load %arg4[%c4, %c0_42, %c0_43] : memref<7x1x256xf32, #tpu.memory_space<vmem>>, vector<1x1x256xf32>
    %40 = vector.shape_cast %39 : vector<1x1x256xf32> to vector<1x256xf32>
    %41 = vector.broadcast %40 : vector<1x256xf32> to vector<8x256xf32>
    %42 = arith.mulf %38, %41 : vector<8x256xf32>
    %c32 = arith.constant 32 : index
    %c128_44 = arith.constant 128 : index
    %43 = vector.load %arg16[%c32, %c128_44] : memref<56x512xf32, #tpu.memory_space<vmem>>, vector<8x256xf32>
    tpu.vector_store %arg16[%c32, %c128_44], %42 {strides = array<i32>} : memref<56x512xf32, #tpu.memory_space<vmem>>, vector<8x256xf32>,
    %c0_45 = arith.constant 0 : index
    %c130 = arith.constant 130 : index
    %44 = vector.load %arg15[%c0_45, %c130] : memref<8x512xf32, #tpu.memory_space<vmem>>, vector<8x256xf32>
    %c5 = arith.constant 5 : index
    %c0_46 = arith.constant 0 : index
    %c0_47 = arith.constant 0 : index
    %45 = vector.load %arg4[%c5, %c0_46, %c0_47] : memref<7x1x256xf32, #tpu.memory_space<vmem>>, vector<1x1x256xf32>
    %46 = vector.shape_cast %45 : vector<1x1x256xf32> to vector<1x256xf32>
    %47 = vector.broadcast %46 : vector<1x256xf32> to vector<8x256xf32>
    %48 = arith.mulf %44, %47 : vector<8x256xf32>
    %c40 = arith.constant 40 : index
    %c128_48 = arith.constant 128 : index
    %49 = vector.load %arg16[%c40, %c128_48] : memref<56x512xf32, #tpu.memory_space<vmem>>, vector<8x256xf32>
    tpu.vector_store %arg16[%c40, %c128_48], %48 {strides = array<i32>} : memref<56x512xf32, #tpu.memory_space<vmem>>, vector<8x256xf32>,
    %c0_49 = arith.constant 0 : index
    %c131 = arith.constant 131 : index
    %50 = vector.load %arg15[%c0_49, %c131] : memref<8x512xf32, #tpu.memory_space<vmem>>, vector<8x256xf32>
    %c6 = arith.constant 6 : index
    %c0_50 = arith.constant 0 : index
    %c0_51 = arith.constant 0 : index
    %51 = vector.load %arg4[%c6, %c0_50, %c0_51] : memref<7x1x256xf32, #tpu.memory_space<vmem>>, vector<1x1x256xf32>
    %52 = vector.shape_cast %51 : vector<1x1x256xf32> to vector<1x256xf32>
    %53 = vector.broadcast %52 : vector<1x256xf32> to vector<8x256xf32>
    %54 = arith.mulf %50, %53 : vector<8x256xf32>
    %c48 = arith.constant 48 : index
    %c128_52 = arith.constant 128 : index
    %55 = vector.load %arg16[%c48, %c128_52] : memref<56x512xf32, #tpu.memory_space<vmem>>, vector<8x256xf32>
    tpu.vector_store %arg16[%c48, %c128_52], %54 {strides = array<i32>} : memref<56x512xf32, #tpu.memory_space<vmem>>, vector<8x256xf32>,
    %c0_53 = arith.constant 0 : index
    %c0_54 = arith.constant 0 : index
    %56 = vector.load %arg3[%c0_53, %c0_54] : memref<32x1xf32, #tpu.memory_space<vmem>>, vector<32x1xf32>
    %cst_55 = arith.constant 0.000000e+00 : f32
    %57 = vector.broadcast %cst_55 : f32 to vector<32x256xf32>
    %c0_56 = arith.constant 0 : index
    %c0_57 = arith.constant 0 : index
    %c0_58 = arith.constant 0 : index
    %58 = vector.load %arg2[%c0_56, %c0_57, %c0_58] : memref<7x32x56xf32, #tpu.memory_space<vmem>>, vector<1x32x56xf32>
    %59 = vector.shape_cast %58 : vector<1x32x56xf32> to vector<32x56xf32>
    %c0_59 = arith.constant 0 : index
    %c80 = arith.constant 80 : index
    %60 = vector.load %arg16[%c0_59, %c80] : memref<56x512xf32, #tpu.memory_space<vmem>>, vector<56x256xf32>
    %cst_60 = arith.constant dense<0.000000e+00> : vector<32x256xf32>
    %61 = tpu.matmul %59, %60, %cst_60 {dimension_numbers = #tpu.dot_dimension_numbers<[1], [0], [0], [1], [0, 0, 1, 1], [], []>} : vector<32x56xf32>, vector<56x256xf32>, vector<32x256xf32> -> vector<32x256xf32>
    %c0_61 = arith.constant 0 : index
    %c0_62 = arith.constant 0 : index
    %c0_63 = arith.constant 0 : index
    %62 = vector.load %arg5[%c0_61, %c0_62, %c0_63] : memref<7x1x256xf32, #tpu.memory_space<vmem>>, vector<1x1x256xf32>
    %63 = vector.shape_cast %62 : vector<1x1x256xf32> to vector<1x256xf32>
    %64 = vector.broadcast %63 : vector<1x256xf32> to vector<32x256xf32>
    %65 = arith.mulf %64, %61 : vector<32x256xf32>
    %66 = arith.addf %57, %65 : vector<32x256xf32>
    %c1_64 = arith.constant 1 : index
    %c0_65 = arith.constant 0 : index
    %c0_66 = arith.constant 0 : index
    %67 = vector.load %arg2[%c1_64, %c0_65, %c0_66] : memref<7x32x56xf32, #tpu.memory_space<vmem>>, vector<1x32x56xf32>
    %68 = vector.shape_cast %67 : vector<1x32x56xf32> to vector<32x56xf32>
    %c0_67 = arith.constant 0 : index
    %c96 = arith.constant 96 : index
    %69 = vector.load %arg16[%c0_67, %c96] : memref<56x512xf32, #tpu.memory_space<vmem>>, vector<56x256xf32>
    %cst_68 = arith.constant dense<0.000000e+00> : vector<32x256xf32>
    %70 = tpu.matmul %68, %69, %cst_68 {dimension_numbers = #tpu.dot_dimension_numbers<[1], [0], [0], [1], [0, 0, 1, 1], [], []>} : vector<32x56xf32>, vector<56x256xf32>, vector<32x256xf32> -> vector<32x256xf32>
    %c1_69 = arith.constant 1 : index
    %c0_70 = arith.constant 0 : index
    %c0_71 = arith.constant 0 : index
    %71 = vector.load %arg5[%c1_69, %c0_70, %c0_71] : memref<7x1x256xf32, #tpu.memory_space<vmem>>, vector<1x1x256xf32>
    %72 = vector.shape_cast %71 : vector<1x1x256xf32> to vector<1x256xf32>
    %73 = vector.broadcast %72 : vector<1x256xf32> to vector<32x256xf32>
    %74 = arith.mulf %73, %70 : vector<32x256xf32>
    %75 = arith.addf %66, %74 : vector<32x256xf32>
    %c2_72 = arith.constant 2 : index
    %c0_73 = arith.constant 0 : index
    %c0_74 = arith.constant 0 : index
    %76 = vector.load %arg2[%c2_72, %c0_73, %c0_74] : memref<7x32x56xf32, #tpu.memory_space<vmem>>, vector<1x32x56xf32>
    %77 = vector.shape_cast %76 : vector<1x32x56xf32> to vector<32x56xf32>
    %c0_75 = arith.constant 0 : index
    %c112 = arith.constant 112 : index
    %78 = vector.load %arg16[%c0_75, %c112] : memref<56x512xf32, #tpu.memory_space<vmem>>, vector<56x256xf32>
    %cst_76 = arith.constant dense<0.000000e+00> : vector<32x256xf32>
    %79 = tpu.matmul %77, %78, %cst_76 {dimension_numbers = #tpu.dot_dimension_numbers<[1], [0], [0], [1], [0, 0, 1, 1], [], []>} : vector<32x56xf32>, vector<56x256xf32>, vector<32x256xf32> -> vector<32x256xf32>
    %c2_77 = arith.constant 2 : index
    %c0_78 = arith.constant 0 : index
    %c0_79 = arith.constant 0 : index
    %80 = vector.load %arg5[%c2_77, %c0_78, %c0_79] : memref<7x1x256xf32, #tpu.memory_space<vmem>>, vector<1x1x256xf32>
    %81 = vector.shape_cast %80 : vector<1x1x256xf32> to vector<1x256xf32>
    %82 = vector.broadcast %81 : vector<1x256xf32> to vector<32x256xf32>
    %83 = arith.mulf %82, %79 : vector<32x256xf32>
    %84 = arith.addf %75, %83 : vector<32x256xf32>
    %c3 = arith.constant 3 : index
    %c0_80 = arith.constant 0 : index
    %c0_81 = arith.constant 0 : index
    %85 = vector.load %arg2[%c3, %c0_80, %c0_81] : memref<7x32x56xf32, #tpu.memory_space<vmem>>, vector<1x32x56xf32>
    %86 = vector.shape_cast %85 : vector<1x32x56xf32> to vector<32x56xf32>
    %c0_82 = arith.constant 0 : index
    %c128_83 = arith.constant 128 : index
    %87 = vector.load %arg16[%c0_82, %c128_83] : memref<56x512xf32, #tpu.memory_space<vmem>>, vector<56x256xf32>
    %cst_84 = arith.constant dense<0.000000e+00> : vector<32x256xf32>
    %88 = tpu.matmul %86, %87, %cst_84 {dimension_numbers = #tpu.dot_dimension_numbers<[1], [0], [0], [1], [0, 0, 1, 1], [], []>} : vector<32x56xf32>, vector<56x256xf32>, vector<32x256xf32> -> vector<32x256xf32>
    %c3_85 = arith.constant 3 : index
    %c0_86 = arith.constant 0 : index
    %c0_87 = arith.constant 0 : index
    %89 = vector.load %arg5[%c3_85, %c0_86, %c0_87] : memref<7x1x256xf32, #tpu.memory_space<vmem>>, vector<1x1x256xf32>
    %90 = vector.shape_cast %89 : vector<1x1x256xf32> to vector<1x256xf32>
    %91 = vector.broadcast %90 : vector<1x256xf32> to vector<32x256xf32>
    %92 = arith.mulf %91, %88 : vector<32x256xf32>
    %93 = arith.addf %84, %92 : vector<32x256xf32>
    %c4_88 = arith.constant 4 : index
    %c0_89 = arith.constant 0 : index
    %c0_90 = arith.constant 0 : index
    %94 = vector.load %arg2[%c4_88, %c0_89, %c0_90] : memref<7x32x56xf32, #tpu.memory_space<vmem>>, vector<1x32x56xf32>
    %95 = vector.shape_cast %94 : vector<1x32x56xf32> to vector<32x56xf32>
    %c0_91 = arith.constant 0 : index
    %c144 = arith.constant 144 : index
    %96 = vector.load %arg16[%c0_91, %c144] : memref<56x512xf32, #tpu.memory_space<vmem>>, vector<56x256xf32>
    %cst_92 = arith.constant dense<0.000000e+00> : vector<32x256xf32>
    %97 = tpu.matmul %95, %96, %cst_92 {dimension_numbers = #tpu.dot_dimension_numbers<[1], [0], [0], [1], [0, 0, 1, 1], [], []>} : vector<32x56xf32>, vector<56x256xf32>, vector<32x256xf32> -> vector<32x256xf32>
    %c4_93 = arith.constant 4 : index
    %c0_94 = arith.constant 0 : index
    %c0_95 = arith.constant 0 : index
    %98 = vector.load %arg5[%c4_93, %c0_94, %c0_95] : memref<7x1x256xf32, #tpu.memory_space<vmem>>, vector<1x1x256xf32>
    %99 = vector.shape_cast %98 : vector<1x1x256xf32> to vector<1x256xf32>
    %100 = vector.broadcast %99 : vector<1x256xf32> to vector<32x256xf32>
    %101 = arith.mulf %100, %97 : vector<32x256xf32>
    %102 = arith.addf %93, %101 : vector<32x256xf32>
    %c5_96 = arith.constant 5 : index
    %c0_97 = arith.constant 0 : index
    %c0_98 = arith.constant 0 : index
    %103 = vector.load %arg2[%c5_96, %c0_97, %c0_98] : memref<7x32x56xf32, #tpu.memory_space<vmem>>, vector<1x32x56xf32>
    %104 = vector.shape_cast %103 : vector<1x32x56xf32> to vector<32x56xf32>
    %c0_99 = arith.constant 0 : index
    %c160 = arith.constant 160 : index
    %105 = vector.load %arg16[%c0_99, %c160] : memref<56x512xf32, #tpu.memory_space<vmem>>, vector<56x256xf32>
    %cst_100 = arith.constant dense<0.000000e+00> : vector<32x256xf32>
    %106 = tpu.matmul %104, %105, %cst_100 {dimension_numbers = #tpu.dot_dimension_numbers<[1], [0], [0], [1], [0, 0, 1, 1], [], []>} : vector<32x56xf32>, vector<56x256xf32>, vector<32x256xf32> -> vector<32x256xf32>
    %c5_101 = arith.constant 5 : index
    %c0_102 = arith.constant 0 : index
    %c0_103 = arith.constant 0 : index
    %107 = vector.load %arg5[%c5_101, %c0_102, %c0_103] : memref<7x1x256xf32, #tpu.memory_space<vmem>>, vector<1x1x256xf32>
    %108 = vector.shape_cast %107 : vector<1x1x256xf32> to vector<1x256xf32>
    %109 = vector.broadcast %108 : vector<1x256xf32> to vector<32x256xf32>
    %110 = arith.mulf %109, %106 : vector<32x256xf32>
    %111 = arith.addf %102, %110 : vector<32x256xf32>
    %c6_104 = arith.constant 6 : index
    %c0_105 = arith.constant 0 : index
    %c0_106 = arith.constant 0 : index
    %112 = vector.load %arg2[%c6_104, %c0_105, %c0_106] : memref<7x32x56xf32, #tpu.memory_space<vmem>>, vector<1x32x56xf32>
    %113 = vector.shape_cast %112 : vector<1x32x56xf32> to vector<32x56xf32>
    %c0_107 = arith.constant 0 : index
    %c176 = arith.constant 176 : index
    %114 = vector.load %arg16[%c0_107, %c176] : memref<56x512xf32, #tpu.memory_space<vmem>>, vector<56x256xf32>
    %cst_108 = arith.constant dense<0.000000e+00> : vector<32x256xf32>
    %115 = tpu.matmul %113, %114, %cst_108 {dimension_numbers = #tpu.dot_dimension_numbers<[1], [0], [0], [1], [0, 0, 1, 1], [], []>} : vector<32x56xf32>, vector<56x256xf32>, vector<32x256xf32> -> vector<32x256xf32>
    %c6_109 = arith.constant 6 : index
    %c0_110 = arith.constant 0 : index
    %c0_111 = arith.constant 0 : index
    %116 = vector.load %arg5[%c6_109, %c0_110, %c0_111] : memref<7x1x256xf32, #tpu.memory_space<vmem>>, vector<1x1x256xf32>
    %117 = vector.shape_cast %116 : vector<1x1x256xf32> to vector<1x256xf32>
    %118 = vector.broadcast %117 : vector<1x256xf32> to vector<32x256xf32>
    %119 = arith.mulf %118, %115 : vector<32x256xf32>
    %120 = arith.addf %111, %119 : vector<32x256xf32>
    %121 = vector.broadcast %56 : vector<32x1xf32> to vector<32x256xf32>
    %122 = arith.addf %120, %121 : vector<32x256xf32>
    %cst_112 = arith.constant 0.000000e+00 : f32
    %123 = vector.broadcast %cst_112 : f32 to vector<32x256xf32>
    %124 = arith.maximumf %122, %123 : vector<32x256xf32>
    %c0_113 = arith.constant 0 : index
    %c128_114 = arith.constant 128 : index
    %125 = vector.load %arg17[%c0_113, %c128_114] : memref<32x512xf32, #tpu.memory_space<vmem>>, vector<32x256xf32>
    tpu.vector_store %arg17[%c0_113, %c128_114], %124 {strides = array<i32>} : memref<32x512xf32, #tpu.memory_space<vmem>>, vector<32x256xf32>,
    %cst_115 = arith.constant 0.000000e+00 : f32
    %126 = vector.broadcast %cst_115 : f32 to vector<160x128xf32>
    %c0_116 = arith.constant 0 : index
    %c0_117 = arith.constant 0 : index
    %127 = vector.load %arg18[%c0_116, %c0_117] : memref<160x512xf32, #tpu.memory_space<vmem>>, vector<160x128xf32>
    tpu.vector_store %arg18[%c0_116, %c0_117], %126 {strides = array<i32>} : memref<160x512xf32, #tpu.memory_space<vmem>>, vector<160x128xf32>,
    %cst_118 = arith.constant 0.000000e+00 : f32
    %128 = vector.broadcast %cst_118 : f32 to vector<160x128xf32>
    %c0_119 = arith.constant 0 : index
    %c384_120 = arith.constant 384 : index
    %129 = vector.load %arg18[%c0_119, %c384_120] : memref<160x512xf32, #tpu.memory_space<vmem>>, vector<160x128xf32>
    tpu.vector_store %arg18[%c0_119, %c384_120], %128 {strides = array<i32>} : memref<160x512xf32, #tpu.memory_space<vmem>>, vector<160x128xf32>,
    %c0_121 = arith.constant 0 : index
    %c126_122 = arith.constant 126 : index
    %130 = vector.load %arg17[%c0_121, %c126_122] : memref<32x512xf32, #tpu.memory_space<vmem>>, vector<32x256xf32>
    %c0_123 = arith.constant 0 : index
    %c0_124 = arith.constant 0 : index
    %c0_125 = arith.constant 0 : index
    %131 = vector.load %arg8[%c0_123, %c0_124, %c0_125] : memref<5x1x256xf32, #tpu.memory_space<vmem>>, vector<1x1x256xf32>
    %132 = vector.shape_cast %131 : vector<1x1x256xf32> to vector<1x256xf32>
    %133 = vector.broadcast %132 : vector<1x256xf32> to vector<32x256xf32>
    %134 = arith.mulf %130, %133 : vector<32x256xf32>
    %c0_126 = arith.constant 0 : index
    %c128_127 = arith.constant 128 : index
    %135 = vector.load %arg18[%c0_126, %c128_127] : memref<160x512xf32, #tpu.memory_space<vmem>>, vector<32x256xf32>
    tpu.vector_store %arg18[%c0_126, %c128_127], %134 {strides = array<i32>} : memref<160x512xf32, #tpu.memory_space<vmem>>, vector<32x256xf32>,
    %c0_128 = arith.constant 0 : index
    %c127_129 = arith.constant 127 : index
    %136 = vector.load %arg17[%c0_128, %c127_129] : memref<32x512xf32, #tpu.memory_space<vmem>>, vector<32x256xf32>
    %c1_130 = arith.constant 1 : index
    %c0_131 = arith.constant 0 : index
    %c0_132 = arith.constant 0 : index
    %137 = vector.load %arg8[%c1_130, %c0_131, %c0_132] : memref<5x1x256xf32, #tpu.memory_space<vmem>>, vector<1x1x256xf32>
    %138 = vector.shape_cast %137 : vector<1x1x256xf32> to vector<1x256xf32>
    %139 = vector.broadcast %138 : vector<1x256xf32> to vector<32x256xf32>
    %140 = arith.mulf %136, %139 : vector<32x256xf32>
    %c32_133 = arith.constant 32 : index
    %c128_134 = arith.constant 128 : index
    %141 = vector.load %arg18[%c32_133, %c128_134] : memref<160x512xf32, #tpu.memory_space<vmem>>, vector<32x256xf32>
    tpu.vector_store %arg18[%c32_133, %c128_134], %140 {strides = array<i32>} : memref<160x512xf32, #tpu.memory_space<vmem>>, vector<32x256xf32>,
    %c0_135 = arith.constant 0 : index
    %c128_136 = arith.constant 128 : index
    %142 = vector.load %arg17[%c0_135, %c128_136] : memref<32x512xf32, #tpu.memory_space<vmem>>, vector<32x256xf32>
    %c64 = arith.constant 64 : index
    %c128_137 = arith.constant 128 : index
    %143 = vector.load %arg18[%c64, %c128_137] : memref<160x512xf32, #tpu.memory_space<vmem>>, vector<32x256xf32>
    tpu.vector_store %arg18[%c64, %c128_137], %142 {strides = array<i32>} : memref<160x512xf32, #tpu.memory_space<vmem>>, vector<32x256xf32>,
    %c0_138 = arith.constant 0 : index
    %c129_139 = arith.constant 129 : index
    %144 = vector.load %arg17[%c0_138, %c129_139] : memref<32x512xf32, #tpu.memory_space<vmem>>, vector<32x256xf32>
    %c3_140 = arith.constant 3 : index
    %c0_141 = arith.constant 0 : index
    %c0_142 = arith.constant 0 : index
    %145 = vector.load %arg8[%c3_140, %c0_141, %c0_142] : memref<5x1x256xf32, #tpu.memory_space<vmem>>, vector<1x1x256xf32>
    %146 = vector.shape_cast %145 : vector<1x1x256xf32> to vector<1x256xf32>
    %147 = vector.broadcast %146 : vector<1x256xf32> to vector<32x256xf32>
    %148 = arith.mulf %144, %147 : vector<32x256xf32>
    %c96_143 = arith.constant 96 : index
    %c128_144 = arith.constant 128 : index
    %149 = vector.load %arg18[%c96_143, %c128_144] : memref<160x512xf32, #tpu.memory_space<vmem>>, vector<32x256xf32>
    tpu.vector_store %arg18[%c96_143, %c128_144], %148 {strides = array<i32>} : memref<160x512xf32, #tpu.memory_space<vmem>>, vector<32x256xf32>,
    %c0_145 = arith.constant 0 : index
    %c130_146 = arith.constant 130 : index
    %150 = vector.load %arg17[%c0_145, %c130_146] : memref<32x512xf32, #tpu.memory_space<vmem>>, vector<32x256xf32>
    %c4_147 = arith.constant 4 : index
    %c0_148 = arith.constant 0 : index
    %c0_149 = arith.constant 0 : index
    %151 = vector.load %arg8[%c4_147, %c0_148, %c0_149] : memref<5x1x256xf32, #tpu.memory_space<vmem>>, vector<1x1x256xf32>
    %152 = vector.shape_cast %151 : vector<1x1x256xf32> to vector<1x256xf32>
    %153 = vector.broadcast %152 : vector<1x256xf32> to vector<32x256xf32>
    %154 = arith.mulf %150, %153 : vector<32x256xf32>
    %c128_150 = arith.constant 128 : index
    %c128_151 = arith.constant 128 : index
    %155 = vector.load %arg18[%c128_150, %c128_151] : memref<160x512xf32, #tpu.memory_space<vmem>>, vector<32x256xf32>
    tpu.vector_store %arg18[%c128_150, %c128_151], %154 {strides = array<i32>} : memref<160x512xf32, #tpu.memory_space<vmem>>, vector<32x256xf32>,
    %c0_152 = arith.constant 0 : index
    %c0_153 = arith.constant 0 : index
    %156 = vector.load %arg7[%c0_152, %c0_153] : memref<32x1xf32, #tpu.memory_space<vmem>>, vector<32x1xf32>
    %cst_154 = arith.constant 0.000000e+00 : f32
    %157 = vector.broadcast %cst_154 : f32 to vector<32x256xf32>
    %c0_155 = arith.constant 0 : index
    %c0_156 = arith.constant 0 : index
    %c0_157 = arith.constant 0 : index
    %158 = vector.load %arg6[%c0_155, %c0_156, %c0_157] : memref<5x32x160xf32, #tpu.memory_space<vmem>>, vector<1x32x160xf32>
    %159 = vector.shape_cast %158 : vector<1x32x160xf32> to vector<32x160xf32>
    %c0_158 = arith.constant 0 : index
    %c96_159 = arith.constant 96 : index
    %160 = vector.load %arg18[%c0_158, %c96_159] : memref<160x512xf32, #tpu.memory_space<vmem>>, vector<160x256xf32>
    %cst_160 = arith.constant dense<0.000000e+00> : vector<32x256xf32>
    %161 = tpu.matmul %159, %160, %cst_160 {dimension_numbers = #tpu.dot_dimension_numbers<[1], [0], [0], [1], [0, 0, 1, 1], [], []>} : vector<32x160xf32>, vector<160x256xf32>, vector<32x256xf32> -> vector<32x256xf32>
    %c0_161 = arith.constant 0 : index
    %c0_162 = arith.constant 0 : index
    %c0_163 = arith.constant 0 : index
    %162 = vector.load %arg9[%c0_161, %c0_162, %c0_163] : memref<5x1x256xf32, #tpu.memory_space<vmem>>, vector<1x1x256xf32>
    %163 = vector.shape_cast %162 : vector<1x1x256xf32> to vector<1x256xf32>
    %164 = vector.broadcast %163 : vector<1x256xf32> to vector<32x256xf32>
    %165 = arith.mulf %164, %161 : vector<32x256xf32>
    %166 = arith.addf %157, %165 : vector<32x256xf32>
    %c1_164 = arith.constant 1 : index
    %c0_165 = arith.constant 0 : index
    %c0_166 = arith.constant 0 : index
    %167 = vector.load %arg6[%c1_164, %c0_165, %c0_166] : memref<5x32x160xf32, #tpu.memory_space<vmem>>, vector<1x32x160xf32>
    %168 = vector.shape_cast %167 : vector<1x32x160xf32> to vector<32x160xf32>
    %c0_167 = arith.constant 0 : index
    %c112_168 = arith.constant 112 : index
    %169 = vector.load %arg18[%c0_167, %c112_168] : memref<160x512xf32, #tpu.memory_space<vmem>>, vector<160x256xf32>
    %cst_169 = arith.constant dense<0.000000e+00> : vector<32x256xf32>
    %170 = tpu.matmul %168, %169, %cst_169 {dimension_numbers = #tpu.dot_dimension_numbers<[1], [0], [0], [1], [0, 0, 1, 1], [], []>} : vector<32x160xf32>, vector<160x256xf32>, vector<32x256xf32> -> vector<32x256xf32>
    %c1_170 = arith.constant 1 : index
    %c0_171 = arith.constant 0 : index
    %c0_172 = arith.constant 0 : index
    %171 = vector.load %arg9[%c1_170, %c0_171, %c0_172] : memref<5x1x256xf32, #tpu.memory_space<vmem>>, vector<1x1x256xf32>
    %172 = vector.shape_cast %171 : vector<1x1x256xf32> to vector<1x256xf32>
    %173 = vector.broadcast %172 : vector<1x256xf32> to vector<32x256xf32>
    %174 = arith.mulf %173, %170 : vector<32x256xf32>
    %175 = arith.addf %166, %174 : vector<32x256xf32>
    %c2_173 = arith.constant 2 : index
    %c0_174 = arith.constant 0 : index
    %c0_175 = arith.constant 0 : index
    %176 = vector.load %arg6[%c2_173, %c0_174, %c0_175] : memref<5x32x160xf32, #tpu.memory_space<vmem>>, vector<1x32x160xf32>
    %177 = vector.shape_cast %176 : vector<1x32x160xf32> to vector<32x160xf32>
    %c0_176 = arith.constant 0 : index
    %c128_177 = arith.constant 128 : index
    %178 = vector.load %arg18[%c0_176, %c128_177] : memref<160x512xf32, #tpu.memory_space<vmem>>, vector<160x256xf32>
    %cst_178 = arith.constant dense<0.000000e+00> : vector<32x256xf32>
    %179 = tpu.matmul %177, %178, %cst_178 {dimension_numbers = #tpu.dot_dimension_numbers<[1], [0], [0], [1], [0, 0, 1, 1], [], []>} : vector<32x160xf32>, vector<160x256xf32>, vector<32x256xf32> -> vector<32x256xf32>
    %c2_179 = arith.constant 2 : index
    %c0_180 = arith.constant 0 : index
    %c0_181 = arith.constant 0 : index
    %180 = vector.load %arg9[%c2_179, %c0_180, %c0_181] : memref<5x1x256xf32, #tpu.memory_space<vmem>>, vector<1x1x256xf32>
    %181 = vector.shape_cast %180 : vector<1x1x256xf32> to vector<1x256xf32>
    %182 = vector.broadcast %181 : vector<1x256xf32> to vector<32x256xf32>
    %183 = arith.mulf %182, %179 : vector<32x256xf32>
    %184 = arith.addf %175, %183 : vector<32x256xf32>
    %c3_182 = arith.constant 3 : index
    %c0_183 = arith.constant 0 : index
    %c0_184 = arith.constant 0 : index
    %185 = vector.load %arg6[%c3_182, %c0_183, %c0_184] : memref<5x32x160xf32, #tpu.memory_space<vmem>>, vector<1x32x160xf32>
    %186 = vector.shape_cast %185 : vector<1x32x160xf32> to vector<32x160xf32>
    %c0_185 = arith.constant 0 : index
    %c144_186 = arith.constant 144 : index
    %187 = vector.load %arg18[%c0_185, %c144_186] : memref<160x512xf32, #tpu.memory_space<vmem>>, vector<160x256xf32>
    %cst_187 = arith.constant dense<0.000000e+00> : vector<32x256xf32>
    %188 = tpu.matmul %186, %187, %cst_187 {dimension_numbers = #tpu.dot_dimension_numbers<[1], [0], [0], [1], [0, 0, 1, 1], [], []>} : vector<32x160xf32>, vector<160x256xf32>, vector<32x256xf32> -> vector<32x256xf32>
    %c3_188 = arith.constant 3 : index
    %c0_189 = arith.constant 0 : index
    %c0_190 = arith.constant 0 : index
    %189 = vector.load %arg9[%c3_188, %c0_189, %c0_190] : memref<5x1x256xf32, #tpu.memory_space<vmem>>, vector<1x1x256xf32>
    %190 = vector.shape_cast %189 : vector<1x1x256xf32> to vector<1x256xf32>
    %191 = vector.broadcast %190 : vector<1x256xf32> to vector<32x256xf32>
    %192 = arith.mulf %191, %188 : vector<32x256xf32>
    %193 = arith.addf %184, %192 : vector<32x256xf32>
    %c4_191 = arith.constant 4 : index
    %c0_192 = arith.constant 0 : index
    %c0_193 = arith.constant 0 : index
    %194 = vector.load %arg6[%c4_191, %c0_192, %c0_193] : memref<5x32x160xf32, #tpu.memory_space<vmem>>, vector<1x32x160xf32>
    %195 = vector.shape_cast %194 : vector<1x32x160xf32> to vector<32x160xf32>
    %c0_194 = arith.constant 0 : index
    %c160_195 = arith.constant 160 : index
    %196 = vector.load %arg18[%c0_194, %c160_195] : memref<160x512xf32, #tpu.memory_space<vmem>>, vector<160x256xf32>
    %cst_196 = arith.constant dense<0.000000e+00> : vector<32x256xf32>
    %197 = tpu.matmul %195, %196, %cst_196 {dimension_numbers = #tpu.dot_dimension_numbers<[1], [0], [0], [1], [0, 0, 1, 1], [], []>} : vector<32x160xf32>, vector<160x256xf32>, vector<32x256xf32> -> vector<32x256xf32>
    %c4_197 = arith.constant 4 : index
    %c0_198 = arith.constant 0 : index
    %c0_199 = arith.constant 0 : index
    %198 = vector.load %arg9[%c4_197, %c0_198, %c0_199] : memref<5x1x256xf32, #tpu.memory_space<vmem>>, vector<1x1x256xf32>
    %199 = vector.shape_cast %198 : vector<1x1x256xf32> to vector<1x256xf32>
    %200 = vector.broadcast %199 : vector<1x256xf32> to vector<32x256xf32>
    %201 = arith.mulf %200, %197 : vector<32x256xf32>
    %202 = arith.addf %193, %201 : vector<32x256xf32>
    %203 = vector.broadcast %156 : vector<32x1xf32> to vector<32x256xf32>
    %204 = arith.addf %202, %203 : vector<32x256xf32>
    %cst_200 = arith.constant 0.000000e+00 : f32
    %205 = vector.broadcast %cst_200 : f32 to vector<32x256xf32>
    %206 = arith.maximumf %204, %205 : vector<32x256xf32>
    %c0_201 = arith.constant 0 : index
    %c128_202 = arith.constant 128 : index
    %207 = vector.load %arg19[%c0_201, %c128_202] : memref<32x512xf32, #tpu.memory_space<vmem>>, vector<32x256xf32>
    tpu.vector_store %arg19[%c0_201, %c128_202], %206 {strides = array<i32>} : memref<32x512xf32, #tpu.memory_space<vmem>>, vector<32x256xf32>,
    %cst_203 = arith.constant 0.000000e+00 : f32
    %208 = vector.broadcast %cst_203 : f32 to vector<96x128xf32>
    %c0_204 = arith.constant 0 : index
    %c0_205 = arith.constant 0 : index
    %209 = vector.load %arg20[%c0_204, %c0_205] : memref<96x512xf32, #tpu.memory_space<vmem>>, vector<96x128xf32>
    tpu.vector_store %arg20[%c0_204, %c0_205], %208 {strides = array<i32>} : memref<96x512xf32, #tpu.memory_space<vmem>>, vector<96x128xf32>,
    %cst_206 = arith.constant 0.000000e+00 : f32
    %210 = vector.broadcast %cst_206 : f32 to vector<96x128xf32>
    %c0_207 = arith.constant 0 : index
    %c384_208 = arith.constant 384 : index
    %211 = vector.load %arg20[%c0_207, %c384_208] : memref<96x512xf32, #tpu.memory_space<vmem>>, vector<96x128xf32>
    tpu.vector_store %arg20[%c0_207, %c384_208], %210 {strides = array<i32>} : memref<96x512xf32, #tpu.memory_space<vmem>>, vector<96x128xf32>,
    %c0_209 = arith.constant 0 : index
    %c127_210 = arith.constant 127 : index
    %212 = vector.load %arg19[%c0_209, %c127_210] : memref<32x512xf32, #tpu.memory_space<vmem>>, vector<32x256xf32>
    %c0_211 = arith.constant 0 : index
    %c0_212 = arith.constant 0 : index
    %c0_213 = arith.constant 0 : index
    %213 = vector.load %arg12[%c0_211, %c0_212, %c0_213] : memref<3x1x256xf32, #tpu.memory_space<vmem>>, vector<1x1x256xf32>
    %214 = vector.shape_cast %213 : vector<1x1x256xf32> to vector<1x256xf32>
    %215 = vector.broadcast %214 : vector<1x256xf32> to vector<32x256xf32>
    %216 = arith.mulf %212, %215 : vector<32x256xf32>
    %c0_214 = arith.constant 0 : index
    %c128_215 = arith.constant 128 : index
    %217 = vector.load %arg20[%c0_214, %c128_215] : memref<96x512xf32, #tpu.memory_space<vmem>>, vector<32x256xf32>
    tpu.vector_store %arg20[%c0_214, %c128_215], %216 {strides = array<i32>} : memref<96x512xf32, #tpu.memory_space<vmem>>, vector<32x256xf32>,
    %c0_216 = arith.constant 0 : index
    %c128_217 = arith.constant 128 : index
    %218 = vector.load %arg19[%c0_216, %c128_217] : memref<32x512xf32, #tpu.memory_space<vmem>>, vector<32x256xf32>
    %c32_218 = arith.constant 32 : index
    %c128_219 = arith.constant 128 : index
    %219 = vector.load %arg20[%c32_218, %c128_219] : memref<96x512xf32, #tpu.memory_space<vmem>>, vector<32x256xf32>
    tpu.vector_store %arg20[%c32_218, %c128_219], %218 {strides = array<i32>} : memref<96x512xf32, #tpu.memory_space<vmem>>, vector<32x256xf32>,
    %c0_220 = arith.constant 0 : index
    %c129_221 = arith.constant 129 : index
    %220 = vector.load %arg19[%c0_220, %c129_221] : memref<32x512xf32, #tpu.memory_space<vmem>>, vector<32x256xf32>
    %c2_222 = arith.constant 2 : index
    %c0_223 = arith.constant 0 : index
    %c0_224 = arith.constant 0 : index
    %221 = vector.load %arg12[%c2_222, %c0_223, %c0_224] : memref<3x1x256xf32, #tpu.memory_space<vmem>>, vector<1x1x256xf32>
    %222 = vector.shape_cast %221 : vector<1x1x256xf32> to vector<1x256xf32>
    %223 = vector.broadcast %222 : vector<1x256xf32> to vector<32x256xf32>
    %224 = arith.mulf %220, %223 : vector<32x256xf32>
    %c64_225 = arith.constant 64 : index
    %c128_226 = arith.constant 128 : index
    %225 = vector.load %arg20[%c64_225, %c128_226] : memref<96x512xf32, #tpu.memory_space<vmem>>, vector<32x256xf32>
    tpu.vector_store %arg20[%c64_225, %c128_226], %224 {strides = array<i32>} : memref<96x512xf32, #tpu.memory_space<vmem>>, vector<32x256xf32>,
    %c0_227 = arith.constant 0 : index
    %c0_228 = arith.constant 0 : index
    %226 = vector.load %arg11[%c0_227, %c0_228] : memref<8x1xf32, #tpu.memory_space<vmem>>, vector<8x1xf32>
    %cst_229 = arith.constant 0.000000e+00 : f32
    %227 = vector.broadcast %cst_229 : f32 to vector<8x256xf32>
    %c0_230 = arith.constant 0 : index
    %c0_231 = arith.constant 0 : index
    %c0_232 = arith.constant 0 : index
    %228 = vector.load %arg10[%c0_230, %c0_231, %c0_232] : memref<3x8x96xf32, #tpu.memory_space<vmem>>, vector<1x8x96xf32>
    %229 = vector.shape_cast %228 : vector<1x8x96xf32> to vector<8x96xf32>
    %c0_233 = arith.constant 0 : index
    %c112_234 = arith.constant 112 : index
    %230 = vector.load %arg20[%c0_233, %c112_234] : memref<96x512xf32, #tpu.memory_space<vmem>>, vector<96x256xf32>
    %cst_235 = arith.constant dense<0.000000e+00> : vector<8x256xf32>
    %231 = tpu.matmul %229, %230, %cst_235 {dimension_numbers = #tpu.dot_dimension_numbers<[1], [0], [0], [1], [0, 0, 1, 1], [], []>} : vector<8x96xf32>, vector<96x256xf32>, vector<8x256xf32> -> vector<8x256xf32>
    %c0_236 = arith.constant 0 : index
    %c0_237 = arith.constant 0 : index
    %c0_238 = arith.constant 0 : index
    %232 = vector.load %arg13[%c0_236, %c0_237, %c0_238] : memref<3x1x256xf32, #tpu.memory_space<vmem>>, vector<1x1x256xf32>
    %233 = vector.shape_cast %232 : vector<1x1x256xf32> to vector<1x256xf32>
    %234 = vector.broadcast %233 : vector<1x256xf32> to vector<8x256xf32>
    %235 = arith.mulf %234, %231 : vector<8x256xf32>
    %236 = arith.addf %227, %235 : vector<8x256xf32>
    %c1_239 = arith.constant 1 : index
    %c0_240 = arith.constant 0 : index
    %c0_241 = arith.constant 0 : index
    %237 = vector.load %arg10[%c1_239, %c0_240, %c0_241] : memref<3x8x96xf32, #tpu.memory_space<vmem>>, vector<1x8x96xf32>
    %238 = vector.shape_cast %237 : vector<1x8x96xf32> to vector<8x96xf32>
    %c0_242 = arith.constant 0 : index
    %c128_243 = arith.constant 128 : index
    %239 = vector.load %arg20[%c0_242, %c128_243] : memref<96x512xf32, #tpu.memory_space<vmem>>, vector<96x256xf32>
    %cst_244 = arith.constant dense<0.000000e+00> : vector<8x256xf32>
    %240 = tpu.matmul %238, %239, %cst_244 {dimension_numbers = #tpu.dot_dimension_numbers<[1], [0], [0], [1], [0, 0, 1, 1], [], []>} : vector<8x96xf32>, vector<96x256xf32>, vector<8x256xf32> -> vector<8x256xf32>
    %c1_245 = arith.constant 1 : index
    %c0_246 = arith.constant 0 : index
    %c0_247 = arith.constant 0 : index
    %241 = vector.load %arg13[%c1_245, %c0_246, %c0_247] : memref<3x1x256xf32, #tpu.memory_space<vmem>>, vector<1x1x256xf32>
    %242 = vector.shape_cast %241 : vector<1x1x256xf32> to vector<1x256xf32>
    %243 = vector.broadcast %242 : vector<1x256xf32> to vector<8x256xf32>
    %244 = arith.mulf %243, %240 : vector<8x256xf32>
    %245 = arith.addf %236, %244 : vector<8x256xf32>
    %c2_248 = arith.constant 2 : index
    %c0_249 = arith.constant 0 : index
    %c0_250 = arith.constant 0 : index
    %246 = vector.load %arg10[%c2_248, %c0_249, %c0_250] : memref<3x8x96xf32, #tpu.memory_space<vmem>>, vector<1x8x96xf32>
    %247 = vector.shape_cast %246 : vector<1x8x96xf32> to vector<8x96xf32>
    %c0_251 = arith.constant 0 : index
    %c144_252 = arith.constant 144 : index
    %248 = vector.load %arg20[%c0_251, %c144_252] : memref<96x512xf32, #tpu.memory_space<vmem>>, vector<96x256xf32>
    %cst_253 = arith.constant dense<0.000000e+00> : vector<8x256xf32>
    %249 = tpu.matmul %247, %248, %cst_253 {dimension_numbers = #tpu.dot_dimension_numbers<[1], [0], [0], [1], [0, 0, 1, 1], [], []>} : vector<8x96xf32>, vector<96x256xf32>, vector<8x256xf32> -> vector<8x256xf32>
    %c2_254 = arith.constant 2 : index
    %c0_255 = arith.constant 0 : index
    %c0_256 = arith.constant 0 : index
    %250 = vector.load %arg13[%c2_254, %c0_255, %c0_256] : memref<3x1x256xf32, #tpu.memory_space<vmem>>, vector<1x1x256xf32>
    %251 = vector.shape_cast %250 : vector<1x1x256xf32> to vector<1x256xf32>
    %252 = vector.broadcast %251 : vector<1x256xf32> to vector<8x256xf32>
    %253 = arith.mulf %252, %249 : vector<8x256xf32>
    %254 = arith.addf %245, %253 : vector<8x256xf32>
    %255 = vector.broadcast %226 : vector<8x1xf32> to vector<8x256xf32>
    %256 = arith.addf %254, %255 : vector<8x256xf32>
    %cst_257 = arith.constant 0.000000e+00 : f32
    %257 = vector.broadcast %cst_257 : f32 to vector<8x256xf32>
    %258 = arith.maximumf %256, %257 : vector<8x256xf32>
    %c0_258 = arith.constant 0 : index
    %c0_259 = arith.constant 0 : index
    %259 = vector.load %arg14[%c0_258, %c0_259] : memref<8x256xf32, #tpu.memory_space<vmem>>, vector<8x256xf32>
    tpu.vector_store %arg14[%c0_258, %c0_259], %258 {strides = array<i32>} : memref<8x256xf32, #tpu.memory_space<vmem>>, vector<8x256xf32>,
    return
  }
  func.func @transform_0(%arg0: i32) -> (i32, i32) {
    %c0_i32 = arith.constant 0 : i32
    %c0_i32_0 = arith.constant 0 : i32
    return %c0_i32, %arg0 : i32, i32
  }
  func.func @transform_1(%arg0: i32) -> (i32, i32, i32) {
    %c0_i32 = arith.constant 0 : i32
    %c0_i32_0 = arith.constant 0 : i32
    %c0_i32_1 = arith.constant 0 : i32
    %c0_i32_2 = arith.constant 0 : i32
    return %c0_i32, %c0_i32_0, %c0_i32_1 : i32, i32, i32
  }
  func.func @transform_2(%arg0: i32) -> (i32, i32) {
    %c0_i32 = arith.constant 0 : i32
    %c0_i32_0 = arith.constant 0 : i32
    %c0_i32_1 = arith.constant 0 : i32
    return %c0_i32, %c0_i32_0 : i32, i32
  }
  func.func @transform_3(%arg0: i32) -> (i32, i32, i32) {
    %c0_i32 = arith.constant 0 : i32
    %c0_i32_0 = arith.constant 0 : i32
    %c0_i32_1 = arith.constant 0 : i32
    %c0_i32_2 = arith.constant 0 : i32
    return %c0_i32, %c0_i32_0, %c0_i32_1 : i32, i32, i32
  }
  func.func @transform_4(%arg0: i32) -> (i32, i32, i32) {
    %c0_i32 = arith.constant 0 : i32
    %c0_i32_0 = arith.constant 0 : i32
    %c0_i32_1 = arith.constant 0 : i32
    %c0_i32_2 = arith.constant 0 : i32
    return %c0_i32, %c0_i32_0, %c0_i32_1 : i32, i32, i32
  }
  func.func @transform_5(%arg0: i32) -> (i32, i32, i32) {
    %c0_i32 = arith.constant 0 : i32
    %c0_i32_0 = arith.constant 0 : i32
    %c0_i32_1 = arith.constant 0 : i32
    %c0_i32_2 = arith.constant 0 : i32
    return %c0_i32, %c0_i32_0, %c0_i32_1 : i32, i32, i32
  }
  func.func @transform_6(%arg0: i32) -> (i32, i32) {
    %c0_i32 = arith.constant 0 : i32
    %c0_i32_0 = arith.constant 0 : i32
    %c0_i32_1 = arith.constant 0 : i32
    return %c0_i32, %c0_i32_0 : i32, i32
  }
  func.func @transform_7(%arg0: i32) -> (i32, i32, i32) {
    %c0_i32 = arith.constant 0 : i32
    %c0_i32_0 = arith.constant 0 : i32
    %c0_i32_1 = arith.constant 0 : i32
    %c0_i32_2 = arith.constant 0 : i32
    return %c0_i32, %c0_i32_0, %c0_i32_1 : i32, i32, i32
  }
  func.func @transform_8(%arg0: i32) -> (i32, i32, i32) {
    %c0_i32 = arith.constant 0 : i32
    %c0_i32_0 = arith.constant 0 : i32
    %c0_i32_1 = arith.constant 0 : i32
    %c0_i32_2 = arith.constant 0 : i32
    return %c0_i32, %c0_i32_0, %c0_i32_1 : i32, i32, i32
  }
  func.func @transform_9(%arg0: i32) -> (i32, i32, i32) {
    %c0_i32 = arith.constant 0 : i32
    %c0_i32_0 = arith.constant 0 : i32
    %c0_i32_1 = arith.constant 0 : i32
    %c0_i32_2 = arith.constant 0 : i32
    return %c0_i32, %c0_i32_0, %c0_i32_1 : i32, i32, i32
  }
  func.func @transform_10(%arg0: i32) -> (i32, i32) {
    %c0_i32 = arith.constant 0 : i32
    %c0_i32_0 = arith.constant 0 : i32
    %c0_i32_1 = arith.constant 0 : i32
    return %c0_i32, %c0_i32_0 : i32, i32
  }
  func.func @transform_11(%arg0: i32) -> (i32, i32, i32) {
    %c0_i32 = arith.constant 0 : i32
    %c0_i32_0 = arith.constant 0 : i32
    %c0_i32_1 = arith.constant 0 : i32
    %c0_i32_2 = arith.constant 0 : i32
    return %c0_i32, %c0_i32_0, %c0_i32_1 : i32, i32, i32
  }
  func.func @transform_12(%arg0: i32) -> (i32, i32, i32) {
    %c0_i32 = arith.constant 0 : i32
    %c0_i32_0 = arith.constant 0 : i32
    %c0_i32_1 = arith.constant 0 : i32
    %c0_i32_2 = arith.constant 0 : i32
    return %c0_i32, %c0_i32_0, %c0_i32_1 : i32, i32, i32
  }
  func.func @transform_13(%arg0: i32) -> (i32, i32) {
    %c0_i32 = arith.constant 0 : i32
    %c0_i32_0 = arith.constant 0 : i32
    return %c0_i32, %arg0 : i32, i32
  }
}

</mosaic_0001>

<bundles_post_ra>
// kernel: tpu_custom_call.1
= control target key start
LH: loop header
LB: loop body
LE: loop exit
PB: predicated region body
PF: predicated region fallthrough
CT: control target
= control target key end

     0   :  { %18 = vsyncpa [#allocation9], 0  ;;  %s9636_s0 = inlined_call_operand.vmem [shape: f32[8,512], index: 0, kind: input, shape index: {}]   ;;  %s9637_s1 = inlined_call_operand.hbm [shape: f32[7,32,56], index: 1, kind: input, shape index: {}]   ;;  %s9638_s2 = inlined_call_operand.vmem [shape: f32[32,1], index: 2, kind: input, shape index: {}]   ;;  %s9639_s3 = inlined_call_operand.vmem [shape: f32[7,1,256], index: 3, kind: input, shape index: {}]   ;;  %s9640_s4 = inlined_call_operand.hbm [shape: f32[7,1,256], index: 4, kind: input, shape index: {}]   ;;  %s9641_s5 = inlined_call_operand.hbm [shape: f32[5,32,160], index: 5, kind: input, shape index: {}]   ;;  %s9642_s6 = inlined_call_operand.vmem [shape: f32[32,1], index: 6, kind: input, shape index: {}]   ;;  %s9643_s7 = inlined_call_operand.vmem [shape: f32[5,1,256], index: 7, kind: input, shape index: {}]   ;;  %s9644_s8 = inlined_call_operand.hbm [shape: f32[5,1,256], index: 8, kind: input, shape index: {}]   ;;  %s9645_s9 = inlined_call_operand.vmem [shape: f32[3,8,96], index: 9, kind: input, shape index: {}]   ;;  %s9646_s10 = inlined_call_operand.vmem [shape: f32[8,1], index: 10, kind: input, shape index: {}]   ;;  %s9647_s11 = inlined_call_operand.vmem [shape: f32[3,1,256], index: 11, kind: input, shape index: {}]   ;;  %s9648_s12 = inlined_call_operand.vmem [shape: f32[3,1,256], index: 12, kind: input, shape index: {}]   ;;  %s9649_s13 = inlined_call_operand.hbm [shape: f32[8,512], index: 13, kind: output, shape index: {}]  }
   0x1   :  { %19 = vsyncpa [#allocation12], 0 }
   0x2   :  { %20 = vsyncpa [#allocation15], 0 }
   0x3   :  { %21 = vsyncpa [#allocation10], 0 }
   0x4   :  { %23 = vsyncpa [#allocation10 + $0x1], 0  ;;  %s6379_s25 = smov 0   ;;  %s6381_s26 = smov 0  }
   0x5   :  { %s6383_s27 = smov 0   ;;  %s6385_s28 = smov 0  }
   0x6 LB: > { %9767 = sst [smem:[#allocation21_spill]] %s6270_s25  ;;  %s6400_s29 = sadd.s32 4294967295, %s6282_s28   ;;  %s6282_s28 = sphi %s6385_s28, %s10078_s28   ;;  %s6278_s27 = sphi %s6383_s27, %s10080_s27   ;;  %s6274_s26 = sphi %s6381_s26, %s10082_s26   ;;  %s6270_s25 = sphi %s6379_s25, %s10081_s25  }
   0x7   : > { %9768 = sst [smem:[#allocation22_spill]] %s6278_s27  ;;  %s5569_s30 = sadd.s32 4294967294, %s6282_s28  }
   0x8   : > { %s6404_s14 = sadd.s32 1, %s6282_s28   ;;  %s314_s15 = sadd.s32 1, %s6278_s27 }
   0x9   : > { %9769 = sst [smem:[#allocation23_spill]] %s6404_s14  ;;  %s311_s16 = ssub.s32 %s6282_s28, %s6404_s14 }
   0xa   : > { %p324_p0 = scmp.ne.s32.totalorder %s6278_s27, %s6274_s26  ;;  %p312_p1 = scmp.eq.s32.totalorder %s311_s16, 0 }
   0xb   : > { %p325_p2 = scmp.eq.s32.totalorder %s6400_s29, 1  ;;  %p330_p3 = scmp.ne.s32.totalorder %s6274_s26, %s6270_s25 }
   0xc   : > { %p331_p4 = scmp.eq.s32.totalorder %s5569_s30, 1  ;;  %p5570_p7 = scmp.ge.s32.totalorder %s6282_s28, 1 }
   0xd   : > { %s6415_s17 = scalar_select %p312_p1, %s6278_s27, %s314_s15  }
   0xe   : > { %p6417_p5 = por %p325_p2, %p324_p0  ;;  %p6421_p6 = por %p331_p4, %p330_p3 }
   0xf   : > { %9770 = sst [smem:[#allocation24_spill]] %s6415_s17  ;;  %p338_p8 = scmp.lt.s32.totalorder %s6282_s28, 3 }
  0x10   : > { %s9772_s19 = scalar_select %p6421_p6, 1, 0 }
  0x11   : > { %p5689_p9 = scmp.eq.s32.totalorder %s6400_s29, 0  ;;  %p6428_p10 = pnand %p5570_p7, %p338_p8 }
  0x12   : > { %9773 = sst [smem:[#allocation25_spill]] %s9772_s19  ;;  %s6284_s21 = smov [#allocation11]  }
  0x13   : > { %s369_s22 = sshll.u32 %s6284_s21, 4  ;;  %p5672_p11 = pneg %p6428_p10  ;;  %s370_s22 = int_to_ptr.vmem [resolvable:$true] %s369_s22 }
  0x14   : > { %s6285_s24 = smov [#allocation8]   ;;  %s6117_s15 = scalar_lea.vmem %s370_s22, 224 }
  0x15   : > { %p6436_p12 = pnand %p5689_p9, %p5672_p11  ;;  %s350_s30 = sshll.u32 %s6285_s24, 4  ;;  %s351_s30 = int_to_ptr.vmem [resolvable:$true] %s350_s30 }
  0x16   : > { %p6118_p0 = scmp.ne.s32.totalorder %s370_s22, %s6117_s15  ;;  %p6125_p3 = scmp.lt.s32.totalorder %s370_s22, %s370_s22 }
  0x17   : > { %p6108_p13 = pneg %p6436_p12  ;;  %p6126_p4 = scmp.lt.s32.totalorder %s6117_s15, %s6117_s15 }
  0x19   : > { %p6120_p1 = pnand %p6118_p0, %p6108_p13  ;;  %p6127_p7 = por %p6126_p4, %p6125_p3 }
  0x1b   : > { %p6121_p2 = pneg %p6120_p1 }
  0x1d   : > { %p6128_p8 = pnand %p6127_p7, %p6121_p2 }
  0x1f   : > { %6131 = shalt.err (!%p6128_p8)
}
  0x20   : > { %s9655_s16 = smov 32   ;;  %s6287_s21 = smov 2  }
  0x21   : > { %5678 = dma.hbm_to_vmem [thread:$0]  (!%p6436_p12), %s9640_s4, 224, %s370_s22, [#allocation12], %s9655_s16, %s9655_s16, %s6287_s21  }
  0x22   : > { %s6143_s27 = scalar_lea.vmem %s351_s30, 3584  ;;  %p6151_p2 = scmp.lt.s32.totalorder %s351_s30, %s351_s30 }
  0x23   : > { %p6144_p11 = scmp.ne.s32.totalorder %s351_s30, %s6143_s27  ;;  %p6152_p3 = scmp.lt.s32.totalorder %s6143_s27, %s6143_s27 }
  0x25   : > { %p6146_p0 = pnand %p6144_p11, %p6108_p13  ;;  %p6153_p4 = por %p6152_p3, %p6151_p2 }
  0x27   : > { %p6147_p1 = pneg %p6146_p0 }
  0x29   : > { %p6154_p7 = pnand %p6153_p4, %p6147_p1 }
  0x2b   : > { %6157 = shalt.err (!%p6154_p7)
}
  0x2c   : > { %s6288_s15 = smov 128   ;;  %s6289_s14 = smov 8  }
  0x2d   : > { %5675 = dma.hbm_to_vmem [thread:$0]  (!%p6436_p12), %s9637_s1, 3584, %s351_s30, [#allocation9], %s6288_s15, %s6288_s15, %s6289_s14  }
  0x2e   : > { %s6290_s17 = smov [#allocation13]  }
  0x2f   : > { %s382_s22 = sshll.u32 %s6290_s17, 4  ;;  %s383_s22 = int_to_ptr.vmem [resolvable:$true] %s382_s22 }
  0x30   : > { %s6169_s24 = scalar_lea.vmem %s383_s22, 5120  ;;  %p6177_p1 = scmp.lt.s32.totalorder %s383_s22, %s383_s22 }
  0x31   : > { %p6170_p8 = scmp.ne.s32.totalorder %s383_s22, %s6169_s24  ;;  %p6178_p2 = scmp.lt.s32.totalorder %s6169_s24, %s6169_s24 }
  0x33   : > { %p6172_p11 = pnand %p6170_p8, %p6108_p13  ;;  %p6179_p3 = por %p6178_p2, %p6177_p1 }
  0x35   : > { %p6173_p0 = pneg %p6172_p11 }
  0x37   : > { %p6180_p4 = pnand %p6179_p3, %p6173_p0 }
  0x39   : > { %6183 = shalt.err (!%p6180_p4)
}
  0x3a   : > { %s6291_s27 = smov 256   ;;  %s6292_s16 = smov 16  }
  0x3b   : > { %5681 = dma.hbm_to_vmem [thread:$0]  (!%p6436_p12), %s9641_s5, 5120, %s383_s22, [#allocation12], %s6291_s27, %s6291_s27, %s6292_s16  }
  0x3c   : > { %s6293_s19 = smov [#allocation14]  }
  0x3d   : > { %s401_s30 = sshll.u32 %s6293_s19, 4  ;;  %s402_s30 = int_to_ptr.vmem [resolvable:$true] %s401_s30 }
  0x3e   : > { %s6195_s15 = scalar_lea.vmem %s402_s30, 160  ;;  %p6203_p0 = scmp.lt.s32.totalorder %s402_s30, %s402_s30 }
  0x3f   : > { %p6196_p7 = scmp.ne.s32.totalorder %s402_s30, %s6195_s15  ;;  %p6204_p1 = scmp.lt.s32.totalorder %s6195_s15, %s6195_s15 }
  0x41   : > { %p6198_p8 = pnand %p6196_p7, %p6108_p13  ;;  %p6205_p2 = por %p6204_p1, %p6203_p0 }
  0x43   : > { %p6199_p11 = pneg %p6198_p8 }
  0x45   : > { %p6206_p3 = pnand %p6205_p2, %p6199_p11 }
  0x47   : > { %6209 = shalt.err (!%p6206_p3)
}
  0x48   : > { %s9776_s17 = smov 32   ;;  %438 = sbr.rel (%p6428_p10) target bundleno = 2119 (0x847), region = 72 }
  0x49   : > { %5684 = dma.hbm_to_vmem [thread:$0]  (!%p6436_p12), %s9644_s8, 160, %s402_s30, [#allocation15], %s9776_s17, %s9776_s17, %s6287_s21  }
  0x4d   : > { %6253 = dma.done.wait (%p5689_p9), [#allocation9], 3584  }
  0x4e   : > { %6255 = vsyncadd (%p5689_p9), [#allocation9], 4294963712 }
  0x4f   : > { %6257 = dma.done.wait (%p5689_p9), [#allocation12], 5344  }
  0x50   : > { %6259 = vsyncadd (%p5689_p9), [#allocation12], 4294961952 }
  0x51   : > { %6261 = dma.done.wait (%p5689_p9), [#allocation15], 160  }
  0x52   : > { %6263 = vsyncadd (%p5689_p9), [#allocation15], 4294967136  ;;  %v542_v0 = vlaneseq  ;;  %v9656_v1 = vmov 0.0   ;;  %v5588_v5 = vld [vmem:[%s9639_s3 + $0xc] sm:$0x3]  ;;  %s6295_s27 = smov 3  }
  0x53   : > { %984 = vmatprep.mubr.f32.mxu0 %v9656_v1  ;;  %1189 = vmatprep.mubr.f32.mxu1 %v9656_v1  ;;  %v5587_v6 = vld [vmem:[%s9639_s3 + $0xa] sm:$0x3]  ;;  %s6296_s25 = smov 2   ;;  %v5586_v11 = vld [vmem:[%s9639_s3 + $0x8] sm:$0x3]  ;;  %s6297_s17 = smov 1  }
  0x54   : > { %v543_v2 = vshrl.u32 %v542_v0, 7  ;;  %v5585_v14 = vld [vmem:[%s9639_s3 + $0x4] sm:$0x3]  ;;  %s5582_s16 = sshll.u32 %s6400_s29, 1  ;;  %v5584_v17 = vld [vmem:[%s9639_s3 + $0x2] sm:$0x3] }
  0x55   : > { %p495_p9 = scmp.lt.s32.totalorder %s5582_s16, 3  ;;  %s6298_s23 = smov 127   ;;  %v540_v20 = vld [vmem:[%s9639_s3] sm:$0x3]  ;;  %vm613_vm0 = vcmask 15360   ;;  %vm571_vm1 = vcmask 23552  }
  0x56   : > { %v6496_v3 = vsub.s32 0, %v543_v2  ;;  %v6498_v4 = vsub.s32 1, %v543_v2  ;;  %s6299_s14 = smov 126   ;;  %s6300_s30 = smov 125   ;;  %vm638_vm2 = vcmask 1039360   ;;  %vm655_vm3 = vcmask 7168  }
  0x57   : > { %s10084_s16 = smov (!%p495_p9, %s5582_s16), 3  ;;  %s6301_s21 = smov 48   ;;  %vm554_vm4 = vcmask 1022976   ;;  %vm596_vm5 = vcmask 1031168   ;;  %vm878_vm6 = vcmask 392192   ;;  %vm907_vm7 = vcmask 457728  }
  0x58   : > { %9777 = vst [vmem:[#allocation26_spill] sm:$0xff] %v6496_v3  ;;  %9778 = vst [vmem:[#allocation27_spill] sm:$0xff] %v6498_v4  ;;  %v755_v7 = vrot.slane %v5588_v5, %v6496_v3  ;;  %v715_v8 = vrot.slane %v5587_v6, %v6496_v3  ;;  %v759_v9 = vrot.slane %v5588_v5, %v6498_v4  ;;  %s5583_s19 = sshll.u32 %s10084_s16, 3  ;;  %s6302_s16 = smov 32   ;;  %vm1084_vm8 = vcmask 261120  }
  0x59   : > { %v719_v10 = vrot.slane %v5587_v6, %v6498_v4  ;;  %v679_v12 = vrot.slane %v5586_v11, %v6498_v4  ;;  %v675_v13 = vrot.slane %v5586_v11, %v6496_v3  ;;  %v633_v15 = vrot.slane %v5585_v14, %v6498_v4  ;;  %s498_s20 = scalar_lea.vmem %s9636_s0, %s5583_s19  ;;  %s6303_s24 = smov 16  }
  0x5a   : > { %760 = vrot.lane.b32.xlu0 %v755_v7, %s6295_s27  ;;  %720 = vrot.lane.b32.xlu1 %v715_v8, %s6296_s25  ;;  %v629_v16 = vrot.slane %v5585_v14, %v6496_v3  ;;  %v591_v18 = vrot.slane %v5584_v17, %v6498_v4  ;;  %v587_v19 = vrot.slane %v5584_v17, %v6496_v3  ;;  %v6550_v23 = vld [vmem:[%s498_s20] sm:$0xff]  ;;  %v6552_v24 = vld [vmem:[%s498_s20 + $0x8] sm:$0xff]  ;;  %s6304_s19 = smov 112   ;;  %s6305_s15 = smov 96   ;;  %vm1290_vm9 = vcmask 130048  }
  0x5b   : > { %v549_v21 = vrot.slane %v540_v20, %v6498_v4  ;;  %v545_v22 = vrot.slane %v540_v20, %v6496_v3  ;;  %s6306_s22 = smov 80   ;;  %vm1673_vm10 = vcmask 916480   ;;  %vm1879_vm11 = vcmask 785408  }
  0x5c   : > { %vm2085_vm12 = vcmask 654336  }
  0x5e   : > { %762 = vrot.lane.b32.xlu0 %v759_v9, %s6295_s27  ;;  %722 = vrot.lane.b32.xlu1 %v719_v10, %s6296_s25 }
  0x62   : > { %682 = vrot.lane.b32.xlu1 %v679_v12, %s6297_s17  ;;  %680 = vrot.lane.b32.xlu0 %v675_v13, %s6297_s17 }
  0x66   : > { %636 = vrot.lane.b32.xlu1 %v633_v15, %s6298_s23  ;;  %634 = vrot.lane.b32.xlu0 %v629_v16, %s6298_s23 }
  0x6a   : > { %594 = vrot.lane.b32.xlu1 %v591_v18, %s6299_s14  ;;  %592 = vrot.lane.b32.xlu0 %v587_v19, %s6299_s14 }
  0x6e   : > { %552 = vrot.lane.b32.xlu1 %v549_v21, %s6300_s30  ;;  %550 = vrot.lane.b32.xlu0 %v545_v22, %s6300_s30 }
  0x72   : > { %5755 = vrot.lane.b32.xlu0 %v9656_v1, %s6301_s21  ;;  %5760 = vrot.lane.b32.xlu1 %v9656_v1, %s6301_s21 }
  0x76   : > { %856 = vrot.lane.b32.xlu0 %v6550_v23, %s6301_s21  ;;  %858 = vrot.lane.b32.xlu1 %v6552_v24, %s6301_s21 }
  0x7a   : > { %5765 = vrot.lane.b32.xlu0 %v9656_v1, %s6301_s21  ;;  %836 = vrot.lane.b32.xlu1 %v9656_v1, %s6301_s21 }
  0x7e   : > { %5770 = vrot.lane.b32.xlu0 %v9656_v1, %s6302_s16  ;;  %5775 = vrot.lane.b32.xlu1 %v9656_v1, %s6303_s24 }
  0x82   : > { %5780 = vrot.lane.b32.xlu0 %v9656_v1, %s6302_s16  ;;  %1062 = vrot.lane.b32.xlu1 %v6550_v23, %s6302_s16 }
  0x86   : > { %1064 = vrot.lane.b32.xlu0 %v6552_v24, %s6302_s16  ;;  %5785 = vrot.lane.b32.xlu1 %v9656_v1, %s6303_s24 }
  0x8a   : > { %1270 = vrot.lane.b32.xlu1 %v6552_v24, %s6303_s24  ;;  %1268 = vrot.lane.b32.xlu0 %v6550_v23, %s6303_s24 }
  0x8e   : > { %5795 = vrot.lane.b32.xlu1 %v9656_v1, %s6303_s24  ;;  %5790 = vrot.lane.b32.xlu0 %v9656_v1, %s6302_s16 }
  0x92   : > { %1248 = vrot.lane.b32.xlu1 %v9656_v1, %s6303_s24  ;;  %1042 = vrot.lane.b32.xlu0 %v9656_v1, %s6302_s16 }
  0x96   : > { %5800 = vrot.lane.b32.xlu1 %v9656_v1, %s6304_s19  ;;  %5805 = vrot.lane.b32.xlu0 %v9656_v1, %s6304_s19 }
  0x9a   : > { %1649 = vrot.lane.b32.xlu1 %v6550_v23, %s6304_s19  ;;  %1651 = vrot.lane.b32.xlu0 %v6552_v24, %s6304_s19 }
  0x9e   : > { %5810 = vrot.lane.b32.xlu1 %v9656_v1, %s6304_s19  ;;  %1635 = vrot.lane.b32.xlu0 %v9656_v1, %s6304_s19 }
  0xa2   : > { %5815 = vrot.lane.b32.xlu1 %v9656_v1, %s6305_s15  ;;  %1855 = vrot.lane.b32.xlu0 %v6550_v23, %s6305_s15 }
  0xa6   : > { %5820 = vrot.lane.b32.xlu1 %v9656_v1, %s6306_s22  ;;  %2063 = vrot.lane.b32.xlu0 %v6552_v24, %s6306_s22 }
  0xaa   : > { %5825 = vrot.lane.b32.xlu1 %v9656_v1, %s6305_s15 }
  0xae   : > { %1857 = vrot.lane.b32.xlu1 %v6552_v24, %s6305_s15 }
  0xb2   : > { %5830 = vrot.lane.b32.xlu1 %v9656_v1, %s6306_s22 }
  0xb6   : > { %5835 = vrot.lane.b32.xlu1 %v9656_v1, %s6305_s15 }
  0xcc   : > { %v761_v25 = vpop.permute.xlu0 %760  ;;  %v721_v26 = vpop.permute.xlu1 %720 }
  0xcd   : > { %v768_v27 = vmul.f32 %v761_v25, %v6550_v23  ;;  %v728_v28 = vmul.f32 %v721_v26, %v6550_v23 }
  0xcf   : > { %774 = vrot.lane.b32.xlu0 %v768_v27, %s6300_s30  ;;  %734 = vrot.lane.b32.xlu1 %v728_v28, %s6299_s14 }
  0xd0   : > { %v763_v29 = vpop.permute.xlu0 %762  ;;  %v723_v30 = vpop.permute.xlu1 %722 }
  0xd1   : > { %v770_v31 = vmul.f32 0.0, %v763_v29  ;;  %v730_v32 = vmul.f32 0.0, %v723_v30  ;;  %v724_v48 = vsel %vm613_vm0, %v721_v26, %v723_v30  ;;  %v764_v52 = vsel %vm571_vm1, %v761_v25, %v763_v29 }
  0xd2   : > { %v729_v51 = vmul.f32 %v724_v48, %v6552_v24  ;;  %v769_v55 = vmul.f32 %v764_v52, %v6552_v24 }
  0xd3   : > { %778 = vrot.lane.b32.xlu0 %v770_v31, %s6300_s30  ;;  %738 = vrot.lane.b32.xlu1 %v730_v32, %s6299_s14 }
  0xd4   : > { %v683_v33 = vpop.permute.xlu1 %682  ;;  %v681_v34 = vpop.permute.xlu0 %680 }
  0xd5   : > { %v688_v35 = vmul.f32 %v681_v34, %v6550_v23  ;;  %v690_v36 = vmul.f32 0.0, %v683_v33  ;;  %v684_v57 = vsel %vm655_vm3, %v681_v34, %v683_v33 }
  0xd6   : > { %v689_v60 = vmul.f32 %v684_v57, %v6552_v24 }
  0xd7   : > { %694 = vrot.lane.b32.xlu0 %v688_v35, %s6298_s23 }
  0xd8   : > { %v637_v37 = vpop.permute.xlu1 %636  ;;  %v635_v38 = vpop.permute.xlu0 %634 }
  0xd9   : > { %v643_v39 = vmul.f32 0.0, %v635_v38  ;;  %v645_v40 = vmul.f32 %v637_v37, %v6552_v24  ;;  %v639_v53 = vsel %vm638_vm2, %v635_v38, %v637_v37 }
  0xda   : > { %v644_v56 = vmul.f32 %v639_v53, %v6550_v23 }
  0xdb   : > { %649 = vrot.lane.b32.xlu1 %v643_v39, %s6297_s17  ;;  %698 = vrot.lane.b32.xlu0 %v690_v36, %s6298_s23 }
  0xdc   : > { %v595_v41 = vpop.permute.xlu1 %594  ;;  %v593_v42 = vpop.permute.xlu0 %592 }
  0xdd   : > { %v601_v43 = vmul.f32 0.0, %v593_v42  ;;  %v603_v44 = vmul.f32 %v595_v41, %v6552_v24  ;;  %v597_v62 = vsel %vm596_vm5, %v593_v42, %v595_v41 }
  0xde   : > { %v602_v0 = vmul.f32 %v597_v62, %v6550_v23 }
  0xdf   : > { %653 = vrot.lane.b32.xlu1 %v645_v40, %s6297_s17  ;;  %607 = vrot.lane.b32.xlu0 %v601_v43, %s6296_s25 }
  0xe0   : > { %v553_v45 = vpop.permute.xlu1 %552  ;;  %v551_v46 = vpop.permute.xlu0 %550 }
  0xe1   : > { %v559_v47 = vmul.f32 0.0, %v551_v46  ;;  %v561_v49 = vmul.f32 %v553_v45, %v6552_v24  ;;  %v555_v58 = vsel %vm554_vm4, %v551_v46, %v553_v45 }
  0xe2   : > { %v560_v61 = vmul.f32 %v555_v58, %v6550_v23 }
  0xe3   : > { %565 = vrot.lane.b32.xlu1 %v559_v47, %s6295_s27  ;;  %611 = vrot.lane.b32.xlu0 %v603_v44, %s6296_s25 }
  0xe4   : > { %v6632_v50 = vpop.permute.xlu1 %5760  ;;  %v6658_v2 = vpop.permute.xlu0 %5755 }
  0xe7   : > { %569 = vrot.lane.b32.xlu1 %v561_v49, %s6295_s27  ;;  %736 = vrot.lane.b32.xlu0 %v729_v51, %s6299_s14 }
  0xe8   : > { %v6639_v54 = vpop.permute.xlu1 %858  ;;  %v6664_v7 = vpop.permute.xlu0 %856 }
  0xeb   : > { %776 = vrot.lane.b32.xlu1 %v769_v55, %s6300_s30  ;;  %651 = vrot.lane.b32.xlu0 %v644_v56, %s6297_s17 }
  0xec   : > { %v6647_v59 = vpop.permute.xlu1 %836  ;;  %v6668_v9 = vpop.permute.xlu0 %5765 }
  0xef   : > { %696 = vrot.lane.b32.xlu1 %v689_v60, %s6298_s23  ;;  %567 = vrot.lane.b32.xlu0 %v560_v61, %s6295_s27 }
  0xf0   : > { %v6654_v63 = vpop.permute.xlu1 %5775  ;;  %v6672_v11 = vpop.permute.xlu0 %5770 }
  0xf3   : > { %609 = vrot.lane.b32.xlu1 %v602_v0, %s6296_s25 }
  0xf4   : > { %v6660_v5 = vpop.permute.xlu1 %1062  ;;  %v6676_v13 = vpop.permute.xlu0 %5780 }
  0xf8   : > { %v6662_v6 = vpop.permute.xlu1 %5785  ;;  %v6680_v15 = vpop.permute.xlu0 %1064 }
  0xfc   : > { %v6666_v8 = vpop.permute.xlu1 %1270  ;;  %v6684_v17 = vpop.permute.xlu0 %1268 }
 0x100   : > { %v6670_v10 = vpop.permute.xlu1 %5795  ;;  %v6686_v18 = vpop.permute.xlu0 %5790 }
 0x104   : > { %v6674_v12 = vpop.permute.xlu1 %1248  ;;  %v6690_v20 = vpop.permute.xlu0 %1042 }
 0x108   : > { %v6678_v14 = vpop.permute.xlu1 %5800  ;;  %v6694_v22 = vpop.permute.xlu0 %5805 }
 0x10c   : > { %v6682_v16 = vpop.permute.xlu1 %1649  ;;  %v6698_v26 = vpop.permute.xlu0 %1651 }
 0x110   : > { %v6688_v19 = vpop.permute.xlu1 %5810  ;;  %v6702_v28 = vpop.permute.xlu0 %1635 }
 0x114   : > { %v6692_v21 = vpop.permute.xlu1 %5815  ;;  %v6706_v30 = vpop.permute.xlu0 %1855 }
 0x118   : > { %v6696_v25 = vpop.permute.xlu1 %5820  ;;  %v6710_v32 = vpop.permute.xlu0 %2063 }
 0x11c   : > { %v6700_v27 = vpop.permute.xlu1 %5825 }
 0x120   : > { %v6704_v29 = vpop.permute.xlu1 %1857 }
 0x124   : > { %v6708_v31 = vpop.permute.xlu1 %5830 }
 0x128   : > { %v6712_v33 = vpop.permute.xlu1 %5835 }
 0x141   : > { %v775_v34 = vpop.permute.xlu0 %774  ;;  %v735_v35 = vpop.permute.xlu1 %734 }
 0x145   : > { %v779_v36 = vpop.permute.xlu0 %778  ;;  %v739_v37 = vpop.permute.xlu1 %738 }
 0x149   : > { %v695_v38 = vpop.permute.xlu0 %694 }
 0x14d   : > { %v650_v39 = vpop.permute.xlu1 %649  ;;  %v699_v40 = vpop.permute.xlu0 %698 }
 0x151   : > { %v654_v41 = vpop.permute.xlu1 %653  ;;  %v608_v42 = vpop.permute.xlu0 %607 }
 0x155   : > { %v566_v43 = vpop.permute.xlu1 %565  ;;  %v612_v44 = vpop.permute.xlu0 %611 }
 0x159   : > { %v570_v45 = vpop.permute.xlu1 %569  ;;  %v737_v49 = vpop.permute.xlu0 %736 }
 0x15a   : > { %v6725_v51 = vsel %vm596_vm5, %v735_v35, %v737_v49  ;;  %v6728_v52 = vsel %vm596_vm5, %v737_v49, %v739_v37  ;;  %v6307_v37 = vmov 0  }
 0x15b   : > { %5844 = vset.pattern.permute.xlu0 %v6307_v37  ;;  %5845 = vset.pattern.permute.xlu1 %v6307_v37 }
 0x15d   : > { %v777_v46 = vpop.permute.xlu1 %776  ;;  %v652_v57 = vpop.permute.xlu0 %651 }
 0x15e   : > { %v6715_v47 = vsel %vm554_vm4, %v775_v34, %v777_v46  ;;  %v6718_v48 = vsel %vm554_vm4, %v777_v46, %v779_v36  ;;  %v6745_v58 = vsel %vm655_vm3, %v650_v39, %v652_v57  ;;  %v6748_v60 = vsel %vm655_vm3, %v652_v57, %v654_v41 }
 0x15f   : > { %876 = vrot.lane.b32.xlu1 %v6718_v48, %s6301_s21  ;;  %874 = vrot.lane.b32.xlu0 %v6715_v47, %s6301_s21 }
 0x161   : > { %v697_v53 = vpop.permute.xlu1 %696  ;;  %v568_v34 = vpop.permute.xlu0 %567 }
 0x162   : > { %v6735_v55 = vsel %vm638_vm2, %v695_v38, %v697_v53  ;;  %v6738_v56 = vsel %vm638_vm2, %v697_v53, %v699_v40  ;;  %v6765_v35 = vsel %vm571_vm1, %v566_v43, %v568_v34  ;;  %v6768_v36 = vsel %vm571_vm1, %v568_v34, %v570_v45 }
 0x163   : > { %868 = vrot.lane.b32.xlu1 %v6725_v51, %s6301_s21  ;;  %870 = vrot.lane.b32.xlu0 %v6728_v52, %s6301_s21  ;;  %v5757_v38 = vunpack.i.l.bf16 %v6658_v2  ;;  %v5758_v43 = vunpack.i.h.bf16 %v6658_v2  ;;  %v5762_v53 = vunpack.i.l.bf16 %v6632_v50 }
 0x165   : > { %v610_v61 = vpop.permute.xlu1 %609 }
 0x166   : > { %v6755_v62 = vsel %vm613_vm0, %v608_v42, %v610_v61  ;;  %v6758_v0 = vsel %vm613_vm0, %v610_v61, %v612_v44  ;;  %v5763_v61 = vunpack.i.h.bf16 %v6632_v50 }
 0x167   : > { %862 = vrot.lane.b32.xlu1 %v6735_v55, %s6301_s21  ;;  %864 = vrot.lane.b32.xlu0 %v6738_v56, %s6301_s21 }
 0x16b   : > { %852 = vrot.lane.b32.xlu1 %v6748_v60, %s6301_s21  ;;  %850 = vrot.lane.b32.xlu0 %v6745_v58, %s6301_s21 }
 0x16f   : > { %844 = vrot.lane.b32.xlu1 %v6755_v62, %s6301_s21  ;;  %846 = vrot.lane.b32.xlu0 %v6758_v0, %s6301_s21 }
 0x173   : > { %840 = vrot.lane.b32.xlu0 %v6768_v36, %s6301_s21  ;;  %838 = vrot.lane.b32.xlu1 %v6765_v35, %s6301_s21 }
 0x177   : > { %1080 = vrot.lane.b32.xlu0 %v6715_v47, %s6302_s16  ;;  %1082 = vrot.lane.b32.xlu1 %v6718_v48, %s6302_s16 }
 0x17b   : > { %1076 = vrot.lane.b32.xlu0 %v6728_v52, %s6302_s16  ;;  %1074 = vrot.lane.b32.xlu1 %v6725_v51, %s6302_s16 }
 0x17f   : > { %1288 = vrot.lane.b32.xlu0 %v6718_v48, %s6303_s24  ;;  %1286 = vrot.lane.b32.xlu1 %v6715_v47, %s6303_s24 }
 0x183   : > { %1068 = vrot.lane.b32.xlu0 %v6735_v55, %s6302_s16  ;;  %1070 = vrot.lane.b32.xlu1 %v6738_v56, %s6302_s16 }
 0x187   : > { %1280 = vrot.lane.b32.xlu0 %v6725_v51, %s6303_s24  ;;  %1282 = vrot.lane.b32.xlu1 %v6728_v52, %s6303_s24 }
 0x18b   : > { %1276 = vrot.lane.b32.xlu0 %v6738_v56, %s6303_s24  ;;  %1274 = vrot.lane.b32.xlu1 %v6735_v55, %s6303_s24 }
 0x18f   : > { %1056 = vrot.lane.b32.xlu0 %v6745_v58, %s6302_s16  ;;  %1058 = vrot.lane.b32.xlu1 %v6748_v60, %s6302_s16 }
 0x193   : > { %1052 = vrot.lane.b32.xlu0 %v6758_v0, %s6302_s16  ;;  %1050 = vrot.lane.b32.xlu1 %v6755_v62, %s6302_s16 }
 0x197   : > { %1264 = vrot.lane.b32.xlu0 %v6748_v60, %s6303_s24  ;;  %1262 = vrot.lane.b32.xlu1 %v6745_v58, %s6303_s24 }
 0x19b   : > { %1044 = vrot.lane.b32.xlu0 %v6765_v35, %s6302_s16  ;;  %1046 = vrot.lane.b32.xlu1 %v6768_v36, %s6302_s16 }
 0x19f   : > { %1256 = vrot.lane.b32.xlu0 %v6755_v62, %s6303_s24  ;;  %1258 = vrot.lane.b32.xlu1 %v6758_v0, %s6303_s24 }
 0x1a3   : > { %1252 = vrot.lane.b32.xlu0 %v6768_v36, %s6303_s24  ;;  %1250 = vrot.lane.b32.xlu1 %v6765_v35, %s6303_s24 }
 0x1a7   : > { %1669 = vrot.lane.b32.xlu0 %v6718_v48, %s6304_s19  ;;  %1663 = vrot.lane.b32.xlu1 %v6728_v52, %s6304_s19 }
 0x1ab   : > { %1667 = vrot.lane.b32.xlu0 %v6715_v47, %s6304_s19  ;;  %1657 = vrot.lane.b32.xlu1 %v6738_v56, %s6304_s19 }
 0x1af   : > { %1661 = vrot.lane.b32.xlu0 %v6725_v51, %s6304_s19  ;;  %1655 = vrot.lane.b32.xlu1 %v6735_v55, %s6304_s19 }
 0x1b3   : > { %1645 = vrot.lane.b32.xlu0 %v6748_v60, %s6304_s19  ;;  %1639 = vrot.lane.b32.xlu1 %v6758_v0, %s6304_s19 }
 0x1b7   : > { %1643 = vrot.lane.b32.xlu0 %v6745_v58, %s6304_s19  ;;  %1633 = vrot.lane.b32.xlu1 %v6768_v36, %s6304_s19 }
 0x1bb   : > { %1637 = vrot.lane.b32.xlu0 %v6755_v62, %s6304_s19  ;;  %1631 = vrot.lane.b32.xlu1 %v6765_v35, %s6304_s19 }
 0x1bf   : > { %1875 = vrot.lane.b32.xlu0 %v6718_v48, %s6305_s15  ;;  %1869 = vrot.lane.b32.xlu1 %v6728_v52, %s6305_s15 }
 0x1c3   : > { %1873 = vrot.lane.b32.xlu0 %v6715_v47, %s6305_s15  ;;  %2079 = vrot.lane.b32.xlu1 %v6715_v47, %s6306_s22 }
 0x1c7   : > { %2081 = vrot.lane.b32.xlu0 %v6718_v48, %s6306_s22  ;;  %1861 = vrot.lane.b32.xlu1 %v6735_v55, %s6305_s15 }
 0x1cb   : > { %1867 = vrot.lane.b32.xlu0 %v6725_v51, %s6305_s15  ;;  %2067 = vrot.lane.b32.xlu1 %v6735_v55, %s6306_s22 }
 0x1cf   : > { %1863 = vrot.lane.b32.xlu0 %v6738_v56, %s6305_s15  ;;  %1849 = vrot.lane.b32.xlu1 %v6745_v58, %s6305_s15 }
 0x1d1   : > { %v877_v39 = vpop.permute.xlu1 %876  ;;  %v875_v40 = vpop.permute.xlu0 %874 }
 0x1d2   : > { %v892_v41 = vsel %vm878_vm6, %v875_v40, %v877_v39  ;;  %v891_v42 = vsel %vm878_vm6, %v5757_v38, %v875_v40  ;;  %v5767_v38 = vunpack.i.l.bf16 %v6668_v9  ;;  %v886_v40 = vsel %vm878_vm6, %v6664_v7, %v6639_v54 }
 0x1d3   : > { %2075 = vrot.lane.b32.xlu0 %v6728_v52, %s6306_s22  ;;  %1845 = vrot.lane.b32.xlu1 %v6758_v0, %s6305_s15 }
 0x1d4   : > { %938 = vmatprep.subr.mxu0 %v892_v41  ;;  %v885_v41 = vsel %vm878_vm6, %v5763_v61, %v6664_v7  ;;  %v5772_v61 = vunpack.i.l.bf16 %v6672_v11 }
 0x1d5   : > { %939 = vmatpush1.msra.mxu0 %v891_v42  ;;  %v869_v44 = vpop.permute.xlu1 %868  ;;  %v871_v45 = vpop.permute.xlu0 %870 }
 0x1d6   : > { %v890_v46 = vsel %vm878_vm6, %v869_v44, %v871_v45  ;;  %v889_v49 = vsel %vm878_vm6, %v5758_v43, %v869_v44  ;;  %v5768_v44 = vunpack.i.h.bf16 %v6668_v9 }
 0x1d7   : > { %2073 = vrot.lane.b32.xlu0 %v6725_v51, %s6306_s22  ;;  %5840 = vrot.lane.b32.xlu1 %v9656_v1, %s6306_s22 }
 0x1d8   : > { %940 = vmatprep.subr.mxu0 %v890_v46 }
 0x1d9   : > { %941 = vmatpush1.msra.mxu0 %v889_v49  ;;  %v863_v57 = vpop.permute.xlu1 %862  ;;  %v865_v2 = vpop.permute.xlu0 %864 }
 0x1da   : > { %v888_v34 = vsel %vm878_vm6, %v863_v57, %v865_v2  ;;  %v887_v37 = vsel %vm878_vm6, %v5762_v53, %v863_v57  ;;  %v790_v2 = vld [vmem:[#allocation8] sm:$0xff] }
 0x1db   : > { %2069 = vrot.lane.b32.xlu0 %v6738_v56, %s6306_s22  ;;  %2055 = vrot.lane.b32.xlu1 %v6745_v58, %s6306_s22 }
 0x1dc   : > { %942 = vmatprep.subr.mxu0 %v888_v34 }
 0x1dd   : > { %943 = vmatpush1.msra.mxu0 %v887_v37  ;;  %v853_v39 = vpop.permute.xlu1 %852  ;;  %v851_v50 = vpop.permute.xlu0 %850 }
 0x1de   : > { %944 = vmatprep.subr.mxu0 %v886_v40  ;;  %v884_v42 = vsel %vm878_vm6, %v851_v50, %v853_v39  ;;  %v883_v43 = vsel %vm878_vm6, %v5767_v38, %v851_v50  ;;  %v791_v39 = vld [vmem:[#allocation8 + $0x8] sm:$0xff]  ;;  %v5773_v40 = vunpack.i.h.bf16 %v6672_v11  ;;  %v5777_v11 = vunpack.i.l.bf16 %v6654_v63 }
 0x1df   : > { %945 = vmatpush1.msra.mxu0 %v885_v41  ;;  %1851 = vrot.lane.b32.xlu0 %v6748_v60, %s6305_s15 }
 0x1e0   : > { %1841 = vrot.lane.b32.xlu1 %v9656_v1, %s6305_s15  ;;  %946 = vmatprep.subr.mxu0 %v884_v42  ;;  %v788_v42 = vld [vmem:[%s9638_s2 + $0x10] sm:$0xff] }
 0x1e1   : > { %947 = vmatpush1.msra.mxu0 %v883_v43  ;;  %v845_v54 = vpop.permute.xlu1 %844  ;;  %v847_v45 = vpop.permute.xlu0 %846 }
 0x1e2   : > { %v882_v46 = vsel %vm878_vm6, %v845_v54, %v847_v45  ;;  %v881_v7 = vsel %vm878_vm6, %v5768_v44, %v845_v54  ;;  %v792_v54 = vld [vmem:[#allocation8 + $0x10] sm:$0xff] }
 0x1e3   : > { %2061 = vrot.lane.b32.xlu0 %v6550_v23, %s6306_s22  ;;  %948 = vmatprep.subr.mxu0 %v882_v46 }
 0x1e4   : > { %1837 = vrot.lane.b32.xlu1 %v6765_v35, %s6305_s15  ;;  %949 = vmatpush1.msra.mxu0 %v881_v7  ;;  %v787_v7 = vld [vmem:[%s9638_s2 + $0x8] sm:$0xff] }
 0x1e5   : > { %v839_v9 = vpop.permute.xlu1 %838  ;;  %v841_v49 = vpop.permute.xlu0 %840 }
 0x1e6   : > { %v880_v53 = vsel %vm878_vm6, %v839_v9, %v841_v49  ;;  %v879_v57 = vsel %vm878_vm6, %v6647_v59, %v839_v9 }
 0x1e7   : > { %2057 = vrot.lane.b32.xlu0 %v6748_v60, %s6306_s22  ;;  %950 = vmatprep.subr.mxu0 %v880_v53  ;;  %v793_v53 = vld [vmem:[#allocation8 + $0x18] sm:$0xff] }
 0x1e8   : > { %2045 = vrot.lane.b32.xlu1 %v6768_v36, %s6306_s22  ;;  %951 = vmatpush1.msra.mxu0 %v879_v57  ;;  %v6946_v57 = vld [vmem:[%s9643_s7 + $0x6] sm:$0x3] }
 0x1e9   : > { %v1083_v34 = vpop.permute.xlu1 %1082  ;;  %v1081_v37 = vpop.permute.xlu0 %1080  ;;  %5589 = vmatmul.mubr.msk.f32.vlgmr.msra.gmra.mxu0 %vm907_vm7, %v790_v2  ;;  %v5782_v2 = vunpack.i.l.bf16 %v6676_v13 }
 0x1ea   : > { %v1098_v38 = vsel %vm1084_vm8, %v1081_v37, %v1083_v34  ;;  %v1097_v59 = vsel %vm1084_vm8, %v5772_v61, %v1081_v37  ;;  %990 = vmatprep.mubr.f32.mxu0 %v9656_v1  ;;  %v2567_v61 = vrot.slane %v6946_v57, %v6496_v3  ;;  %v5783_v34 = vunpack.i.h.bf16 %v6676_v13 }
 0x1eb   : > { %1843 = vrot.lane.b32.xlu0 %v6755_v62, %s6305_s15  ;;  %1143 = vmatprep.subr.mxu1 %v1098_v38  ;;  %v5778_v13 = vunpack.i.h.bf16 %v6654_v63  ;;  %v2340_v63 = vld [vmem:[%s9643_s7] sm:$0x3] }
 0x1ec   : > { %2043 = vrot.lane.b32.xlu1 %v6765_v35, %s6306_s22  ;;  %1144 = vmatpush1.msra.mxu1 %v1097_v59  ;;  %v6956_v59 = vld [vmem:[%s9643_s7 + $0x2] sm:$0x3] }
 0x1ed   : > { %v1075_v50 = vpop.permute.xlu1 %1074  ;;  %v1077_v41 = vpop.permute.xlu0 %1076  ;;  %5590 = vmatmul.mubr.msk.f32.gmra.mxu0 %vm907_vm7, %v791_v39 }
 0x1ee   : > { %v1096_v43 = vsel %vm1084_vm8, %v1075_v50, %v1077_v41  ;;  %v1095_v44 = vsel %vm1084_vm8, %v5773_v40, %v1075_v50  ;;  %996 = vmatprep.mubr.f32.mxu0 %v9656_v1  ;;  %v1092_v50 = vsel %vm1084_vm8, %v6660_v5, %v6680_v15  ;;  %v2448_v41 = vrot.slane %v6956_v59, %v6496_v3 }
 0x1ef   : > { %1839 = vrot.lane.b32.xlu0 %v6768_v36, %s6305_s15  ;;  %1145 = vmatprep.subr.mxu1 %v1096_v43 }
 0x1f0   : > { %1146 = vmatpush1.msra.mxu1 %v1095_v44  ;;  %2256 = vperm.xlu1 %5845, %v788_v42   ;;  %v1091_v44 = vsel %vm1084_vm8, %v5783_v34, %v6660_v5  ;;  %v789_v5 = vld [vmem:[%s9638_s2 + $0x18] sm:$0xff]  ;;  %v786_v34 = vld [vmem:[%s9638_s2] sm:$0xff] }
 0x1f1   : > { %v1287_v45 = vpop.permute.xlu1 %1286  ;;  %v1289_v46 = vpop.permute.xlu0 %1288  ;;  %5591 = vmatmul.mubr.msk.f32.gmra.mxu0 %vm907_vm7, %v792_v54 }
 0x1f2   : > { %v1304_v9 = vsel %vm1290_vm9, %v1287_v45, %v1289_v46  ;;  %v1303_v49 = vsel %vm1290_vm9, %v5777_v11, %v1287_v45  ;;  %1002 = vmatprep.mubr.f32.mxu0 %v9656_v1  ;;  %v5787_v11 = vunpack.i.l.bf16 %v6662_v6  ;;  %v2345_v45 = vrot.slane %v2340_v63, %v6496_v3 }
 0x1f3   : > { %2051 = vrot.lane.b32.xlu0 %v6758_v0, %s6306_s22  ;;  %1349 = vmatprep.subr.mxu0 %v1304_v9  ;;  %v5788_v46 = vunpack.i.h.bf16 %v6662_v6  ;;  %v1298_v6 = vsel %vm1290_vm9, %v6684_v17, %v6666_v8 }
 0x1f4   : > { %1350 = vmatpush1.msra.mxu0 %v1303_v49  ;;  %2251 = vperm.xlu1 %5845, %v787_v7  }
 0x1f5   : > { %v1071_v37 = vpop.permute.xlu1 %1070  ;;  %v1069_v38 = vpop.permute.xlu0 %1068  ;;  %5592 = vmatmul.mubr.msk.f32.gmra.mxu0 %vm907_vm7, %v793_v53 }
 0x1f6   : > { %v1094_v39 = vsel %vm1084_vm8, %v1069_v38, %v1071_v37  ;;  %v1093_v40 = vsel %vm1084_vm8, %v5782_v2, %v1069_v38  ;;  %1395 = vmatprep.mubr.f32.mxu0 %v9656_v1  ;;  %v6991_v2 = vld [vmem:[%s9643_s7 + $0x8] sm:$0x3] }
 0x1f7   : > { %2049 = vrot.lane.b32.xlu0 %v6755_v62, %s6306_s22  ;;  %1147 = vmatprep.subr.mxu1 %v1094_v39  ;;  %v2670_v37 = vrot.slane %v6991_v2, %v6496_v3 }
 0x1f8   : > { %1148 = vmatpush1.msra.mxu1 %v1093_v40  ;;  %2572 = vrot.lane.b32.xlu1 %v2567_v61, %s6297_s17  ;;  %v5792_v61 = vunpack.i.l.bf16 %v6686_v18  ;;  %v1297_v40 = vsel %vm1290_vm9, %v5788_v46, %v6684_v17 }
 0x1f9   : > { %v1283_v42 = vpop.permute.xlu1 %1282  ;;  %1149 = vmatprep.subr.mxu1 %v1092_v50  ;;  %v1281_v43 = vpop.permute.xlu0 %1280  ;;  %v2571_v50 = vrot.slane %v6946_v57, %v6498_v4 }
 0x1fa   : > { %1150 = vmatpush1.msra.mxu1 %v1091_v44  ;;  %v1302_v54 = vsel %vm1290_vm9, %v1281_v43, %v1283_v42  ;;  %v1301_v15 = vsel %vm1290_vm9, %v5778_v13, %v1281_v43 }
 0x1fb   : > { %2047 = vrot.lane.b32.xlu0 %v9656_v1, %s6306_s22  ;;  %1351 = vmatprep.subr.mxu0 %v1302_v54  ;;  %v2452_v54 = vrot.slane %v6956_v59, %v6498_v4 }
 0x1fc   : > { %1352 = vmatpush1.msra.mxu0 %v1301_v15  ;;  %2453 = vrot.lane.b32.xlu1 %v2448_v41, %s6298_s23  ;;  %v5793_v41 = vunpack.i.h.bf16 %v6686_v18  ;;  %v5797_v15 = vunpack.i.l.bf16 %v6670_v10 }
 0x1fd   : > { %v1275_v7 = vpop.permute.xlu1 %1274  ;;  %v1277_v9 = vpop.permute.xlu0 %1276 }
 0x1fe   : > { %v1300_v49 = vsel %vm1290_vm9, %v1275_v7, %v1277_v9  ;;  %v1299_v53 = vsel %vm1290_vm9, %v5787_v11, %v1275_v7 }
 0x1ff   : > { %1353 = vmatprep.subr.mxu0 %v1300_v49  ;;  %2261 = vperm.xlu0 %5844, %v789_v5   ;;  %v1038_v49 = vld [vmem:[#allocation8 + $0x20] sm:$0xff] }
 0x200   : > { %1354 = vmatpush1.msra.mxu0 %v1299_v53  ;;  %2350 = vrot.lane.b32.xlu1 %v2345_v45, %s6299_s14  ;;  %v2349_v45 = vrot.slane %v2340_v63, %v6498_v4  ;;  %v5798_v53 = vunpack.i.h.bf16 %v6670_v10 }
 0x201   : > { %v1059_v38 = vpop.permute.xlu1 %1058  ;;  %1355 = vmatprep.subr.mxu0 %v1298_v6  ;;  %v1057_v39 = vpop.permute.xlu0 %1056 }
 0x202   : > { %1356 = vmatpush1.msra.mxu0 %v1297_v40  ;;  %v1090_v13 = vsel %vm1084_vm8, %v1057_v39, %v1059_v38  ;;  %v1089_v8 = vsel %vm1084_vm8, %v5792_v61, %v1057_v39  ;;  %v1244_v38 = vld [vmem:[#allocation8 + $0x40] sm:$0xff]  ;;  %v1246_v40 = vld [vmem:[#allocation8 + $0x50] sm:$0xff] }
 0x203   : > { %1151 = vmatprep.subr.mxu1 %v1090_v13  ;;  %2246 = vperm.xlu0 %5844, %v786_v34  }
 0x204   : > { %1152 = vmatpush1.msra.mxu1 %v1089_v8  ;;  %2675 = vrot.lane.b32.xlu1 %v2670_v37, %s6296_s25 }
 0x205   : > { %v1051_v42 = vpop.permute.xlu1 %1050  ;;  %v1053_v43 = vpop.permute.xlu0 %1052 }
 0x206   : > { %v1088_v44 = vsel %vm1084_vm8, %v1051_v42, %v1053_v43  ;;  %v1087_v17 = vsel %vm1084_vm8, %v5793_v41, %v1051_v42  ;;  %v1247_v42 = vld [vmem:[#allocation8 + $0x58] sm:$0xff]  ;;  %v5812_v43 = vunpack.i.l.bf16 %v6688_v19 }
 0x207   : > { %1153 = vmatprep.subr.mxu1 %v1088_v44  ;;  %2574 = vrot.lane.b32.xlu0 %v2571_v50, %s6297_s17  ;;  %v1450_v50 = vld [vmem:[#allocation8 + $0x60] sm:$0xff] }
 0x208   : > { %1154 = vmatpush1.msra.mxu1 %v1087_v17 }
 0x209   : > { %v1263_v57 = vpop.permute.xlu1 %1262  ;;  %v1265_v18 = vpop.permute.xlu0 %1264 }
 0x20a   : > { %v1296_v11 = vsel %vm1290_vm9, %v1263_v57, %v1265_v18  ;;  %v1295_v5 = vsel %vm1290_vm9, %v5797_v15, %v1263_v57  ;;  %v1680_v15 = vsel %vm1673_vm10, %v6682_v16, %v6698_v26  ;;  %v1451_v18 = vld [vmem:[#allocation8 + $0x68] sm:$0xff]  ;;  %v1452_v16 = vld [vmem:[#allocation8 + $0x70] sm:$0xff] }
 0x20b   : > { %1357 = vmatprep.subr.mxu0 %v1296_v11  ;;  %2455 = vrot.lane.b32.xlu0 %v2452_v54, %s6298_s23  ;;  %v5813_v11 = vunpack.i.h.bf16 %v6688_v19  ;;  %v1453_v19 = vld [vmem:[#allocation8 + $0x78] sm:$0xff] }
 0x20c   : > { %1358 = vmatpush1.msra.mxu0 %v1295_v5 }
 0x20d   : > { %v1047_v46 = vpop.permute.xlu1 %1046  ;;  %v1045_v7 = vpop.permute.xlu0 %1044 }
 0x20e   : > { %v1086_v9 = vsel %vm1084_vm8, %v1045_v7, %v1047_v46  ;;  %v1085_v59 = vsel %vm1084_vm8, %v6690_v20, %v1045_v7  ;;  %v1039_v20 = vld [vmem:[#allocation8 + $0x28] sm:$0xff] }
 0x20f   : > { %1155 = vmatprep.subr.mxu1 %v1086_v9  ;;  %2352 = vrot.lane.b32.xlu0 %v2349_v45, %s6299_s14 }
 0x210   : > { %1156 = vmatpush1.msra.mxu1 %v1085_v59 }
 0x211   : > { %v1259_v61 = vpop.permute.xlu1 %1258  ;;  %1484 = vmatprep.subr.mxu1 %v6718_v48  ;;  %v1257_v6 = vpop.permute.xlu0 %1256  ;;  %5593 = vmatmul.mubr.msk.f32.vlgmr.msra.gmra.mxu1 %vm907_vm7, %v1038_v49 }
 0x212   : > { %1485 = vmatpush1.msra.mxu1 %v6715_v47  ;;  %v1294_v63 = vsel %vm1290_vm9, %v1257_v6, %v1259_v61  ;;  %v1293_v34 = vsel %vm1290_vm9, %v5798_v53, %v1257_v6  ;;  %1195 = vmatprep.mubr.f32.mxu1 %v9656_v1  ;;  %v1585_v53 = vld [vmem:[#allocation8 + $0x80] sm:$0xff]  ;;  %v5817_v61 = vunpack.i.l.bf16 %v6692_v21 }
 0x213   : > { %1359 = vmatprep.subr.mxu0 %v1294_v63  ;;  %1486 = vmatprep.subr.mxu1 %v6728_v52  ;;  %v2674_v52 = vrot.slane %v6991_v2, %v6498_v4 }
 0x214   : > { %1360 = vmatpush1.msra.mxu0 %v1293_v34  ;;  %1487 = vmatpush1.msra.mxu1 %v6725_v51  ;;  %v5802_v51 = vunpack.i.l.bf16 %v6678_v14 }
 0x215   : > { %v1251_v10 = vpop.permute.xlu1 %1250  ;;  %1488 = vmatprep.subr.mxu1 %v6738_v56  ;;  %v1253_v48 = vpop.permute.xlu0 %1252  ;;  %5594 = vmatmul.mubr.msk.f32.gmra.mxu1 %vm907_vm7, %v1039_v20 }
 0x216   : > { %1489 = vmatpush1.msra.mxu1 %v6735_v55  ;;  %v1292_v47 = vsel %vm1290_vm9, %v1251_v10, %v1253_v48  ;;  %v1291_v37 = vsel %vm1290_vm9, %v6674_v12, %v1251_v10  ;;  %1201 = vmatprep.mubr.f32.mxu1 %v9656_v1  ;;  %v5818_v10 = vunpack.i.h.bf16 %v6692_v21 }
 0x217   : > { %1361 = vmatprep.subr.mxu0 %v1292_v47  ;;  %1490 = vmatprep.subr.mxu1 %v6552_v24  ;;  %v1040_v24 = vld [vmem:[#allocation8 + $0x30] sm:$0xff] }
 0x218   : > { %1362 = vmatpush1.msra.mxu0 %v1291_v37  ;;  %1491 = vmatpush1.msra.mxu1 %v6550_v23  ;;  %v1245_v23 = vld [vmem:[#allocation8 + $0x48] sm:$0xff] }
 0x219   : > { %v1664_v55 = vpop.permute.xlu1 %1663  ;;  %1492 = vmatprep.subr.mxu1 %v6748_v60  ;;  %v1670_v56 = vpop.permute.xlu0 %1669  ;;  %5597 = vmatmul.mubr.msk.f32.vlgmr.msra.gmra.mxu0 %vm907_vm7, %v1244_v38  ;;  %v5803_v60 = vunpack.i.h.bf16 %v6678_v14  ;;  %v5808_v14 = vunpack.i.h.bf16 %v6694_v22 }
 0x21a   : > { %1493 = vmatpush1.msra.mxu1 %v6745_v58  ;;  %v1687_v12 = vsel %vm1673_vm10, %v1670_v56, %v5802_v51  ;;  %1401 = vmatprep.mubr.f32.mxu0 %v9656_v1  ;;  %v1587_v51 = vld [vmem:[#allocation8 + $0x90] sm:$0xff] }
 0x21b   : > { %1494 = vmatprep.subr.mxu1 %v6758_v0  ;;  %1732 = vmatprep.subr.mxu0 %v1687_v12  ;;  %v1041_v0 = vld [vmem:[#allocation8 + $0x38] sm:$0xff]  ;;  %v1681_v54 = vsel %vm1673_vm10, %v6698_v26, %v5808_v14 }
 0x21c   : > { %1495 = vmatpush1.msra.mxu1 %v6755_v62  ;;  %2677 = vrot.lane.b32.xlu0 %v2674_v52, %s6296_s25  ;;  %v1685_v62 = vsel %vm1673_vm10, %v1664_v55, %v5803_v60  ;;  %v5822_v52 = vunpack.i.l.bf16 %v6696_v25 }
 0x21d   : > { %v1658_v2 = vpop.permute.xlu1 %1657  ;;  %1496 = vmatprep.subr.mxu1 %v6768_v36  ;;  %v1668_v39 = vpop.permute.xlu0 %1667  ;;  %5595 = vmatmul.mubr.msk.f32.gmra.mxu1 %vm907_vm7, %v1040_v24  ;;  %v5807_v36 = vunpack.i.l.bf16 %v6694_v22  ;;  %v1588_v24 = vld [vmem:[#allocation8 + $0x98] sm:$0xff] }
 0x21e   : > { %v1686_v58 = vsel %vm1673_vm10, %v1668_v39, %v1670_v56  ;;  %1497 = vmatpush1.msra.mxu1 %v6765_v35  ;;  %5598 = vmatmul.mubr.msk.f32.gmra.mxu0 %vm907_vm7, %v1245_v23  ;;  %v5828_v39 = vunpack.i.h.bf16 %v6700_v27 }
 0x21f   : > { %1733 = vmatpush1.msra.mxu0 %v1686_v58  ;;  %1207 = vmatprep.mubr.f32.mxu1 %v9656_v1  ;;  %v1683_v41 = vsel %vm1673_vm10, %v1658_v2, %v5807_v36  ;;  %v5827_v58 = vunpack.i.l.bf16 %v6700_v27  ;;  %v5823_v36 = vunpack.i.h.bf16 %v6696_v25  ;;  %v5833_v25 = vunpack.i.h.bf16 %v6708_v31 }
 0x220   : > { %1734 = vmatprep.subr.mxu0 %v1685_v62  ;;  %1407 = vmatprep.mubr.f32.mxu0 %v9656_v1 }
 0x221   : > { %v1656_v13 = vpop.permute.xlu1 %1655  ;;  %v1662_v8 = vpop.permute.xlu0 %1661  ;;  %5596 = vmatmul.mubr.msk.f32.gmra.mxu1 %vm907_vm7, %v1041_v0 }
 0x222   : > { %v1684_v35 = vsel %vm1673_vm10, %v1662_v8, %v1664_v55  ;;  %5599 = vmatmul.mubr.msk.f32.gmra.mxu0 %vm907_vm7, %v1246_v40  ;;  %1530 = vmatprep.mubr.f32.mxu1 %v9656_v1  ;;  %v1682_v22 = vsel %vm1673_vm10, %v1656_v13, %v1658_v2  ;;  %v1887_v13 = vsel %vm1879_vm11, %v6704_v29, %v5828_v39 }
 0x223   : > { %1735 = vmatpush1.msra.mxu0 %v1684_v35  ;;  %1413 = vmatprep.mubr.f32.mxu0 %v9656_v1  ;;  %v1886_v8 = vsel %vm1879_vm11, %v6706_v30, %v6704_v29  ;;  %v5837_v30 = vunpack.i.l.bf16 %v6712_v33 }
 0x224   : > { %1736 = vmatprep.subr.mxu0 %v1683_v41 }
 0x225   : > { %v1640_v44 = vpop.permute.xlu1 %1639  ;;  %1737 = vmatpush1.msra.mxu0 %v1682_v22  ;;  %v1646_v17 = vpop.permute.xlu0 %1645  ;;  %5601 = vmatmul.mubr.msk.f32.vlgmr.msra.gmra.mxu1 %vm907_vm7, %v1450_v50 }
 0x226   : > { %1738 = vmatprep.subr.mxu0 %v1681_v54  ;;  %v1679_v57 = vsel %vm1673_vm10, %v1646_v17, %v5812_v43  ;;  %5600 = vmatmul.mubr.msk.f32.gmra.mxu0 %vm907_vm7, %v1247_v42  ;;  %v1677_v26 = vsel %vm1673_vm10, %v1640_v44, %v5813_v11  ;;  %v5832_v43 = vunpack.i.l.bf16 %v6708_v31  ;;  %v2093_v54 = vsel %vm2085_vm12, %v6710_v32, %v5833_v25 }
 0x227   : > { %1739 = vmatpush1.msra.mxu0 %v1680_v15  ;;  %1778 = vmatprep.mubr.f32.mxu0 %v9656_v1 }
 0x228   : > { %1740 = vmatprep.subr.mxu0 %v1679_v57  ;;  %1536 = vmatprep.mubr.f32.mxu1 %v9656_v1  ;;  %v5838_v57 = vunpack.i.h.bf16 %v6712_v33 }
 0x229   : > { %v1634_v5 = vpop.permute.xlu1 %1633  ;;  %v1644_v45 = vpop.permute.xlu0 %1643  ;;  %5602 = vmatmul.mubr.msk.f32.gmra.mxu1 %vm907_vm7, %v1451_v18 }
 0x22a   : > { %v1678_v46 = vsel %vm1673_vm10, %v1644_v45, %v1646_v17  ;;  %1542 = vmatprep.mubr.f32.mxu1 %v9656_v1  ;;  %v1675_v49 = vsel %vm1673_vm10, %v1634_v5, %v6702_v28  ;;  %v1586_v28 = vld [vmem:[#allocation8 + $0x88] sm:$0xff] }
 0x22b   : > { %1741 = vmatpush1.msra.mxu0 %v1678_v46 }
 0x22c   : > { %1742 = vmatprep.subr.mxu0 %v1677_v26 }
 0x22d   : > { %v1632_v7 = vpop.permute.xlu1 %1631  ;;  %v1638_v9 = vpop.permute.xlu0 %1637  ;;  %5603 = vmatmul.mubr.msk.f32.gmra.mxu1 %vm907_vm7, %v1452_v16 }
 0x22e   : > { %v1676_v59 = vsel %vm1673_vm10, %v1638_v9, %v1640_v44  ;;  %1548 = vmatprep.mubr.f32.mxu1 %v9656_v1  ;;  %v1674_v6 = vsel %vm1673_vm10, %v1632_v7, %v1634_v5 }
 0x22f   : > { %1743 = vmatpush1.msra.mxu0 %v1676_v59 }
 0x230   : > { %1744 = vmatprep.subr.mxu0 %v1675_v49 }
 0x231   : > { %v1870_v63 = vpop.permute.xlu1 %1869  ;;  %1745 = vmatpush1.msra.mxu0 %v1674_v6  ;;  %v1876_v34 = vpop.permute.xlu0 %1875  ;;  %5604 = vmatmul.mubr.msk.f32.gmra.mxu1 %vm907_vm7, %v1453_v19 }
 0x232   : > { %v1893_v20 = vsel %vm1879_vm11, %v1876_v34, %v5817_v61  ;;  %5605 = vmatmul.mubr.msk.f32.vlgmr.msra.gmra.mxu0 %vm907_vm7, %v1585_v53  ;;  %1984 = vmatprep.mubr.f32.mxu1 %v9656_v1  ;;  %v1891_v38 = vsel %vm1879_vm11, %v1870_v63, %v5818_v10  ;;  %v1834_v10 = vld [vmem:[#allocation8 + $0xa8] sm:$0xff] }
 0x233   : > { %1938 = vmatprep.subr.mxu1 %v1893_v20  ;;  %1784 = vmatprep.mubr.f32.mxu0 %v9656_v1 }
 0x235   : > { %v2080_v48 = vpop.permute.xlu1 %2079  ;;  %v1874_v47 = vpop.permute.xlu0 %1873 }
 0x236   : > { %v1892_v37 = vsel %vm1879_vm11, %v1874_v47, %v1876_v34  ;;  %5606 = vmatmul.mubr.msk.f32.gmra.mxu0 %vm907_vm7, %v1586_v28 }
 0x237   : > { %1939 = vmatpush1.msra.mxu1 %v1892_v37  ;;  %1790 = vmatprep.mubr.f32.mxu0 %v9656_v1  ;;  %v1835_v37 = vld [vmem:[#allocation8 + $0xb0] sm:$0xff] }
 0x238   : > { %1940 = vmatprep.subr.mxu1 %v1891_v38 }
 0x239   : > { %v1862_v55 = vpop.permute.xlu1 %1861  ;;  %v2082_v56 = vpop.permute.xlu0 %2081 }
 0x23a   : > { %v2099_v21 = vsel %vm2085_vm12, %v2082_v56, %v5822_v52  ;;  %v2098_v12 = vsel %vm2085_vm12, %v2080_v48, %v2082_v56  ;;  %5607 = vmatmul.mubr.msk.f32.gmra.mxu0 %vm907_vm7, %v1587_v51  ;;  %v2039_v56 = vld [vmem:[#allocation8 + $0xc0] sm:$0xff] }
 0x23b   : > { %2144 = vmatprep.subr.mxu0 %v2099_v21  ;;  %1796 = vmatprep.mubr.f32.mxu0 %v9656_v1 }
 0x23c   : > { %2145 = vmatpush1.msra.mxu0 %v2098_v12  ;;  %v2040_v12 = vld [vmem:[#allocation8 + $0xc8] sm:$0xff] }
 0x23d   : > { %v2068_v23 = vpop.permute.xlu1 %2067  ;;  %v1868_v60 = vpop.permute.xlu0 %1867 }
 0x23e   : > { %v1890_v2 = vsel %vm1879_vm11, %v1868_v60, %v1870_v63  ;;  %5608 = vmatmul.mubr.msk.f32.gmra.mxu0 %vm907_vm7, %v1588_v24  ;;  %v2042_v60 = vld [vmem:[#allocation8 + $0xd8] sm:$0xff] }
 0x23f   : > { %1941 = vmatpush1.msra.mxu1 %v1890_v2  ;;  %2190 = vmatprep.mubr.f32.mxu0 %v9656_v1 }
 0x241   : > { %v1864_v0 = vpop.permute.xlu0 %1863  ;;  %v1850_v62 = vpop.permute.xlu1 %1849 }
 0x242   : > { %v1889_v40 = vsel %vm1879_vm11, %v1864_v0, %v5827_v58  ;;  %v1888_v14 = vsel %vm1879_vm11, %v1862_v55, %v1864_v0  ;;  %v1836_v55 = vld [vmem:[#allocation8 + $0xb8] sm:$0xff] }
 0x243   : > { %1942 = vmatprep.subr.mxu1 %v1889_v40 }
 0x244   : > { %1943 = vmatpush1.msra.mxu1 %v1888_v14 }
 0x245   : > { %1944 = vmatprep.subr.mxu1 %v1887_v13  ;;  %v2076_v35 = vpop.permute.xlu0 %2075  ;;  %v1846_v50 = vpop.permute.xlu1 %1845 }
 0x246   : > { %1945 = vmatpush1.msra.mxu1 %v1886_v8  ;;  %v2097_v27 = vsel %vm2085_vm12, %v2076_v35, %v5823_v36  ;;  %v1883_v5 = vsel %vm1879_vm11, %v1846_v50, %v5838_v57 }
 0x247   : > { %2146 = vmatprep.subr.mxu0 %v2097_v27 }
 0x249   : > { %v2074_v41 = vpop.permute.xlu0 %2073  ;;  %v5841_v44 = vpop.permute.xlu1 %5840 }
 0x24a   : > { %v2096_v42 = vsel %vm2085_vm12, %v2074_v41, %v2076_v35  ;;  %v5842_v46 = vunpack.i.l.bf16 %v5841_v44  ;;  %v5843_v63 = vunpack.i.h.bf16 %v5841_v44 }
 0x24b   : > { %2147 = vmatpush1.msra.mxu0 %v2096_v42 }
 0x24d   : > { %v2070_v22 = vpop.permute.xlu0 %2069  ;;  %v2056_v11 = vpop.permute.xlu1 %2055 }
 0x24e   : > { %v2095_v17 = vsel %vm2085_vm12, %v2070_v22, %v5832_v43  ;;  %v2094_v29 = vsel %vm2085_vm12, %v2068_v23, %v2070_v22  ;;  %v2041_v23 = vld [vmem:[#allocation8 + $0xd0] sm:$0xff]  ;;  %v1009_v43 = vld [vmem:[#allocation11] sm:$0x3] }
 0x24f   : > { %2148 = vmatprep.subr.mxu0 %v2095_v17  ;;  %v7224_v17 = vrot.slane %v1009_v43, %v6496_v3 }
 0x250   : > { %2149 = vmatpush1.msra.mxu0 %v2094_v29 }
 0x251   : > { %2150 = vmatprep.subr.mxu0 %v2093_v54  ;;  %v1852_v15 = vpop.permute.xlu0 %1851 }
 0x252   : > { %v1885_v18 = vsel %vm1879_vm11, %v1852_v15, %v5837_v30  ;;  %v1884_v31 = vsel %vm1879_vm11, %v1850_v62, %v1852_v15  ;;  %v1842_v7 = vpop.permute.xlu1 %1841  ;;  %v7231_v30 = vrot.slane %v1009_v43, %v6498_v4 }
 0x253   : > { %1946 = vmatprep.subr.mxu1 %v1885_v18 }
 0x254   : > { %1947 = vmatpush1.msra.mxu1 %v1884_v31 }
 0x255   : > { %1948 = vmatprep.subr.mxu1 %v1883_v5  ;;  %v2062_v45 = vpop.permute.xlu0 %2061 }
 0x256   : > { %v2092_v16 = vsel %vm2085_vm12, %v2062_v45, %v6710_v32  ;;  %v1838_v49 = vpop.permute.xlu1 %1837  ;;  %v1833_v32 = vld [vmem:[#allocation8 + $0xa0] sm:$0xff] }
 0x257   : > { %2151 = vmatpush1.msra.mxu0 %v2092_v16 }
 0x259   : > { %v2058_v26 = vpop.permute.xlu0 %2057 }
 0x25a   : > { %v2091_v33 = vsel %vm2085_vm12, %v2058_v26, %v5842_v46  ;;  %v2090_v9 = vsel %vm2085_vm12, %v2056_v11, %v2058_v26  ;;  %v2046_v20 = vpop.permute.xlu1 %2045  ;;  %v1215_v26 = vld [vmem:[#allocation11 + $0x2] sm:$0x3] }
 0x25b   : > { %2152 = vmatprep.subr.mxu0 %v2091_v33 }
 0x25c   : > { %2153 = vmatpush1.msra.mxu0 %v2090_v9 }
 0x25d   : > { %v1844_v59 = vpop.permute.xlu0 %1843 }
 0x25e   : > { %v1882_v19 = vsel %vm1879_vm11, %v1844_v59, %v1846_v50  ;;  %v2044_v38 = vpop.permute.xlu1 %2043  ;;  %v7282_v59 = vrot.slane %v1215_v26, %v6496_v3 }
 0x25f   : > { %1949 = vmatpush1.msra.mxu1 %v1882_v19  ;;  %v2086_v21 = vsel %vm2085_vm12, %v2044_v38, %v2046_v20 }
 0x261   : > { %v1840_v53 = vpop.permute.xlu0 %1839 }
 0x262   : > { %v1881_v61 = vsel %vm1879_vm11, %v1840_v53, %v1842_v7  ;;  %v1880_v6 = vsel %vm1879_vm11, %v1838_v49, %v1840_v53  ;;  %v7287_v49 = vrot.slane %v1215_v26, %v6498_v4  ;;  %v1421_v53 = vld [vmem:[#allocation11 + $0x4] sm:$0x3] }
 0x263   : > { %1950 = vmatprep.subr.mxu1 %v1881_v61  ;;  %v7302_v38 = vrot.slane %v1421_v53, %v6498_v4 }
 0x264   : > { %1951 = vmatpush1.msra.mxu1 %v1880_v6 }
 0x265   : > { %5609 = vmatmul.mubr.msk.f32.vlgmr.msra.gmra.mxu1 %vm907_vm7, %v1833_v32  ;;  %v2052_v34 = vpop.permute.xlu0 %2051 }
 0x266   : > { %v2089_v28 = vsel %vm2085_vm12, %v2052_v34, %v5843_v63  ;;  %1990 = vmatprep.mubr.f32.mxu1 %v9656_v1 }
 0x267   : > { %2154 = vmatprep.subr.mxu0 %v2089_v28  ;;  %v7296_v28 = vrot.slane %v1421_v53, %v6496_v3 }
 0x269   : > { %5610 = vmatmul.mubr.msk.f32.gmra.mxu1 %vm907_vm7, %v1834_v10  ;;  %v2050_v48 = vpop.permute.xlu0 %2049 }
 0x26a   : > { %v2088_v47 = vsel %vm2085_vm12, %v2050_v48, %v2052_v34  ;;  %1996 = vmatprep.mubr.f32.mxu1 %v9656_v1 }
 0x26b   : > { %2155 = vmatpush1.msra.mxu0 %v2088_v47  ;;  %v7156_v24 = vpop.permute.xlu1 %2256 }
 0x26d   : > { %5611 = vmatmul.mubr.msk.f32.gmra.mxu1 %vm907_vm7, %v1835_v37  ;;  %v2048_v51 = vpop.permute.xlu0 %2047 }
 0x26e   : > { %v2087_v52 = vsel %vm2085_vm12, %v2046_v20, %v2048_v51  ;;  %2002 = vmatprep.mubr.f32.mxu1 %v9656_v1 }
 0x26f   : > { %2156 = vmatprep.subr.mxu0 %v2087_v52  ;;  %v7164_v39 = vpop.permute.xlu1 %2251 }
 0x270   : > { %2157 = vmatpush1.msra.mxu0 %v2086_v21 }
 0x271   : > { %5612 = vmatmul.mubr.msk.f32.gmra.mxu1 %vm907_vm7, %v1836_v55  ;;  %5613 = vmatmul.mubr.msk.f32.vlgmr.msra.gmra.mxu0 %vm907_vm7, %v2039_v56 }
 0x272   : > { %2196 = vmatprep.mubr.f32.mxu0 %v9656_v1 }
 0x273   : > { %v7169_v0 = vpop.permute.xlu1 %2572 }
 0x275   : > { %5614 = vmatmul.mubr.msk.f32.gmra.mxu0 %vm907_vm7, %v2040_v12 }
 0x276   : > { %2202 = vmatprep.mubr.f32.mxu0 %v9656_v1 }
 0x277   : > { %v7176_v14 = vpop.permute.xlu1 %2453 }
 0x278   : > { %v2461_v36 = vmul.f32 0.0, %v7176_v14 }
 0x279   : > { %5615 = vmatmul.mubr.msk.f32.gmra.mxu0 %vm907_vm7, %v2041_v23 }
 0x27a   : > { %2208 = vmatprep.mubr.f32.mxu0 %v9656_v1  ;;  %v7162_v2 = vpop.permute.xlu0 %2261 }
 0x27b   : > { %9779 = vst [vmem:[#allocation28_spill] sm:$0xff] %v7162_v2  ;;  %v7185_v8 = vpop.permute.xlu1 %2350 }
 0x27c   : > { %v2358_v27 = vmul.f32 0.0, %v7185_v8 }
 0x27d   : > { %5616 = vmatmul.mubr.msk.f32.gmra.mxu0 %vm907_vm7, %v2042_v60 }
 0x27e   : > { %v7167_v58 = vpop.permute.xlu0 %2246 }
 0x282   : > { %v7171_v62 = vpop.permute.xlu0 %2574 }
 0x283   : > { %v2582_v40 = vmul.f32 0.0, %v7171_v62 }
 0x285   : > { %2620 = vrot.lane.b32.xlu0 %v2582_v40, %s6298_s23  ;;  %2626 = vrot.lane.b32.xlu1 %v2582_v40, %s6298_s23 }
 0x286   : > { %v7181_v13 = vpop.permute.xlu0 %2455 }
 0x289   : > { %2608 = vrot.lane.b32.xlu0 %v2582_v40, %s6298_s23  ;;  %2614 = vrot.lane.b32.xlu1 %v2582_v40, %s6298_s23 }
 0x28a   : > { %v7187_v35 = vpop.permute.xlu0 %2352 }
 0x28d   : > { %2497 = vrot.lane.b32.xlu0 %v2461_v36, %s6297_s17  ;;  %2503 = vrot.lane.b32.xlu1 %v2461_v36, %s6297_s17 }
 0x28e   : > { %v7194_v50 = vpop.permute.xlu0 %2677 }
 0x28f   : > { %v2685_v41 = vmul.f32 0.0, %v7194_v50 }
 0x291   : > { %2485 = vrot.lane.b32.xlu0 %v2461_v36, %s6297_s17  ;;  %2491 = vrot.lane.b32.xlu1 %v2461_v36, %s6297_s17 }
 0x295   : > { %2394 = vrot.lane.b32.xlu0 %v2358_v27, %s6296_s25  ;;  %2400 = vrot.lane.b32.xlu1 %v2358_v27, %s6296_s25 }
 0x299   : > { %2382 = vrot.lane.b32.xlu0 %v2358_v27, %s6296_s25  ;;  %2388 = vrot.lane.b32.xlu1 %v2358_v27, %s6296_s25 }
 0x29d   : > { %2723 = vrot.lane.b32.xlu0 %v2685_v41, %s6299_s14  ;;  %2729 = vrot.lane.b32.xlu1 %v2685_v41, %s6299_s14 }
 0x2a1   : > { %2711 = vrot.lane.b32.xlu0 %v2685_v41, %s6299_s14  ;;  %2717 = vrot.lane.b32.xlu1 %v2685_v41, %s6299_s14 }
 0x2a5   : > { %5852 = vrot.lane.b32.xlu0 %v9656_v1, %s6302_s16  ;;  %5847 = vrot.lane.b32.xlu1 %v9656_v1, %s6302_s16 }
 0x2a9   : > { %v7207_v42 = vpop.f32.mrf.mxu0  ;;  %5862 = vrot.lane.b32.xlu0 %v9656_v1, %s6302_s16  ;;  %5857 = vrot.lane.b32.xlu1 %v9656_v1, %s6302_s16 }
 0x2ab   : > { %v7213_v25 = vpop.f32.mrf.mxu0 }
 0x2ad   : > { %v7215_v22 = vpop.f32.mrf.mxu0  ;;  %5872 = vrot.lane.b32.xlu0 %v9656_v1, %s6302_s16  ;;  %5867 = vrot.lane.b32.xlu1 %v9656_v1, %s6302_s16 }
 0x2af   : > { %v7221_v44 = vpop.f32.mrf.mxu0 }
 0x2b1   : > { %v998_v29 = vpop.f32.mrf.mxu0  ;;  %5882 = vrot.lane.b32.xlu0 %v9656_v1, %s6302_s16  ;;  %5877 = vrot.lane.b32.xlu1 %v9656_v1, %s6302_s16 }
 0x2b2   : > { %v1025_v54 = vmul.f32 %v7224_v17, %v998_v29 }
 0x2b3   : > { %v1000_v15 = vpop.f32.mrf.mxu0 }
 0x2b4   : > { %v1026_v57 = vmul.f32 %v7231_v30, %v1000_v15 }
 0x2b5   : > { %v1004_v18 = vpop.f32.mrf.mxu0  ;;  %5892 = vrot.lane.b32.xlu0 %v9656_v1, %s6302_s16  ;;  %5887 = vrot.lane.b32.xlu1 %v9656_v1, %s6302_s16 }
 0x2b6   : > { %v1027_v31 = vmul.f32 %v7224_v17, %v1004_v18 }
 0x2b7   : > { %v1006_v11 = vpop.f32.mrf.mxu0 }
 0x2b8   : > { %v1028_v5 = vmul.f32 %v7231_v30, %v1006_v11 }
 0x2b9   : > { %5902 = vrot.lane.b32.xlu0 %v9656_v1, %s6303_s24  ;;  %5897 = vrot.lane.b32.xlu1 %v9656_v1, %s6303_s24 }
 0x2bd   : > { %5912 = vrot.lane.b32.xlu0 %v9656_v1, %s6303_s24  ;;  %5907 = vrot.lane.b32.xlu1 %v9656_v1, %s6303_s24 }
 0x2c1   : > { %5922 = vrot.lane.b32.xlu0 %v9656_v1, %s6303_s24  ;;  %5917 = vrot.lane.b32.xlu1 %v9656_v1, %s6303_s24 }
 0x2c5   : > { %5932 = vrot.lane.b32.xlu0 %v9656_v1, %s6303_s24  ;;  %5927 = vrot.lane.b32.xlu1 %v9656_v1, %s6303_s24 }
 0x2c9   : > { %5942 = vrot.lane.b32.xlu0 %v9656_v1, %s6303_s24  ;;  %5937 = vrot.lane.b32.xlu1 %v9656_v1, %s6303_s24 }
 0x2cd   : > { %5947 = vrot.lane.b32.xlu0 %v9656_v1, %s6304_s19 }
 0x2d1   : > { %v7263_v45 = vpop.f32.mrf.mxu1  ;;  %5952 = vrot.lane.b32.xlu0 %v9656_v1, %s6305_s15 }
 0x2d3   : > { %v7267_v46 = vpop.f32.mrf.mxu1 }
 0x2d5   : > { %v7269_v16 = vpop.f32.mrf.mxu1  ;;  %5957 = vrot.lane.b32.xlu0 %v9656_v1, %s6304_s19 }
 0x2d7   : > { %v7275_v33 = vpop.f32.mrf.mxu1 }
 0x2d9   : > { %v7273_v7 = vpop.f32.mrf.mxu0  ;;  %5962 = vrot.lane.b32.xlu0 %v9656_v1, %s6305_s15 }
 0x2db   : > { %v7279_v9 = vpop.f32.mrf.mxu0 }
 0x2dd   : > { %v1203_v19 = vpop.f32.mrf.mxu1  ;;  %5967 = vrot.lane.b32.xlu0 %v9656_v1, %s6304_s19 }
 0x2de   : > { %v7289_v61 = vpop.f32.mrf.mxu0  ;;  %v1231_v6 = vmul.f32 %v7282_v59, %v1203_v19 }
 0x2df   : > { %v1205_v32 = vpop.f32.mrf.mxu1 }
 0x2e0   : > { %v1239_v63 = vadd.f32 %v1231_v6, %v1025_v54  ;;  %v7292_v34 = vpop.f32.mrf.mxu0  ;;  %v1232_v20 = vmul.f32 %v7287_v49, %v1205_v32 }
 0x2e1   : > { %v1209_v10 = vpop.f32.mrf.mxu1  ;;  %5972 = vrot.lane.b32.xlu0 %v9656_v1, %s6305_s15 }
 0x2e2   : > { %v1240_v48 = vadd.f32 %v1232_v20, %v1026_v57  ;;  %v1409_v47 = vpop.f32.mrf.mxu0  ;;  %v1233_v37 = vmul.f32 %v7282_v59, %v1209_v10  ;;  %v1556_v57 = vld [vmem:[#allocation11 + $0x6] sm:$0x3] }
 0x2e3   : > { %v1437_v51 = vmul.f32 %v7296_v28, %v1409_v47  ;;  %v1211_v52 = vpop.f32.mrf.mxu1  ;;  %v7327_v19 = vrot.slane %v1556_v57, %v6498_v4 }
 0x2e4   : > { %v1241_v55 = vadd.f32 %v1233_v37, %v1027_v31  ;;  %v1411_v56 = vpop.f32.mrf.mxu0  ;;  %v1234_v21 = vmul.f32 %v7287_v49, %v1211_v52 }
 0x2e5   : > { %v1445_v12 = vadd.f32 %v1437_v51, %v1239_v63  ;;  %v1438_v23 = vmul.f32 %v7302_v38, %v1411_v56  ;;  %v7307_v60 = vpop.f32.mrf.mxu1  ;;  %5977 = vrot.lane.b32.xlu0 %v9656_v1, %s6304_s19  ;;  %v1804_v56 = vld [vmem:[#allocation11 + $0x8] sm:$0x3] }
 0x2e6   : > { %v1242_v40 = vadd.f32 %v1234_v21, %v1028_v5  ;;  %v1415_v36 = vpop.f32.mrf.mxu0  ;;  %v7322_v5 = vrot.slane %v1556_v57, %v6496_v3 }
 0x2e7   : > { %v1446_v27 = vadd.f32 %v1438_v23, %v1240_v48  ;;  %v1439_v41 = vmul.f32 %v7296_v28, %v1415_v36  ;;  %v7312_v43 = vpop.f32.mrf.mxu1 }
 0x2e8   : > { %v1417_v29 = vpop.f32.mrf.mxu0 }
 0x2e9   : > { %v1447_v54 = vadd.f32 %v1439_v41, %v1241_v55  ;;  %v1440_v15 = vmul.f32 %v7302_v38, %v1417_v29  ;;  %v7315_v18 = vpop.f32.mrf.mxu1  ;;  %5982 = vrot.lane.b32.xlu0 %v9656_v1, %s6305_s15  ;;  %v7351_v41 = vrot.slane %v1804_v56, %v6498_v4 }
 0x2eb   : > { %v1448_v31 = vadd.f32 %v1440_v15, %v1242_v40  ;;  %v7319_v11 = vpop.f32.mrf.mxu1  ;;  %v7344_v40 = vrot.slane %v1804_v56, %v6496_v3 }
 0x2ed   : > { %v1544_v26 = vpop.f32.mrf.mxu1  ;;  %5987 = vrot.lane.b32.xlu0 %v9656_v1, %s6304_s19 }
 0x2ee   : > { %v1572_v53 = vmul.f32 %v7322_v5, %v1544_v26 }
 0x2ef   : > { %v1546_v6 = vpop.f32.mrf.mxu1 }
 0x2f0   : > { %v1580_v32 = vadd.f32 %v1572_v53, %v1445_v12  ;;  %v1573_v63 = vmul.f32 %v7327_v19, %v1546_v6 }
 0x2f1   : > { %v1550_v20 = vpop.f32.mrf.mxu1  ;;  %5992 = vrot.lane.b32.xlu0 %v9656_v1, %s6305_s15 }
 0x2f2   : > { %v1780_v10 = vpop.f32.mrf.mxu0  ;;  %v1581_v48 = vadd.f32 %v1573_v63, %v1446_v27  ;;  %v1574_v47 = vmul.f32 %v7322_v5, %v1550_v20 }
 0x2f3   : > { %v1552_v37 = vpop.f32.mrf.mxu1 }
 0x2f4   : > { %v7334_v51 = vpop.f32.mrf.mxu0  ;;  %v1582_v52 = vadd.f32 %v1574_v47, %v1447_v54  ;;  %v1575_v55 = vmul.f32 %v7327_v19, %v1552_v37 }
 0x2f5   : > { %5997 = vrot.lane.b32.xlu0 %v9656_v1, %s6304_s19 }
 0x2f6   : > { %v7339_v21 = vpop.f32.mrf.mxu0  ;;  %v1583_v12 = vadd.f32 %v1575_v55, %v1448_v31 }
 0x2f7   : > { %v7348_v27 = vpop.permute.xlu0 %2620 }
 0x2f8   : > { %v7341_v23 = vpop.f32.mrf.mxu0  ;;  %9780 = vst [vmem:[#allocation29_spill] sm:$0xff] %v7348_v27 }
 0x2f9   : > { %6002 = vrot.lane.b32.xlu0 %v9656_v1, %s6305_s15 }
 0x2fa   : > { %v1792_v36 = vpop.f32.mrf.mxu0 }
 0x2fb   : > { %v1820_v29 = vmul.f32 %v7344_v40, %v1792_v36  ;;  %v7356_v63 = vpop.permute.xlu0 %2608 }
 0x2fc   : > { %v1794_v54 = vpop.f32.mrf.mxu0  ;;  %9781 = vst [vmem:[#allocation30_spill] sm:$0xff] %v7356_v63 }
 0x2fd   : > { %v1828_v15 = vadd.f32 %v1820_v29, %v1580_v32  ;;  %v1821_v57 = vmul.f32 %v7351_v41, %v1794_v54  ;;  %v1227_v54 = vmul.f32 %v7282_v59, %v7263_v45 }
 0x2fe   : > { %v1798_v31 = vpop.f32.mrf.mxu0 }
 0x2ff   : > { %v1829_v26 = vadd.f32 %v1821_v57, %v1581_v48  ;;  %v1822_v53 = vmul.f32 %v7344_v40, %v1798_v31  ;;  %v7359_v55 = vpop.permute.xlu0 %2497  ;;  %v1021_v48 = vmul.f32 %v7224_v17, %v7207_v42  ;;  %v1568_v42 = vmul.f32 %v7322_v5, %v7307_v60 }
 0x300   : > { %v1800_v6 = vpop.f32.mrf.mxu0  ;;  %9782 = vst [vmem:[#allocation31_spill] sm:$0xff] %v7359_v55 }
 0x301   : > { %v1830_v20 = vadd.f32 %v1822_v53, %v1582_v52  ;;  %v1823_v47 = vmul.f32 %v7351_v41, %v1800_v6  ;;  %v1235_v52 = vadd.f32 %v1227_v54, %v1021_v48  ;;  %v1022_v53 = vmul.f32 %v7231_v30, %v7213_v25 }
 0x302   : > { %v1228_v6 = vmul.f32 %v7287_v49, %v7267_v46  ;;  %v1434_v25 = vmul.f32 %v7302_v38, %v7279_v9  ;;  %v2216_v46 = vld [vmem:[#allocation11 + $0xc] sm:$0x3]  ;;  %v1569_v9 = vmul.f32 %v7327_v19, %v7312_v43 }
 0x303   : > { %v1831_v37 = vadd.f32 %v1823_v47, %v1583_v12  ;;  %v7361_v56 = vpop.permute.xlu0 %2485  ;;  %v1433_v12 = vmul.f32 %v7296_v28, %v7273_v7  ;;  %v2010_v47 = vld [vmem:[#allocation11 + $0xa] sm:$0x3] }
 0x304   : > { %9783 = vst [vmem:[#allocation32_spill] sm:$0xff] %v7361_v56  ;;  %v7386_v48 = vrot.slane %v2010_v47, %v6496_v3  ;;  %v1236_v54 = vadd.f32 %v1228_v6, %v1022_v53  ;;  %v7397_v55 = vrot.slane %v2010_v47, %v6498_v4 }
 0x306   : > { %v1442_v53 = vadd.f32 %v1434_v25, %v1236_v54  ;;  %v1817_v54 = vmul.f32 %v7351_v41, %v7334_v51 }
 0x307   : > { %v7363_v36 = vpop.permute.xlu0 %2394 }
 0x308   : > { %9784 = vst [vmem:[#allocation33_spill] sm:$0xff] %v7363_v36  ;;  %v1577_v2 = vadd.f32 %v1569_v9, %v1442_v53 }
 0x30b   : > { %v7365_v32 = vpop.permute.xlu0 %2382 }
 0x30c   : > { %9785 = vst [vmem:[#allocation34_spill] sm:$0xff] %v7365_v32 }
 0x30f   : > { %v7367_v29 = vpop.permute.xlu0 %2723 }
 0x310   : > { %9786 = vst [vmem:[#allocation35_spill] sm:$0xff] %v7367_v29  ;;  %v1441_v29 = vadd.f32 %v1433_v12, %v1235_v52  ;;  %v1816_v52 = vmul.f32 %v7344_v40, %v1780_v10 }
 0x312   : > { %v1576_v36 = vadd.f32 %v1568_v42, %v1441_v29 }
 0x313   : > { %v7375_v57 = vpop.permute.xlu0 %2711 }
 0x314   : > { %9787 = vst [vmem:[#allocation36_spill] sm:$0xff] %v7375_v57  ;;  %v1824_v63 = vadd.f32 %v1816_v52, %v1576_v36 }
 0x317   : > { %v7388_v7 = vpop.permute.xlu0 %5852 }
 0x318   : > { %9788 = vst [vmem:[#allocation37_spill] sm:$0xff] %v7388_v7  ;;  %v7401_v7 = vrot.slane %v2216_v46, %v6496_v3 }
 0x31b   : > { %v7406_v42 = vpop.permute.xlu0 %5862 }
 0x31f   : > { %v7421_v51 = vpop.permute.xlu0 %5872 }
 0x325   : > { %v1986_v31 = vpop.f32.mrf.mxu1 }
 0x326   : > { %v2022_v60 = vmul.f32 %v7386_v48, %v1986_v31 }
 0x327   : > { %v1988_v1 = vpop.f32.mrf.mxu1 }
 0x328   : > { %v2030_v47 = vadd.f32 %v2022_v60, %v1824_v63  ;;  %v2023_v63 = vmul.f32 %v7397_v55, %v1988_v1  ;;  %v1023_v1 = vmul.f32 %v7224_v17, %v7215_v22 }
 0x329   : > { %v7383_v45 = vpop.f32.mrf.mxu1 }
 0x32b   : > { %v7392_v27 = vpop.f32.mrf.mxu1 }
 0x32d   : > { %v1998_v12 = vpop.f32.mrf.mxu1 }
 0x32e   : > { %v2026_v57 = vmul.f32 %v7386_v48, %v1998_v12 }
 0x32f   : > { %v2000_v6 = vpop.f32.mrf.mxu1 }
 0x330   : > { %v2034_v29 = vadd.f32 %v2026_v57, %v1828_v15  ;;  %v2027_v10 = vmul.f32 %v7397_v55, %v2000_v6  ;;  %v7413_v15 = vrot.slane %v2216_v46, %v6498_v4 }
 0x331   : > { %v2004_v31 = vpop.f32.mrf.mxu1  ;;  %v2192_v32 = vpop.f32.mrf.mxu0 }
 0x332   : > { %v2035_v56 = vadd.f32 %v2027_v10, %v1829_v26  ;;  %v2028_v12 = vmul.f32 %v7386_v48, %v2004_v31  ;;  %v2228_v3 = vmul.f32 %v7401_v7, %v2192_v32  ;;  %v1825_v32 = vadd.f32 %v1817_v54, %v1577_v2 }
 0x333   : > { %v2006_v43 = vpop.f32.mrf.mxu1  ;;  %v2194_v25 = vpop.f32.mrf.mxu0  ;;  %v1229_v2 = vmul.f32 %v7282_v59, %v7269_v16  ;;  %v1435_v59 = vmul.f32 %v7296_v28, %v7289_v61 }
 0x334   : > { %v2036_v36 = vadd.f32 %v2028_v12, %v1830_v20  ;;  %v2236_v57 = vadd.f32 %v2228_v3, %v2030_v47  ;;  %v2029_v52 = vmul.f32 %v7397_v55, %v2006_v43  ;;  %v2229_v53 = vmul.f32 %v7413_v15, %v2194_v25  ;;  %v7438_v25 = vpop.permute.xlu0 %5882 }
 0x335   : > { %v2198_v26 = vpop.f32.mrf.mxu0  ;;  %v2031_v46 = vadd.f32 %v2023_v63, %v1825_v32  ;;  %v1237_v16 = vadd.f32 %v1229_v2, %v1023_v1  ;;  %v2024_v2 = vmul.f32 %v7386_v48, %v7383_v45 }
 0x336   : > { %v2264_v60 = vadd.f32 %v7167_v58, %v2236_v57  ;;  %v2037_v6 = vadd.f32 %v2029_v52, %v1831_v37  ;;  %v7440_v57 = vpop.permute.xlu1 %2675 }
 0x337   : > { %v7419_v9 = vpop.f32.mrf.mxu0  ;;  %v2237_v37 = vadd.f32 %v2229_v53, %v2031_v46  ;;  %v1443_v61 = vadd.f32 %v1435_v59, %v1237_v16  ;;  %v2025_v16 = vmul.f32 %v7397_v55, %v7392_v27 }
 0x338   : > { %v7423_v10 = vmax.f32 %v2264_v60, 0.0  ;;  %v7466_v46 = vpop.permute.xlu0 %5892  ;;  %v2231_v59 = vmul.f32 %v7413_v15, %v7419_v9 }
 0x339   : > { %v2204_v20 = vpop.f32.mrf.mxu0  ;;  %9791 = vst [vmem:[#allocation40_spill] sm:$0xff] %v7466_v46 }
 0x33a   : > { %9789 = vst [vmem:[#allocation38_spill] sm:$0xff] %v7423_v10  ;;  %v2232_v3 = vmul.f32 %v7401_v7, %v2204_v20  ;;  %2937 = vrot.lane.b32.xlu1 %v7423_v10, %s6302_s16  ;;  %v2580_v47 = vmul.f32 %v7169_v0, %v7423_v10  ;;  %v2683_v63 = vmul.f32 %v7440_v57, %v7423_v10  ;;  %v7456_v32 = vpop.permute.xlu1 %2626 }
 0x33b   : > { %v2206_v31 = vpop.f32.mrf.mxu0  ;;  %v7477_v20 = vsel %vm638_vm2, %v7176_v14, %v7181_v13 }
 0x33c   : > { %v7434_v12 = vadd.f32 %v2232_v3, %v2034_v29  ;;  %v2233_v54 = vmul.f32 %v7413_v15, %v2206_v31  ;;  %2604 = vrot.lane.b32.xlu0 %v2580_v47, %s6298_s23  ;;  %v2265_v29 = vadd.f32 %v7167_v58, %v2237_v37  ;;  %v1570_v58 = vmul.f32 %v7322_v5, %v7315_v18 }
 0x33d   : > { %v2210_v43 = vpop.f32.mrf.mxu0  ;;  %v1024_v18 = vmul.f32 %v7231_v30, %v7221_v44  ;;  %v1230_v5 = vmul.f32 %v7287_v49, %v7275_v33  ;;  %v2462_v1 = vmul.f32 %v7477_v20, %v7423_v10  ;;  %v2230_v44 = vmul.f32 %v7401_v7, %v2198_v26 }
 0x33e   : > { %v7442_v22 = vadd.f32 %v2233_v54, %v2035_v56  ;;  %v2234_v17 = vmul.f32 %v7401_v7, %v2210_v43  ;;  %3275 = vrot.lane.b32.xlu1 %v7423_v10, %s6303_s24  ;;  %v7464_v28 = vmax.f32 %v2265_v29, 0.0  ;;  %v7483_v3 = vpop.permute.xlu1 %2614  ;;  %v7498_v30 = vsel %vm596_vm5, %v7185_v8, %v7187_v35 }
 0x33f   : > { %v2212_v52 = vpop.f32.mrf.mxu0  ;;  %v1238_v33 = vadd.f32 %v1230_v5, %v1024_v18  ;;  %v1436_v49 = vmul.f32 %v7302_v38, %v7292_v34  ;;  %v1571_v34 = vmul.f32 %v7327_v19, %v7319_v11  ;;  %v7524_v47 = vsel %vm655_vm3, %v7169_v0, %v7171_v62 }
 0x340   : > { %v7452_v60 = vadd.f32 %v2234_v17, %v2036_v36  ;;  %v2235_v56 = vmul.f32 %v7413_v15, %v2212_v52  ;;  %2707 = vrot.lane.b32.xlu0 %v2683_v63, %s6299_s14  ;;  %9790 = vst [vmem:[#allocation39_spill] sm:$0xff] %v7464_v28  ;;  %v1578_v36 = vadd.f32 %v1570_v58, %v1443_v61 }
 0x341   : > { %v2463_v8 = vmul.f32 %v7181_v13, %v7464_v28  ;;  %v1444_v37 = vadd.f32 %v1436_v49, %v1238_v33  ;;  %v2360_v31 = vmul.f32 %v7187_v35, %v7464_v28  ;;  %v1819_v43 = vmul.f32 %v7351_v41, %v7341_v23 }
 0x342   : > { %v7458_v53 = vadd.f32 %v2235_v56, %v2037_v6  ;;  %3871 = vrot.lane.b32.xlu1 %v7423_v10, %s6304_s19  ;;  %v1818_v6 = vmul.f32 %v7344_v40, %v7339_v21  ;;  %v7491_v21 = vpop.permute.xlu0 %5902  ;;  %v2359_v40 = vmul.f32 %v7498_v30, %v7423_v10  ;;  %v7506_v48 = vpop.permute.xlu1 %2503  ;;  %v2581_v19 = vmul.f32 %v7524_v47, %v7464_v28 }
 0x343   : > { %v1579_v54 = vadd.f32 %v1571_v34, %v1444_v37  ;;  %v7543_v23 = vsel %vm613_vm0, %v7440_v57, %v7194_v50 }
 0x344   : > { %2939 = vrot.lane.b32.xlu0 %v7464_v28, %s6302_s16  ;;  %v1826_v14 = vadd.f32 %v1818_v6, %v1578_v36  ;;  %v2684_v29 = vmul.f32 %v7543_v23, %v7464_v28 }
 0x345   : > { %v1827_v41 = vadd.f32 %v1819_v43, %v1579_v54  ;;  %v2269_v54 = vadd.f32 %v7156_v24, %v7442_v22 }
 0x346   : > { %4210 = vrot.lane.b32.xlu1 %v7423_v10, %s6305_s15  ;;  %v2032_v45 = vadd.f32 %v2024_v2, %v1826_v14  ;;  %v7511_v26 = vpop.permute.xlu0 %5912  ;;  %v7528_v11 = vpop.permute.xlu1 %2491 }
 0x347   : > { %9792 = vst [vmem:[#allocation41_spill] sm:$0xff] %v7511_v26  ;;  %v2033_v27 = vadd.f32 %v2025_v16, %v1827_v41  ;;  %v7648_v41 = vmax.f32 %v2269_v54, 0.0 }
 0x348   : > { %3277 = vrot.lane.b32.xlu0 %v7464_v28, %s6303_s24  ;;  %v2238_v7 = vadd.f32 %v2230_v44, %v2032_v45  ;;  %v2268_v44 = vadd.f32 %v7156_v24, %v7434_v12 }
 0x349   : > { %v2239_v63 = vadd.f32 %v2231_v59, %v2033_v27  ;;  %9805 = vst [vmem:[#allocation54_spill] sm:$0xff] %v7648_v41  ;;  %v2469_v24 = vmul.f32 %v7181_v13, %v7648_v41 }
 0x34a   : > { %2487 = vrot.lane.b32.xlu1 %v2462_v1, %s6297_s17  ;;  %v2266_v38 = vadd.f32 %v7164_v39, %v2238_v7  ;;  %v7533_v17 = vpop.permute.xlu0 %5922  ;;  %v7551_v55 = vpop.permute.xlu1 %2400  ;;  %v7614_v7 = vmax.f32 %v2268_v44, 0.0 }
 0x34b   : > { %9793 = vst [vmem:[#allocation42_spill] sm:$0xff] %v7533_v17  ;;  %v2267_v15 = vadd.f32 %v7164_v39, %v2239_v63  ;;  %v9807_v63 = vld [vmem:[#allocation28_spill] sm:$0xff] }
 0x34c   : > { %3873 = vrot.lane.b32.xlu0 %v7464_v28, %s6304_s19  ;;  %v7538_v62 = vmax.f32 %v2266_v38, 0.0  ;;  %9801 = vst [vmem:[#allocation50_spill] sm:$0xff] %v7614_v7  ;;  %v2586_v34 = vmul.f32 %v7169_v0, %v7614_v7  ;;  %v2689_v43 = vmul.f32 %v7440_v57, %v7614_v7  ;;  %v2365_v59 = vmul.f32 %v7498_v30, %v7614_v7 }
 0x34d   : > { %v7571_v58 = vmax.f32 %v2267_v15, 0.0  ;;  %v2366_v15 = vmul.f32 %v7187_v35, %v7648_v41 }
 0x34e   : > { %2384 = vrot.lane.b32.xlu1 %v2359_v40, %s6296_s25  ;;  %9794 = vst [vmem:[#allocation43_spill] sm:$0xff] %v7538_v62  ;;  %v7554_v52 = vpop.permute.xlu0 %5932  ;;  %v2583_v50 = vmul.f32 %v7169_v0, %v7538_v62  ;;  %v7562_v9 = vpop.permute.xlu1 %2388  ;;  %v2686_v56 = vmul.f32 %v7440_v57, %v7538_v62  ;;  %v2465_v39 = vmul.f32 %v7477_v20, %v7538_v62 }
 0x34f   : > { %9795 = vst [vmem:[#allocation44_spill] sm:$0xff] %v7554_v52  ;;  %9797 = vst [vmem:[#allocation46_spill] sm:$0xff] %v7571_v58  ;;  %v2362_v18 = vmul.f32 %v7498_v30, %v7538_v62  ;;  %v2584_v2 = vmul.f32 %v7524_v47, %v7571_v58  ;;  %v2687_v33 = vmul.f32 %v7543_v23, %v7571_v58 }
 0x350   : > { %2489 = vrot.lane.b32.xlu0 %v2463_v8, %s6297_s17  ;;  %v2466_v40 = vmul.f32 %v7181_v13, %v7571_v58  ;;  %v2363_v8 = vmul.f32 %v7187_v35, %v7571_v58 }
 0x352   : > { %4212 = vrot.lane.b32.xlu1 %v7464_v28, %s6305_s15  ;;  %v7568_v61 = vpop.permute.xlu0 %5942  ;;  %v7575_v36 = vpop.permute.xlu1 %2729 }
 0x353   : > { %9796 = vst [vmem:[#allocation45_spill] sm:$0xff] %v7568_v61 }
 0x354   : > { %2386 = vrot.lane.b32.xlu0 %v2360_v31, %s6296_s25 }
 0x356   : > { %2606 = vrot.lane.b32.xlu1 %v2581_v19, %s6298_s23  ;;  %v7581_v6 = vpop.permute.xlu0 %5947  ;;  %v7588_v5 = vpop.permute.xlu1 %2717  ;;  %v2468_v19 = vmul.f32 %v7477_v20, %v7614_v7 }
 0x357   : > { %9798 = vst [vmem:[#allocation47_spill] sm:$0xff] %v7581_v6 }
 0x358   : > { %2943 = vrot.lane.b32.xlu0 %v7538_v62, %s6302_s16 }
 0x35a   : > { %2709 = vrot.lane.b32.xlu1 %v2684_v29, %s6299_s14  ;;  %v7591_v1 = vpop.permute.xlu0 %5952  ;;  %v7597_v14 = vpop.permute.xlu1 %5847 }
 0x35b   : > { %9799 = vst [vmem:[#allocation48_spill] sm:$0xff] %v7591_v1  ;;  %v9835_v1 = vld [vmem:[#allocation36_spill] sm:$0xff] }
 0x35c   : > { %3281 = vrot.lane.b32.xlu0 %v7538_v62, %s6303_s24 }
 0x35e   : > { %2610 = vrot.lane.b32.xlu1 %v2583_v50, %s6298_s23  ;;  %v7606_v49 = vpop.permute.xlu0 %5957  ;;  %v7612_v45 = vpop.permute.xlu1 %5857  ;;  %v2270_v50 = vadd.f32 %v9807_v63, %v7452_v60 }
 0x35f   : > { %9800 = vst [vmem:[#allocation49_spill] sm:$0xff] %v7606_v49 }
 0x360   : > { %3877 = vrot.lane.b32.xlu0 %v7538_v62, %s6304_s19 }
 0x362   : > { %2713 = vrot.lane.b32.xlu1 %v2686_v56, %s6299_s14  ;;  %v7620_v12 = vpop.permute.xlu0 %5962  ;;  %v7623_v37 = vpop.permute.xlu1 %5867 }
 0x363   : > { %9802 = vst [vmem:[#allocation51_spill] sm:$0xff] %v7620_v12 }
 0x364   : > { %4216 = vrot.lane.b32.xlu0 %v7538_v62, %s6305_s15 }
 0x366   : > { %2945 = vrot.lane.b32.xlu1 %v7571_v58, %s6302_s16  ;;  %v7631_v38 = vpop.permute.xlu0 %5967  ;;  %v7636_v31 = vpop.permute.xlu1 %5877 }
 0x367   : > { %9803 = vst [vmem:[#allocation52_spill] sm:$0xff] %v7631_v38 }
 0x368   : > { %2493 = vrot.lane.b32.xlu0 %v2465_v39, %s6297_s17  ;;  %v7675_v39 = vmax.f32 %v2270_v50, 0.0 }
 0x36a   : > { %3283 = vrot.lane.b32.xlu1 %v7571_v58, %s6303_s24  ;;  %v7645_v16 = vpop.permute.xlu0 %5972  ;;  %v7652_v29 = vpop.permute.xlu1 %5887  ;;  %9809 = vst [vmem:[#allocation56_spill] sm:$0xff] %v7675_v39  ;;  %v2368_v54 = vmul.f32 %v7498_v30, %v7675_v39  ;;  %v2589_v30 = vmul.f32 %v7169_v0, %v7675_v39  ;;  %v2692_v50 = vmul.f32 %v7440_v57, %v7675_v39 }
 0x36b   : > { %9804 = vst [vmem:[#allocation53_spill] sm:$0xff] %v7645_v16 }
 0x36c   : > { %2390 = vrot.lane.b32.xlu0 %v2362_v18, %s6296_s25 }
 0x36e   : > { %3879 = vrot.lane.b32.xlu1 %v7571_v58, %s6304_s19  ;;  %v7659_v22 = vpop.permute.xlu0 %5977  ;;  %v7664_v27 = vpop.permute.xlu1 %5897 }
 0x36f   : > { %9806 = vst [vmem:[#allocation55_spill] sm:$0xff] %v7659_v22 }
 0x370   : > { %2612 = vrot.lane.b32.xlu0 %v2584_v2, %s6298_s23  ;;  %v2587_v2 = vmul.f32 %v7524_v47, %v7648_v41 }
 0x372   : > { %4218 = vrot.lane.b32.xlu1 %v7571_v58, %s6305_s15  ;;  %v7671_v56 = vpop.permute.xlu0 %5982  ;;  %v7677_v18 = vpop.permute.xlu1 %5907 }
 0x373   : > { %9808 = vst [vmem:[#allocation28_spill] sm:$0xff] %v7671_v56  ;;  %v9828_v56 = vld [vmem:[#allocation30_spill] sm:$0xff] }
 0x374   : > { %2715 = vrot.lane.b32.xlu0 %v2687_v33, %s6299_s14  ;;  %v2471_v33 = vmul.f32 %v7477_v20, %v7675_v39 }
 0x376   : > { %2495 = vrot.lane.b32.xlu1 %v2466_v40, %s6297_s17  ;;  %v7683_v60 = vpop.permute.xlu0 %5987  ;;  %v7690_v44 = vpop.permute.xlu1 %5917  ;;  %v2690_v40 = vmul.f32 %v7543_v23, %v7648_v41 }
 0x377   : > { %9810 = vst [vmem:[#allocation57_spill] sm:$0xff] %v7683_v60  ;;  %9811 = vst [vmem:[#allocation58_spill] sm:$0xff] %v7690_v44 }
 0x378   : > { %2949 = vrot.lane.b32.xlu0 %v7614_v7, %s6302_s16 }
 0x37a   : > { %2392 = vrot.lane.b32.xlu1 %v2363_v8, %s6296_s25  ;;  %v7697_v8 = vpop.permute.xlu0 %5992 }
 0x37b   : > { %9812 = vst [vmem:[#allocation59_spill] sm:$0xff] %v7697_v8 }
 0x37c   : > { %3287 = vrot.lane.b32.xlu0 %v7614_v7, %s6303_s24 }
 0x37e   : > { %3883 = vrot.lane.b32.xlu1 %v7614_v7, %s6304_s19 }
 0x380   : > { %2616 = vrot.lane.b32.xlu0 %v2586_v34, %s6298_s23  ;;  %v2271_v34 = vadd.f32 %v9807_v63, %v7458_v53 }
 0x382   : > { %4222 = vrot.lane.b32.xlu1 %v7614_v7, %s6305_s15  ;;  %v7709_v20 = vmax.f32 %v2271_v34, 0.0 }
 0x384   : > { %2719 = vrot.lane.b32.xlu0 %v2689_v43, %s6299_s14  ;;  %v7704_v43 = vpop.permute.xlu1 %5927  ;;  %9814 = vst [vmem:[#allocation61_spill] sm:$0xff] %v7709_v20 }
 0x385   : > { %9813 = vst [vmem:[#allocation60_spill] sm:$0xff] %v7704_v43 }
 0x386   : > { %2499 = vrot.lane.b32.xlu1 %v2468_v19, %s6297_s17  ;;  %v7711_v19 = vpop.permute.xlu0 %5997 }
 0x387   : > { %9815 = vst [vmem:[#allocation62_spill] sm:$0xff] %v7711_v19 }
 0x388   : > { %3885 = vrot.lane.b32.xlu0 %v7648_v41, %s6304_s19  ;;  %v7717_v53 = vpop.permute.xlu1 %5937 }
 0x389   : > { %9816 = vst [vmem:[#allocation63_spill] sm:$0xff] %v7717_v53 }
 0x38a   : > { %2396 = vrot.lane.b32.xlu1 %v2365_v59, %s6296_s25  ;;  %v7723_v59 = vpop.permute.xlu0 %6002 }
 0x38b   : > { %9817 = vst [vmem:[#allocation64_spill] sm:$0xff] %v7723_v59 }
 0x38c   : > { %2501 = vrot.lane.b32.xlu0 %v2469_v24, %s6297_s17  ;;  %v2590_v24 = vmul.f32 %v7524_v47, %v7709_v20 }
 0x38e   : > { %2951 = vrot.lane.b32.xlu1 %v7648_v41, %s6302_s16 }
 0x390   : > { %2398 = vrot.lane.b32.xlu0 %v2366_v15, %s6296_s25  ;;  %v2693_v15 = vmul.f32 %v7543_v23, %v7709_v20  ;;  %v2472_v23 = vmul.f32 %v7181_v13, %v7709_v20 }
 0x392   : > { %3289 = vrot.lane.b32.xlu1 %v7648_v41, %s6303_s24 }
 0x394   : > { %3889 = vrot.lane.b32.xlu0 %v7675_v39, %s6304_s19 }
 0x396   : > { %4224 = vrot.lane.b32.xlu1 %v7648_v41, %s6305_s15 }
 0x398   : > { %4228 = vrot.lane.b32.xlu0 %v7675_v39, %s6305_s15 }
 0x39a   : > { %2618 = vrot.lane.b32.xlu1 %v2587_v2, %s6298_s23 }
 0x39c   : > { %2505 = vrot.lane.b32.xlu0 %v2471_v33, %s6297_s17 }
 0x39e   : > { %2721 = vrot.lane.b32.xlu1 %v2690_v40, %s6299_s14 }
 0x3a0   : > { %2402 = vrot.lane.b32.xlu0 %v2368_v54, %s6296_s25 }
 0x3a2   : > { %2955 = vrot.lane.b32.xlu1 %v7675_v39, %s6302_s16 }
 0x3a4   : > { %2957 = vrot.lane.b32.xlu0 %v7709_v20, %s6302_s16 }
 0x3a6   : > { %3293 = vrot.lane.b32.xlu1 %v7675_v39, %s6303_s24 }
 0x3a8   : > { %3295 = vrot.lane.b32.xlu0 %v7709_v20, %s6303_s24 }
 0x3aa   : > { %2622 = vrot.lane.b32.xlu1 %v2589_v30, %s6298_s23  ;;  %v2369_v30 = vmul.f32 %v7187_v35, %v7709_v20 }
 0x3ac   : > { %v7728_v63 = vpop.permute.xlu1 %2937  ;;  %2624 = vrot.lane.b32.xlu0 %v2590_v24, %s6298_s23 }
 0x3ae   : > { %2725 = vrot.lane.b32.xlu1 %v2692_v50, %s6299_s14  ;;  %v2605_v0 = vpop.permute.xlu0 %2604 }
 0x3b0   : > { %v7736_v2 = vpop.permute.xlu1 %3275  ;;  %2727 = vrot.lane.b32.xlu0 %v2693_v15, %s6299_s14  ;;  %v9823_v15 = vld [vmem:[#allocation32_spill] sm:$0xff]  ;;  %s6308_s14 = smov [#allocation16]  }
 0x3b1   : > { %9818 = vst [vmem:[#allocation65_spill] sm:$0xff] %v7736_v2 }
 0x3b2   : > { %3891 = vrot.lane.b32.xlu1 %v7709_v20, %s6304_s19  ;;  %v2708_v47 = vpop.permute.xlu0 %2707 }
 0x3b4   : > { %v7741_v33 = vpop.permute.xlu1 %3871 }
 0x3b5   : > { %9819 = vst [vmem:[#allocation66_spill] sm:$0xff] %v7741_v33 }
 0x3b6   : > { %4230 = vrot.lane.b32.xlu1 %v7709_v20, %s6305_s15  ;;  %v7745_v57 = vpop.permute.xlu0 %2939 }
 0x3b8   : > { %v7747_v40 = vpop.permute.xlu1 %4210 }
 0x3b9   : > { %9820 = vst [vmem:[#allocation67_spill] sm:$0xff] %v7747_v40  ;;  %v9826_v40 = vld [vmem:[#allocation34_spill] sm:$0xff] }
 0x3ba   : > { %2507 = vrot.lane.b32.xlu1 %v2472_v23, %s6297_s17  ;;  %v7752_v34 = vpop.permute.xlu0 %3277 }
 0x3bb   : > { %9821 = vst [vmem:[#allocation68_spill] sm:$0xff] %v7752_v34 }
 0x3bc   : > { %v2488_v54 = vpop.permute.xlu1 %2487 }
 0x3bd   : > { %v7761_v59 = vsel %vm655_vm3, %v9823_v15, %v2488_v54 }
 0x3be   : > { %2404 = vrot.lane.b32.xlu1 %v2369_v30, %s6296_s25  ;;  %v7757_v24 = vpop.permute.xlu0 %3873  ;;  %9824 = vst [vmem:[#allocation32_spill] sm:$0xff] %v7761_v59 }
 0x3bf   : > { %9822 = vst [vmem:[#allocation69_spill] sm:$0xff] %v7757_v24 }
 0x3c0   : > { %v2385_v50 = vpop.permute.xlu1 %2384 }
 0x3c1   : > { %v7769_v8 = vsel %vm613_vm0, %v9826_v40, %v2385_v50 }
 0x3c2   : > { %2913 = vrot.lane.b32.xlu1 %v7761_v59, %s6302_s16  ;;  %v2490_v13 = vpop.permute.xlu0 %2489  ;;  %9827 = vst [vmem:[#allocation34_spill] sm:$0xff] %v7769_v8 }
 0x3c3   : > { %v7784_v40 = vsel %vm655_vm3, %v2488_v54, %v2490_v13 }
 0x3c4   : > { %v7765_v23 = vpop.permute.xlu1 %4212  ;;  %9830 = vst [vmem:[#allocation71_spill] sm:$0xff] %v7784_v40 }
 0x3c5   : > { %9825 = vst [vmem:[#allocation70_spill] sm:$0xff] %v7765_v23 }
 0x3c6   : > { %2889 = vrot.lane.b32.xlu1 %v7769_v8, %s6302_s16  ;;  %v2387_v35 = vpop.permute.xlu0 %2386 }
 0x3c7   : > { %v7795_v19 = vsel %vm613_vm0, %v2385_v50, %v2387_v35 }
 0x3c8   : > { %v2607_v30 = vpop.permute.xlu1 %2606  ;;  %9832 = vst [vmem:[#allocation73_spill] sm:$0xff] %v7795_v19 }
 0x3c9   : > { %v7775_v16 = vsel %vm638_vm2, %v2607_v30, %v9828_v56  ;;  %v7798_v33 = vsel %vm638_vm2, %v2605_v0, %v2607_v30 }
 0x3ca   : > { %9829 = vst [vmem:[#allocation30_spill] sm:$0xff] %v7775_v16  ;;  %3251 = vrot.lane.b32.xlu1 %v7761_v59, %s6303_s24  ;;  %2963 = vrot.lane.b32.xlu0 %v7775_v16, %s6302_s16  ;;  %v7781_v15 = vpop.permute.xlu0 %2943  ;;  %9833 = vst [vmem:[#allocation74_spill] sm:$0xff] %v7798_v33 }
 0x3cc   : > { %v2710_v23 = vpop.permute.xlu1 %2709 }
 0x3cd   : > { %v7807_v60 = vsel %vm596_vm5, %v2708_v47, %v2710_v23  ;;  %v7811_v24 = vsel %vm596_vm5, %v2710_v23, %v9835_v1 }
 0x3ce   : > { %3227 = vrot.lane.b32.xlu1 %v7769_v8, %s6303_s24  ;;  %2915 = vrot.lane.b32.xlu0 %v7784_v40, %s6302_s16  ;;  %v7790_v56 = vpop.permute.xlu0 %3281 }
 0x3cf   : > { %9831 = vst [vmem:[#allocation72_spill] sm:$0xff] %v7790_v56 }
 0x3d0   : > { %v7792_v12 = vpop.permute.xlu1 %2610 }
 0x3d2   : > { %2961 = vrot.lane.b32.xlu1 %v7798_v33, %s6302_s16  ;;  %2891 = vrot.lane.b32.xlu0 %v7795_v19, %s6302_s16  ;;  %v7804_v54 = vpop.permute.xlu0 %3877 }
 0x3d3   : > { %9834 = vst [vmem:[#allocation75_spill] sm:$0xff] %v7804_v54 }
 0x3d4   : > { %v2714_v13 = vpop.permute.xlu1 %2713 }
 0x3d6   : > { %2985 = vrot.lane.b32.xlu1 %v7807_v60, %s6302_s16  ;;  %2987 = vrot.lane.b32.xlu0 %v7811_v24, %s6302_s16  ;;  %v7817_v0 = vpop.permute.xlu0 %4216 }
 0x3d7   : > { %9836 = vst [vmem:[#allocation36_spill] sm:$0xff] %v7817_v0 }
 0x3d8   : > { %v7819_v50 = vpop.permute.xlu1 %2945 }
 0x3da   : > { %3299 = vrot.lane.b32.xlu1 %v7798_v33, %s6303_s24  ;;  %3301 = vrot.lane.b32.xlu0 %v7775_v16, %s6303_s24  ;;  %v2494_v47 = vpop.permute.xlu0 %2493 }
 0x3db   : > { %v7863_v61 = vsel %vm655_vm3, %v7528_v11, %v2494_v47 }
 0x3dc   : > { %v7825_v35 = vpop.permute.xlu1 %3283  ;;  %9843 = vst [vmem:[#allocation82_spill] sm:$0xff] %v7863_v61 }
 0x3dd   : > { %9837 = vst [vmem:[#allocation76_spill] sm:$0xff] %v7825_v35 }
 0x3de   : > { %3323 = vrot.lane.b32.xlu1 %v7807_v60, %s6303_s24  ;;  %3253 = vrot.lane.b32.xlu0 %v7784_v40, %s6303_s24  ;;  %v2391_v1 = vpop.permute.xlu0 %2390 }
 0x3e0   : > { %v7831_v23 = vpop.permute.xlu1 %3879 }
 0x3e1   : > { %9838 = vst [vmem:[#allocation77_spill] sm:$0xff] %v7831_v23 }
 0x3e2   : > { %3895 = vrot.lane.b32.xlu1 %v7798_v33, %s6304_s19  ;;  %3229 = vrot.lane.b32.xlu0 %v7795_v19, %s6303_s24  ;;  %v2613_v30 = vpop.permute.xlu0 %2612 }
 0x3e4   : > { %v7837_v0 = vpop.permute.xlu1 %4218 }
 0x3e5   : > { %9839 = vst [vmem:[#allocation78_spill] sm:$0xff] %v7837_v0  ;;  %v7851_v0 = vsel %vm638_vm2, %v2613_v30, %v7483_v3 }
 0x3e6   : > { %4236 = vrot.lane.b32.xlu1 %v7775_v16, %s6305_s15  ;;  %3325 = vrot.lane.b32.xlu0 %v7811_v24, %s6303_s24  ;;  %v2716_v54 = vpop.permute.xlu0 %2715  ;;  %9840 = vst [vmem:[#allocation79_spill] sm:$0xff] %v7851_v0 }
 0x3e7   : > { %v7891_v62 = vsel %vm596_vm5, %v2716_v54, %v7588_v5  ;;  %v7922_v7 = vsel %vm596_vm5, %v2714_v13, %v2716_v54 }
 0x3e8   : > { %v2496_v22 = vpop.permute.xlu1 %2495  ;;  %9848 = vst [vmem:[#allocation87_spill] sm:$0xff] %v7891_v62  ;;  %9853 = vst [vmem:[#allocation92_spill] sm:$0xff] %v7922_v7 }
 0x3e9   : > { %v7866_v10 = vsel %vm655_vm3, %v2494_v47, %v2496_v22 }
 0x3ea   : > { %4234 = vrot.lane.b32.xlu1 %v7798_v33, %s6305_s15  ;;  %3897 = vrot.lane.b32.xlu0 %v7775_v16, %s6304_s19  ;;  %v7847_v23 = vpop.permute.xlu0 %2949  ;;  %9844 = vst [vmem:[#allocation83_spill] sm:$0xff] %v7866_v10 }
 0x3ec   : > { %v2393_v38 = vpop.permute.xlu1 %2392 }
 0x3ed   : > { %v7881_v11 = vsel %vm613_vm0, %v2391_v1, %v2393_v38 }
 0x3ee   : > { %3849 = vrot.lane.b32.xlu0 %v7784_v40, %s6304_s19  ;;  %2969 = vrot.lane.b32.xlu1 %v7851_v0, %s6302_s16  ;;  %v7857_v49 = vpop.permute.xlu0 %3287  ;;  %9847 = vst [vmem:[#allocation86_spill] sm:$0xff] %v7881_v11 }
 0x3ef   : > { %9841 = vst [vmem:[#allocation80_spill] sm:$0xff] %v7857_v49 }
 0x3f0   : > { %v7859_v6 = vpop.permute.xlu1 %3883 }
 0x3f1   : > { %9842 = vst [vmem:[#allocation81_spill] sm:$0xff] %v7859_v6  ;;  %v7878_v6 = vsel %vm613_vm0, %v7562_v9, %v2391_v1 }
 0x3f2   : > { %2919 = vrot.lane.b32.xlu0 %v7863_v61, %s6302_s16  ;;  %2921 = vrot.lane.b32.xlu1 %v7866_v10, %s6302_s16  ;;  %v7872_v3 = vpop.permute.xlu0 %2616  ;;  %9846 = vst [vmem:[#allocation85_spill] sm:$0xff] %v7878_v6 }
 0x3f4   : > { %v7874_v28 = vpop.permute.xlu1 %4222 }
 0x3f5   : > { %9845 = vst [vmem:[#allocation84_spill] sm:$0xff] %v7874_v28 }
 0x3f6   : > { %2895 = vrot.lane.b32.xlu0 %v7878_v6, %s6302_s16  ;;  %2897 = vrot.lane.b32.xlu1 %v7881_v11, %s6302_s16  ;;  %v7887_v22 = vpop.permute.xlu0 %2719 }
 0x3f8   : > { %v2500_v47 = vpop.permute.xlu1 %2499 }
 0x3fa   : > { %3257 = vrot.lane.b32.xlu0 %v7863_v61, %s6303_s24  ;;  %2993 = vrot.lane.b32.xlu1 %v7891_v62, %s6302_s16  ;;  %v7897_v9 = vpop.permute.xlu0 %3885 }
 0x3fb   : > { %9849 = vst [vmem:[#allocation88_spill] sm:$0xff] %v7897_v9  ;;  %v7913_v9 = vsel %vm638_vm2, %v7792_v12, %v2613_v30 }
 0x3fc   : > { %v2397_v38 = vpop.permute.xlu1 %2396  ;;  %9851 = vst [vmem:[#allocation90_spill] sm:$0xff] %v7913_v9 }
 0x3fe   : > { %3233 = vrot.lane.b32.xlu0 %v7878_v6, %s6303_s24  ;;  %3307 = vrot.lane.b32.xlu1 %v7851_v0, %s6303_s24  ;;  %v2502_v28 = vpop.permute.xlu0 %2501 }
 0x3ff   : > { %v7991_v17 = vsel %vm655_vm3, %v2500_v47, %v2502_v28 }
 0x400   : > { %v7903_v1 = vpop.permute.xlu1 %2951  ;;  %9864 = vst [vmem:[#allocation97_spill] sm:$0xff] %v7991_v17 }
 0x402   : > { %3853 = vrot.lane.b32.xlu0 %v7863_v61, %s6304_s19  ;;  %3259 = vrot.lane.b32.xlu1 %v7866_v10, %s6303_s24  ;;  %v2399_v53 = vpop.permute.xlu0 %2398 }
 0x403   : > { %v8000_v44 = vsel %vm613_vm0, %v2397_v38, %v2399_v53 }
 0x404   : > { %v7909_v5 = vpop.permute.xlu1 %3289  ;;  %9865 = vst [vmem:[#allocation98_spill] sm:$0xff] %v8000_v44 }
 0x405   : > { %9850 = vst [vmem:[#allocation89_spill] sm:$0xff] %v7909_v5 }
 0x406   : > { %2967 = vrot.lane.b32.xlu0 %v7913_v9, %s6302_s16  ;;  %3235 = vrot.lane.b32.xlu1 %v7881_v11, %s6303_s24  ;;  %v7928_v30 = vpop.permute.xlu0 %3889 }
 0x407   : > { %9854 = vst [vmem:[#allocation93_spill] sm:$0xff] %v7928_v30 }
 0x408   : > { %v7919_v58 = vpop.permute.xlu1 %4224 }
 0x409   : > { %9852 = vst [vmem:[#allocation91_spill] sm:$0xff] %v7919_v58 }
 0x40a   : > { %3331 = vrot.lane.b32.xlu1 %v7891_v62, %s6303_s24  ;;  %2991 = vrot.lane.b32.xlu0 %v7922_v7, %s6302_s16  ;;  %v7938_v54 = vpop.permute.xlu0 %4228 }
 0x40b   : > { %9855 = vst [vmem:[#allocation94_spill] sm:$0xff] %v7938_v54  ;;  %v9856_v54 = vld [vmem:[#allocation31_spill] sm:$0xff] }
 0x40c   : > { %v2619_v12 = vpop.permute.xlu1 %2618  ;;  %v7958_v52 = vsel %vm655_vm3, %v9856_v54, %v2500_v47 }
 0x40d   : > { %9857 = vst [vmem:[#allocation31_spill] sm:$0xff] %v7958_v52 }
 0x40e   : > { %3903 = vrot.lane.b32.xlu1 %v7851_v0, %s6304_s19  ;;  %3305 = vrot.lane.b32.xlu0 %v7913_v9, %s6303_s24  ;;  %v7948_v30 = vpop.permute.xlu0 %2505 }
 0x40f   : > { %v8059_v35 = vsel %vm655_vm3, %v7506_v48, %v7948_v30 }
 0x410   : > { %v2722_v41 = vpop.permute.xlu1 %2721  ;;  %9872 = vst [vmem:[#allocation103_spill] sm:$0xff] %v8059_v35 }
 0x411   : > { %v8012_v47 = vsel %vm596_vm5, %v7887_v22, %v2722_v41 }
 0x412   : > { %4242 = vrot.lane.b32.xlu1 %v7851_v0, %s6305_s15  ;;  %3329 = vrot.lane.b32.xlu0 %v7922_v7, %s6303_s24  ;;  %v7964_v20 = vpop.permute.xlu0 %2402  ;;  %9867 = vst [vmem:[#allocation100_spill] sm:$0xff] %v8012_v47 }
 0x414   : > { %v7940_v13 = vpop.permute.xlu1 %2955 }
 0x416   : > { %3855 = vrot.lane.b32.xlu1 %v7866_v10, %s6304_s19  ;;  %3901 = vrot.lane.b32.xlu0 %v7913_v9, %s6304_s19  ;;  %v7982_v0 = vpop.permute.xlu0 %2957 }
 0x418   : > { %v7946_v58 = vpop.permute.xlu1 %3293 }
 0x41a   : > { %4194 = vrot.lane.b32.xlu1 %v7866_v10, %s6305_s15  ;;  %4240 = vrot.lane.b32.xlu0 %v7913_v9, %s6305_s15  ;;  %v9858_v10 = vld [vmem:[#allocation33_spill] sm:$0xff] }
 0x41b   : > { %v7970_v16 = vsel %vm613_vm0, %v9858_v10, %v2397_v38  ;;  %v9861_v9 = vld [vmem:[#allocation29_spill] sm:$0xff] }
 0x41c   : > { %v7954_v39 = vpop.permute.xlu1 %2622  ;;  %9859 = vst [vmem:[#allocation33_spill] sm:$0xff] %v7970_v16  ;;  %v7980_v43 = vsel %vm638_vm2, %v2619_v12, %v9861_v9  ;;  %v7997_v9 = vpop.permute.xlu0 %3295 }
 0x41d   : > { %9862 = vst [vmem:[#allocation29_spill] sm:$0xff] %v7980_v43 }
 0x41e   : > { %3859 = vrot.lane.b32.xlu1 %v7958_v52, %s6304_s19  ;;  %2925 = vrot.lane.b32.xlu0 %v7958_v52, %s6302_s16 }
 0x420   : > { %v7966_v33 = vpop.permute.xlu1 %2725  ;;  %v2625_v53 = vpop.permute.xlu0 %2624 }
 0x421   : > { %v8079_v49 = vsel %vm638_vm2, %v2625_v53, %v7456_v32 }
 0x422   : > { %4198 = vrot.lane.b32.xlu1 %v7958_v52, %s6305_s15  ;;  %2901 = vrot.lane.b32.xlu0 %v7970_v16, %s6302_s16  ;;  %9875 = vst [vmem:[#allocation106_spill] sm:$0xff] %v8079_v49 }
 0x424   : > { %v7976_v54 = vpop.permute.xlu1 %3891  ;;  %v8028_v22 = vpop.permute.xlu0 %2727 }
 0x425   : > { %9860 = vst [vmem:[#allocation95_spill] sm:$0xff] %v7976_v54 }
 0x426   : > { %2975 = vrot.lane.b32.xlu1 %v7980_v43, %s6302_s16  ;;  %3263 = vrot.lane.b32.xlu0 %v7958_v52, %s6303_s24  ;;  %v8004_v52 = vsel %vm638_vm2, %v7872_v3, %v2619_v12 }
 0x427   : > { %9866 = vst [vmem:[#allocation99_spill] sm:$0xff] %v8004_v52 }
 0x428   : > { %v7988_v10 = vpop.permute.xlu1 %4230 }
 0x429   : > { %9863 = vst [vmem:[#allocation96_spill] sm:$0xff] %v7988_v10  ;;  %v9868_v10 = vld [vmem:[#allocation35_spill] sm:$0xff] }
 0x42a   : > { %3239 = vrot.lane.b32.xlu0 %v7970_v16, %s6303_s24  ;;  %2927 = vrot.lane.b32.xlu1 %v7991_v17, %s6302_s16  ;;  %v8016_v2 = vsel %vm596_vm5, %v2722_v41, %v9868_v10 }
 0x42b   : > { %9869 = vst [vmem:[#allocation35_spill] sm:$0xff] %v8016_v2 }
 0x42c   : > { %v2508_v54 = vpop.permute.xlu1 %2507 }
 0x42e   : > { %2973 = vrot.lane.b32.xlu0 %v8004_v52, %s6302_s16  ;;  %2903 = vrot.lane.b32.xlu1 %v8000_v44, %s6302_s16 }
 0x430   : > { %v2405_v28 = vpop.permute.xlu1 %2404 }
 0x432   : > { %2997 = vrot.lane.b32.xlu0 %v8012_v47, %s6302_s16  ;;  %2999 = vrot.lane.b32.xlu1 %v8016_v2, %s6302_s16 }
 0x434   : > { %v8022_v3 = vpop.permute.xlu1 %2913 }
 0x436   : > { %3311 = vrot.lane.b32.xlu0 %v8004_v52, %s6303_s24  ;;  %3313 = vrot.lane.b32.xlu1 %v7980_v43, %s6303_s24 }
 0x438   : > { %v8030_v38 = vpop.permute.xlu1 %2889 }
 0x43a   : > { %3335 = vrot.lane.b32.xlu0 %v8012_v47, %s6303_s24  ;;  %3265 = vrot.lane.b32.xlu1 %v7991_v17, %s6303_s24 }
 0x43c   : > { %v8036_v41 = vpop.permute.xlu1 %3251  ;;  %v8038_v12 = vpop.permute.xlu0 %2963 }
 0x43d   : > { %9870 = vst [vmem:[#allocation101_spill] sm:$0xff] %v8036_v41 }
 0x43e   : > { %3909 = vrot.lane.b32.xlu0 %v7980_v43, %s6304_s19  ;;  %3241 = vrot.lane.b32.xlu1 %v8000_v44, %s6303_s24 }
 0x440   : > { %v8044_v10 = vpop.permute.xlu1 %3227  ;;  %v8046_v34 = vpop.permute.xlu0 %2915 }
 0x441   : > { %9871 = vst [vmem:[#allocation102_spill] sm:$0xff] %v8044_v10 }
 0x442   : > { %3861 = vrot.lane.b32.xlu0 %v7991_v17, %s6304_s19  ;;  %3337 = vrot.lane.b32.xlu1 %v8016_v2, %s6303_s24 }
 0x444   : > { %v8052_v56 = vpop.permute.xlu1 %2961  ;;  %v8054_v41 = vpop.permute.xlu0 %2891 }
 0x446   : > { %3907 = vrot.lane.b32.xlu1 %v8004_v52, %s6304_s19  ;;  %3865 = vrot.lane.b32.xlu0 %v8059_v35, %s6304_s19 }
 0x448   : > { %v8065_v10 = vpop.permute.xlu1 %2985  ;;  %v8067_v26 = vpop.permute.xlu0 %2987 }
 0x449   : > { %9873 = vst [vmem:[#allocation104_spill] sm:$0xff] %v8065_v10  ;;  %9874 = vst [vmem:[#allocation105_spill] sm:$0xff] %v8067_v26 }
 0x44a   : > { %4248 = vrot.lane.b32.xlu1 %v7980_v43, %s6305_s15  ;;  %4204 = vrot.lane.b32.xlu0 %v8059_v35, %s6305_s15 }
 0x44c   : > { %v8073_v46 = vpop.permute.xlu1 %3299  ;;  %v8075_v48 = vpop.permute.xlu0 %3301 }
 0x44e   : > { %4246 = vrot.lane.b32.xlu1 %v8004_v52, %s6305_s15  ;;  %2981 = vrot.lane.b32.xlu0 %v8079_v49, %s6302_s16  ;;  %v9880_v52 = vmov 0.0  }
 0x450   : > { %v8085_v10 = vpop.permute.xlu1 %3323  ;;  %v8087_v43 = vpop.permute.xlu0 %3253 }
 0x451   : > { %9876 = vst [vmem:[#allocation107_spill] sm:$0xff] %v8085_v10  ;;  %9877 = vst [vmem:[#allocation108_spill] sm:$0xff] %v8087_v43 }
 0x452   : > { %4200 = vrot.lane.b32.xlu1 %v7991_v17, %s6305_s15  ;;  %4192 = vrot.lane.b32.xlu0 %v7863_v61, %s6305_s15  ;;  %v8108_v17 = vsel %vm613_vm0, %v7551_v55, %v7964_v20 }
 0x453   : > { %9883 = vst [vmem:[#allocation113_spill] sm:$0xff] %v8108_v17 }
 0x454   : > { %v8093_v26 = vpop.permute.xlu1 %3895  ;;  %v8095_v32 = vpop.permute.xlu0 %3229 }
 0x455   : > { %9878 = vst [vmem:[#allocation109_spill] sm:$0xff] %v8093_v26  ;;  %9879 = vst [vmem:[#allocation110_spill] sm:$0xff] %v8095_v32 }
 0x456   : > { %2931 = vrot.lane.b32.xlu1 %v8059_v35, %s6302_s16  ;;  %6007 = vrot.lane.b32.xlu0 %v9880_v52, %s6304_s19 }
 0x458   : > { %v8101_v5 = vpop.permute.xlu1 %4236  ;;  %v8103_v10 = vpop.permute.xlu0 %3325 }
 0x459   : > { %9881 = vst [vmem:[#allocation111_spill] sm:$0xff] %v8101_v5  ;;  %9882 = vst [vmem:[#allocation112_spill] sm:$0xff] %v8103_v10  ;;  %v8120_v5 = vsel %vm655_vm3, %v7948_v30, %v2508_v54  ;;  %v8140_v54 = vsel %vm638_vm2, %v7954_v39, %v2625_v53 }
 0x45a   : > { %2907 = vrot.lane.b32.xlu1 %v8108_v17, %s6302_s16  ;;  %3841 = vrot.lane.b32.xlu0 %v8108_v17, %s6304_s19  ;;  %9886 = vst [vmem:[#allocation116_spill] sm:$0xff] %v8120_v5  ;;  %9888 = vst [vmem:[#allocation118_spill] sm:$0xff] %v8140_v54 }
 0x45c   : > { %v8114_v26 = vpop.permute.xlu1 %4234  ;;  %v8116_v61 = vpop.permute.xlu0 %3897 }
 0x45d   : > { %9884 = vst [vmem:[#allocation114_spill] sm:$0xff] %v8114_v26  ;;  %9885 = vst [vmem:[#allocation115_spill] sm:$0xff] %v8116_v61  ;;  %v8144_v61 = vsel %vm613_vm0, %v7964_v20, %v2405_v28  ;;  %v8165_v28 = vsel %vm596_vm5, %v8028_v22, %v7575_v36 }
 0x45e   : > { %3269 = vrot.lane.b32.xlu1 %v8059_v35, %s6303_s24  ;;  %2933 = vrot.lane.b32.xlu0 %v8120_v5, %s6302_s16  ;;  %9889 = vst [vmem:[#allocation119_spill] sm:$0xff] %v8144_v61  ;;  %9892 = vst [vmem:[#allocation122_spill] sm:$0xff] %v8165_v28 }
 0x460   : > { %v8126_v55 = vpop.permute.xlu1 %2969  ;;  %v8128_v10 = vpop.permute.xlu0 %3849 }
 0x461   : > { %9887 = vst [vmem:[#allocation117_spill] sm:$0xff] %v8128_v10 }
 0x462   : > { %3245 = vrot.lane.b32.xlu1 %v8108_v17, %s6303_s24  ;;  %3837 = vrot.lane.b32.xlu0 %v8000_v44, %s6304_s19 }
 0x464   : > { %v8134_v26 = vpop.permute.xlu1 %2921  ;;  %v8136_v30 = vpop.permute.xlu0 %2919 }
 0x466   : > { %2909 = vrot.lane.b32.xlu0 %v8144_v61, %s6302_s16  ;;  %2979 = vrot.lane.b32.xlu1 %v8140_v54, %s6302_s16 }
 0x468   : > { %v8150_v10 = vpop.permute.xlu1 %2897  ;;  %v8152_v35 = vpop.permute.xlu0 %2895 }
 0x46a   : > { %6012 = vrot.lane.b32.xlu0 %v9880_v52, %s6305_s15  ;;  %3847 = vrot.lane.b32.xlu1 %v7761_v59, %s6304_s19 }
 0x46c   : > { %v8158_v39 = vpop.permute.xlu1 %2993  ;;  %v8160_v20 = vpop.permute.xlu0 %3257 }
 0x46d   : > { %9890 = vst [vmem:[#allocation120_spill] sm:$0xff] %v8158_v39  ;;  %9891 = vst [vmem:[#allocation121_spill] sm:$0xff] %v8160_v20 }
 0x46e   : > { %4188 = vrot.lane.b32.xlu1 %v7784_v40, %s6305_s15  ;;  %3005 = vrot.lane.b32.xlu0 %v8165_v28, %s6302_s16 }
 0x470   : > { %v8171_v53 = vpop.permute.xlu1 %3307  ;;  %v8173_v32 = vpop.permute.xlu0 %3233 }
 0x471   : > { %9893 = vst [vmem:[#allocation123_spill] sm:$0xff] %v8173_v32 }
 0x472   : > { %4186 = vrot.lane.b32.xlu1 %v7761_v59, %s6305_s15  ;;  %3319 = vrot.lane.b32.xlu0 %v8079_v49, %s6303_s24  ;;  %v8194_v59 = vsel %vm596_vm5, %v7966_v33, %v8028_v22  ;;  %v2760_v22 = vld [vmem:[#allocation13 + $0x8] sm:$0xff] }
 0x473   : > { %9897 = vst [vmem:[#allocation127_spill] sm:$0xff] %v8194_v59  ;;  %5620 = vmatprep.mubr.msk.f32.mxu1 %vm1084_vm8, %v2760_v22 }
 0x474   : > { %v8179_v43 = vpop.permute.xlu1 %3259  ;;  %v8181_v36 = vpop.permute.xlu0 %3853 }
 0x475   : > { %9894 = vst [vmem:[#allocation124_spill] sm:$0xff] %v8179_v43  ;;  %9895 = vst [vmem:[#allocation125_spill] sm:$0xff] %v8181_v36 }
 0x476   : > { %3835 = vrot.lane.b32.xlu1 %v7970_v16, %s6304_s19  ;;  %4180 = vrot.lane.b32.xlu0 %v8108_v17, %s6305_s15 }
 0x478   : > { %v8187_v40 = vpop.permute.xlu1 %3235  ;;  %v8189_v20 = vpop.permute.xlu0 %2967 }
 0x479   : > { %9896 = vst [vmem:[#allocation126_spill] sm:$0xff] %v8187_v40 }
 0x47a   : > { %6017 = vrot.lane.b32.xlu0 %v9880_v52, %s6304_s19  ;;  %3003 = vrot.lane.b32.xlu1 %v8194_v59, %s6302_s16 }
 0x47c   : > { %v8200_v36 = vpop.permute.xlu1 %3331  ;;  %v8202_v32 = vpop.permute.xlu0 %2991 }
 0x47d   : > { %9898 = vst [vmem:[#allocation128_spill] sm:$0xff] %v8200_v36  ;;  %9899 = vst [vmem:[#allocation129_spill] sm:$0xff] %v8202_v32 }
 0x47e   : > { %3829 = vrot.lane.b32.xlu0 %v7878_v6, %s6304_s19  ;;  %3317 = vrot.lane.b32.xlu1 %v8140_v54, %s6303_s24 }
 0x480   : > { %v8208_v17 = vpop.permute.xlu1 %3903  ;;  %v8210_v33 = vpop.permute.xlu0 %3305 }
 0x481   : > { %9900 = vst [vmem:[#allocation130_spill] sm:$0xff] %v8208_v17 }
 0x482   : > { %3271 = vrot.lane.b32.xlu0 %v8120_v5, %s6303_s24  ;;  %3831 = vrot.lane.b32.xlu1 %v7881_v11, %s6304_s19 }
 0x484   : > { %v8217_v36 = vpop.permute.xlu1 %4242  ;;  %v8219_v40 = vpop.permute.xlu0 %3329 }
 0x485   : > { %9901 = vst [vmem:[#allocation131_spill] sm:$0xff] %v8217_v36  ;;  %9902 = vst [vmem:[#allocation132_spill] sm:$0xff] %v8219_v40 }
 0x486   : > { %3825 = vrot.lane.b32.xlu0 %v7795_v19, %s6304_s19  ;;  %4176 = vrot.lane.b32.xlu1 %v8000_v44, %s6305_s15 }
 0x488   : > { %v8225_v17 = vpop.permute.xlu1 %3855  ;;  %v8227_v43 = vpop.permute.xlu0 %3901 }
 0x489   : > { %9903 = vst [vmem:[#allocation133_spill] sm:$0xff] %v8225_v17  ;;  %9904 = vst [vmem:[#allocation134_spill] sm:$0xff] %v8227_v43 }
 0x48a   : > { %3247 = vrot.lane.b32.xlu0 %v8144_v61, %s6303_s24  ;;  %4174 = vrot.lane.b32.xlu1 %v7970_v16, %s6305_s15 }
 0x48c   : > { %v8233_v22 = vpop.permute.xlu1 %4194  ;;  %v8235_v36 = vpop.permute.xlu0 %4240 }
 0x48d   : > { %9905 = vst [vmem:[#allocation135_spill] sm:$0xff] %v8233_v22  ;;  %9906 = vst [vmem:[#allocation136_spill] sm:$0xff] %v8235_v36 }
 0x48e   : > { %4170 = vrot.lane.b32.xlu1 %v7881_v11, %s6305_s15  ;;  %6022 = vrot.lane.b32.xlu0 %v9880_v52, %s6305_s15  ;;  %v3218_v11 = vld [vmem:[#allocation13 + $0x48] sm:$0xff] }
 0x48f   : > { %5624 = vmatprep.mubr.msk.f32.mxu0 %vm1084_vm8, %v3218_v11 }
 0x490   : > { %v8241_v44 = vpop.permute.xlu1 %3859  ;;  %v8243_v17 = vpop.permute.xlu0 %2925 }
 0x491   : > { %9907 = vst [vmem:[#allocation137_spill] sm:$0xff] %v8241_v44 }
 0x492   : > { %3823 = vrot.lane.b32.xlu1 %v7769_v8, %s6304_s19  ;;  %3343 = vrot.lane.b32.xlu0 %v8165_v28, %s6303_s24 }
 0x494   : > { %v8249_v43 = vpop.permute.xlu1 %4198  ;;  %v8251_v22 = vpop.permute.xlu0 %2901 }
 0x495   : > { %9908 = vst [vmem:[#allocation138_spill] sm:$0xff] %v8249_v43 }
 0x496   : > { %3341 = vrot.lane.b32.xlu1 %v8194_v59, %s6303_s24  ;;  %4168 = vrot.lane.b32.xlu0 %v7878_v6, %s6305_s15 }
 0x498   : > { %v8257_v36 = vpop.permute.xlu1 %2975  ;;  %v8259_v44 = vpop.permute.xlu0 %3263 }
 0x499   : > { %9909 = vst [vmem:[#allocation139_spill] sm:$0xff] %v8259_v44 }
 0x49a   : > { %3915 = vrot.lane.b32.xlu1 %v8079_v49, %s6304_s19  ;;  %4252 = vrot.lane.b32.xlu0 %v8140_v54, %s6305_s15 }
 0x49c   : > { %v8266_v43 = vpop.permute.xlu1 %2927  ;;  %v8268_v16 = vpop.permute.xlu0 %3239 }
 0x49d   : > { %9910 = vst [vmem:[#allocation140_spill] sm:$0xff] %v8268_v16 }
 0x49e   : > { %3913 = vrot.lane.b32.xlu1 %v8140_v54, %s6304_s19  ;;  %6027 = vrot.lane.b32.xlu0 %v9880_v52, %s6304_s19 }
 0x4a0   : > { %v8274_v6 = vpop.permute.xlu1 %2903  ;;  %v8276_v40 = vpop.permute.xlu0 %2973 }
 0x4a2   : > { %4254 = vrot.lane.b32.xlu1 %v8079_v49, %s6305_s15  ;;  %3937 = vrot.lane.b32.xlu0 %v8194_v59, %s6304_s19 }
 0x4a4   : > { %v8282_v11 = vpop.permute.xlu1 %2999  ;;  %v8284_v44 = vpop.permute.xlu0 %2997 }
 0x4a5   : > { %9911 = vst [vmem:[#allocation141_spill] sm:$0xff] %v8284_v44 }
 0x4a6   : > { %3867 = vrot.lane.b32.xlu1 %v8120_v5, %s6304_s19  ;;  %3933 = vrot.lane.b32.xlu0 %v8016_v2, %s6304_s19 }
 0x4a8   : > { %v8290_v16 = vpop.permute.xlu1 %3313  ;;  %v8292_v54 = vpop.permute.xlu0 %3311 }
 0x4aa   : > { %4206 = vrot.lane.b32.xlu1 %v8120_v5, %s6305_s15  ;;  %6032 = vrot.lane.b32.xlu0 %v9880_v52, %s6305_s15 }
 0x4ac   : > { %v8298_v49 = vpop.permute.xlu1 %3265  ;;  %v8300_v32 = vpop.permute.xlu0 %3335 }
 0x4ad   : > { %9912 = vst [vmem:[#allocation142_spill] sm:$0xff] %v8298_v49  ;;  %9913 = vst [vmem:[#allocation143_spill] sm:$0xff] %v8300_v32 }
 0x4ae   : > { %3843 = vrot.lane.b32.xlu1 %v8144_v61, %s6304_s19  ;;  %4276 = vrot.lane.b32.xlu0 %v8194_v59, %s6305_s15 }
 0x4b0   : > { %v8306_v39 = vpop.permute.xlu1 %3241  ;;  %v8308_v44 = vpop.permute.xlu0 %3909 }
 0x4b1   : > { %9914 = vst [vmem:[#allocation144_spill] sm:$0xff] %v8306_v39  ;;  %9915 = vst [vmem:[#allocation145_spill] sm:$0xff] %v8308_v44  ;;  %v5850_v39 = vunpack.i.h.bf16 %v7597_v14 }
 0x4b2   : > { %4182 = vrot.lane.b32.xlu1 %v8144_v61, %s6305_s15  ;;  %6037 = vrot.lane.b32.xlu0 %v9880_v52, %s6304_s19 }
 0x4b4   : > { %v8314_v5 = vpop.permute.xlu1 %3337  ;;  %v8316_v49 = vpop.permute.xlu0 %3861 }
 0x4b5   : > { %9916 = vst [vmem:[#allocation146_spill] sm:$0xff] %v8314_v5  ;;  %9917 = vst [vmem:[#allocation147_spill] sm:$0xff] %v8316_v49 }
 0x4b6   : > { %3939 = vrot.lane.b32.xlu1 %v8165_v28, %s6304_s19  ;;  %3925 = vrot.lane.b32.xlu0 %v7922_v7, %s6304_s19 }
 0x4b8   : > { %v8322_v59 = vpop.permute.xlu1 %3907  ;;  %v8324_v32 = vpop.permute.xlu0 %3865 }
 0x4b9   : > { %9918 = vst [vmem:[#allocation148_spill] sm:$0xff] %v8322_v59  ;;  %9919 = vst [vmem:[#allocation149_spill] sm:$0xff] %v8324_v32 }
 0x4ba   : > { %4164 = vrot.lane.b32.xlu1 %v7795_v19, %s6305_s15  ;;  %3921 = vrot.lane.b32.xlu0 %v7811_v24, %s6304_s19 }
 0x4bc   : > { %v8330_v44 = vpop.permute.xlu1 %4248  ;;  %v8332_v61 = vpop.permute.xlu0 %4204 }
 0x4bd   : > { %9920 = vst [vmem:[#allocation150_spill] sm:$0xff] %v8330_v44  ;;  %9921 = vst [vmem:[#allocation151_spill] sm:$0xff] %v8332_v61 }
 0x4be   : > { %4162 = vrot.lane.b32.xlu1 %v7769_v8, %s6305_s15  ;;  %6042 = vrot.lane.b32.xlu0 %v9880_v52, %s6305_s15  ;;  %v2757_v52 = vld [vmem:[%s9642_s6 + $0x10] sm:$0xff] }
 0x4c0   : > { %v8338_v49 = vpop.permute.xlu1 %4246  ;;  %v2982_v59 = vpop.permute.xlu0 %2981 }
 0x4c1   : > { %9922 = vst [vmem:[#allocation152_spill] sm:$0xff] %v8338_v49 }
 0x4c2   : > { %4278 = vrot.lane.b32.xlu1 %v8165_v28, %s6305_s15  ;;  %4264 = vrot.lane.b32.xlu0 %v7922_v7, %s6305_s15 }
 0x4c4   : > { %v8344_v32 = vpop.permute.xlu1 %4200  ;;  %v8346_v44 = vpop.permute.xlu0 %4192 }
 0x4c5   : > { %9923 = vst [vmem:[#allocation153_spill] sm:$0xff] %v8344_v32  ;;  %9924 = vst [vmem:[#allocation154_spill] sm:$0xff] %v8346_v44  ;;  %v2755_v44 = vld [vmem:[%s9642_s6] sm:$0xff] }
 0x4c6   : > { %3931 = vrot.lane.b32.xlu1 %v8012_v47, %s6304_s19  ;;  %4258 = vrot.lane.b32.xlu0 %v7807_v60, %s6305_s15 }
 0x4c8   : > { %v8355_v61 = vpop.permute.xlu1 %2931  ;;  %v8357_v49 = vpop.permute.xlu0 %6007 }
 0x4c9   : > { %9925 = vst [vmem:[#allocation155_spill] sm:$0xff] %v8357_v49 }
 0x4ca   : > { %3927 = vrot.lane.b32.xlu1 %v7891_v62, %s6304_s19  ;;  %4504 = vperm.xlu0 %5844, %v2757_v52  }
 0x4cc   : > { %v8364_v32 = vpop.permute.xlu1 %2907  ;;  %v8366_v7 = vpop.permute.xlu0 %3841 }
 0x4cd   : > { %9926 = vst [vmem:[#allocation156_spill] sm:$0xff] %v8366_v7  ;;  %v5849_v7 = vunpack.i.l.bf16 %v7597_v14  ;;  %v3034_v14 = vsel %vm1084_vm8, %v8189_v20, %v8126_v55 }
 0x4ce   : > { %4272 = vrot.lane.b32.xlu1 %v8016_v2, %s6305_s15  ;;  %4494 = vperm.xlu0 %5844, %v2755_v44  }
 0x4d0   : > { %v8370_v28 = vpop.permute.xlu1 %3269  ;;  %v8372_v8 = vpop.permute.xlu0 %2933 }
 0x4d1   : > { %9927 = vst [vmem:[#allocation157_spill] sm:$0xff] %v8370_v28 }
 0x4d2   : > { %4270 = vrot.lane.b32.xlu1 %v8012_v47, %s6305_s15 }
 0x4d4   : > { %v8376_v52 = vpop.permute.xlu1 %3245  ;;  %v8378_v49 = vpop.permute.xlu0 %3837 }
 0x4d5   : > { %9928 = vst [vmem:[#allocation158_spill] sm:$0xff] %v8376_v52  ;;  %9929 = vst [vmem:[#allocation159_spill] sm:$0xff] %v8378_v49  ;;  %v3036_v49 = vsel %vm1084_vm8, %v8276_v40, %v8257_v36  ;;  %v3028_v36 = vsel %vm1084_vm8, %v7847_v23, %v7903_v1  ;;  %v5865_v1 = vunpack.i.h.bf16 %v7406_v42 }
 0x4d6   : > { %4266 = vrot.lane.b32.xlu1 %v7891_v62, %s6305_s15  ;;  %v9930_v62 = vld [vmem:[#allocation37_spill] sm:$0xff] }
 0x4d7   : > { %v5854_v47 = vunpack.i.l.bf16 %v9930_v62 }
 0x4d8   : > { %v2980_v19 = vpop.permute.xlu1 %2979  ;;  %v8383_v5 = vpop.permute.xlu0 %2909 }
 0x4d9   : > { %v3038_v44 = vsel %vm1084_vm8, %v2980_v19, %v2982_v59  ;;  %v3037_v2 = vsel %vm1084_vm8, %v5849_v7, %v2980_v19  ;;  %v3035_v7 = vsel %vm1084_vm8, %v5850_v39, %v8276_v40  ;;  %v5855_v19 = vunpack.i.h.bf16 %v9930_v62 }
 0x4da   : > { %3919 = vrot.lane.b32.xlu1 %v7807_v60, %s6304_s19  ;;  %3099 = vmatprep.subr.mxu1 %v3038_v44  ;;  %v3033_v59 = vsel %vm1084_vm8, %v5854_v47, %v8189_v20  ;;  %v5859_v40 = vunpack.i.l.bf16 %v7612_v45  ;;  %v3030_v47 = vsel %vm1084_vm8, %v7940_v13, %v7982_v0  ;;  %v5864_v44 = vunpack.i.l.bf16 %v7406_v42 }
 0x4db   : > { %3100 = vmatpush1.msra.mxu1 %v3037_v2  ;;  %v2758_v2 = vld [vmem:[%s9642_s6 + $0x18] sm:$0xff]  ;;  %v3031_v39 = vsel %vm1084_vm8, %v5855_v19, %v8052_v56  ;;  %v3024_v19 = vsel %vm1084_vm8, %v7728_v63, %v7745_v57  ;;  %v3023_v42 = vsel %vm1084_vm8, %v5865_v1, %v7728_v63  ;;  %v5870_v57 = vunpack.i.h.bf16 %v7623_v37  ;;  %v4572_v63 = vld [vmem:[%s9647_s11] sm:$0x3] }
 0x4dc   : > { %v8394_v52 = vpop.permute.xlu1 %3847  ;;  %3101 = vmatprep.subr.mxu1 %v3036_v49  ;;  %v8396_v28 = vpop.permute.xlu0 %6012  ;;  %v3032_v49 = vsel %vm1084_vm8, %v8052_v56, %v8038_v12  ;;  %v5860_v12 = vunpack.i.h.bf16 %v7612_v45  ;;  %v3029_v20 = vsel %vm1084_vm8, %v5859_v40, %v7940_v13  ;;  %v2756_v56 = vld [vmem:[%s9642_s6 + $0x8] sm:$0xff]  ;;  %v3026_v13 = vsel %vm1084_vm8, %v7781_v15, %v7819_v50  ;;  %v5640_v50 = vld [vmem:[%s9647_s11 + $0x4] sm:$0x3] }
 0x4dd   : > { %3102 = vmatpush1.msra.mxu1 %v3035_v7  ;;  %v4700_v40 = vrot.slane %v5640_v50, %v6498_v4  ;;  %v5879_v1 = vunpack.i.l.bf16 %v7636_v31 }
 0x4de   : > { %4260 = vrot.lane.b32.xlu1 %v7811_v24, %s6305_s15  ;;  %3103 = vmatprep.subr.mxu1 %v3034_v14  ;;  %v3027_v45 = vsel %vm1084_vm8, %v5860_v12, %v7847_v23  ;;  %v3025_v14 = vsel %vm1084_vm8, %v5864_v44, %v7781_v15  ;;  %v3022_v15 = vsel %vm1084_vm8, %v8355_v61, %v8372_v8  ;;  %v5874_v12 = vunpack.i.l.bf16 %v7421_v51 }
 0x4df   : > { %3104 = vmatpush1.msra.mxu1 %v3033_v59  ;;  %v5869_v59 = vunpack.i.l.bf16 %v7623_v37  ;;  %v3020_v8 = vsel %vm1084_vm8, %v8243_v17, %v8266_v43  ;;  %4703 = vrot.lane.b32.xlu0 %v4700_v40, %s6297_s17  ;;  %v5875_v44 = vunpack.i.h.bf16 %v7421_v51  ;;  %v5905_v40 = vunpack.i.h.bf16 %v7491_v21 }
 0x4e0   : > { %v8415_v55 = vpop.permute.xlu1 %4188  ;;  %v8417_v62 = vpop.permute.xlu0 %3005  ;;  %3105 = vmatprep.subr.mxu1 %v3032_v49 }
 0x4e1   : > { %3106 = vmatpush1.msra.mxu1 %v3031_v39  ;;  %v9931_v39 = vld [vmem:[#allocation26_spill] sm:$0xff]  ;;  %v3015_v51 = vsel %vm1084_vm8, %v5875_v44, %v8022_v3 }
 0x4e2   : > { %4509 = vperm.xlu1 %5845, %v2758_v2   ;;  %3107 = vmatprep.subr.mxu1 %v3030_v47  ;;  %v3021_v2 = vsel %vm1084_vm8, %v5869_v59, %v8355_v61  ;;  %v4696_v47 = vrot.slane %v5640_v50, %v9931_v39  ;;  %v3019_v61 = vsel %vm1084_vm8, %v5870_v57, %v8243_v17  ;;  %v5899_v17 = vunpack.i.l.bf16 %v7664_v27 }
 0x4e3   : > { %3108 = vmatpush1.msra.mxu1 %v3029_v20  ;;  %v4577_v43 = vrot.slane %v4572_v63, %v9931_v39  ;;  %v5880_v59 = vunpack.i.h.bf16 %v7636_v31  ;;  %v5904_v31 = vunpack.i.l.bf16 %v7491_v21  ;;  %v3372_v57 = vsel %vm1290_vm9, %v8210_v33, %v8171_v53 }
 0x4e4   : > { %v8434_v7 = vpop.permute.xlu1 %4186  ;;  %v3320_v0 = vpop.permute.xlu0 %3319  ;;  %3109 = vmatprep.subr.mxu1 %v3028_v36  ;;  %v4581_v36 = vrot.slane %v4572_v63, %v6498_v4  ;;  %v5889_v21 = vunpack.i.l.bf16 %v7652_v29  ;;  %v5909_v53 = vunpack.i.l.bf16 %v7677_v18  ;;  %v3368_v63 = vsel %vm1290_vm9, %v7946_v58, %v7997_v9  ;;  %v9934_v9 = vld [vmem:[#allocation80_spill] sm:$0xff] }
 0x4e5   : > { %3110 = vmatpush1.msra.mxu1 %v3027_v45  ;;  %v3017_v45 = vsel %vm1084_vm8, %v5874_v12, %v8136_v30  ;;  %v5910_v12 = vunpack.i.h.bf16 %v7677_v18 }
 0x4e6   : > { %4499 = vperm.xlu1 %5845, %v2756_v56   ;;  %3111 = vmatprep.subr.mxu1 %v3026_v13  ;;  %v3018_v56 = vsel %vm1084_vm8, %v8136_v30, %v8134_v26  ;;  %v3016_v13 = vsel %vm1084_vm8, %v8022_v3, %v8046_v34  ;;  %v3014_v30 = vsel %vm1084_vm8, %v8364_v32, %v8383_v5 }
 0x4e7   : > { %3112 = vmatpush1.msra.mxu1 %v3025_v14  ;;  %4584 = vrot.lane.b32.xlu0 %v4581_v36, %s6298_s23  ;;  %v3013_v3 = vsel %vm1084_vm8, %v5879_v1, %v8364_v32  ;;  %v3374_v5 = vsel %vm1290_vm9, %v8292_v54, %v8290_v16  ;;  %v3011_v32 = vsel %vm1084_vm8, %v5880_v59, %v8251_v22  ;;  %v9933_v36 = vld [vmem:[#allocation89_spill] sm:$0xff]  ;;  %v9939_v1 = vld [vmem:[#allocation76_spill] sm:$0xff] }
 0x4e8   : > { %v8448_v23 = vpop.permute.xlu1 %3835  ;;  %v8450_v49 = vpop.permute.xlu0 %4180  ;;  %3113 = vmatprep.subr.mxu1 %v3024_v19 }
 0x4e9   : > { %3114 = vmatpush1.msra.mxu1 %v3023_v42  ;;  %v5900_v42 = vunpack.i.h.bf16 %v7664_v27 }
 0x4ea   : > { %3115 = vmatprep.subr.mxu1 %v3022_v15  ;;  %4701 = vrot.lane.b32.xlu1 %v4696_v47, %s6297_s17  ;;  %v5884_v15 = vunpack.i.l.bf16 %v7438_v25 }
 0x4eb   : > { %3116 = vmatpush1.msra.mxu1 %v3021_v2  ;;  %v3373_v16 = vsel %vm1290_vm9, %v5900_v42, %v8292_v54  ;;  %v5885_v2 = vunpack.i.h.bf16 %v7438_v25  ;;  %v3371_v54 = vsel %vm1290_vm9, %v5904_v31, %v8210_v33  ;;  %v3370_v25 = vsel %vm1290_vm9, %v8073_v46, %v8075_v48  ;;  %v9944_v31 = vld [vmem:[#allocation65_spill] sm:$0xff] }
 0x4ec   : > { %v8472_v37 = vpop.permute.xlu1 %3003  ;;  %v8474_v20 = vpop.permute.xlu0 %6017  ;;  %3117 = vmatprep.subr.mxu1 %v3020_v8  ;;  %v5890_v8 = vunpack.i.h.bf16 %v7652_v29  ;;  %v3366_v29 = vsel %vm1290_vm9, %v9934_v9, %v9933_v36  ;;  %v9954_v36 = vld [vmem:[#allocation121_spill] sm:$0xff] }
 0x4ed   : > { %3118 = vmatpush1.msra.mxu1 %v3019_v61  ;;  %v3007_v33 = vsel %vm1084_vm8, %v5885_v2, %v8030_v38  ;;  %v3046_v48 = vsel %vm1084_vm8, %v8472_v37, %v8417_v62  ;;  %v9932_v62 = vld [vmem:[#allocation141_spill] sm:$0xff] }
 0x4ee   : > { %3119 = vmatprep.subr.mxu1 %v3018_v56  ;;  %4582 = vrot.lane.b32.xlu1 %v4577_v43, %s6298_s23  ;;  %v3044_v61 = vsel %vm1084_vm8, %v9932_v62, %v8282_v11  ;;  %v9935_v56 = vld [vmem:[#allocation40_spill] sm:$0xff]  ;;  %v9936_v43 = vld [vmem:[#allocation41_spill] sm:$0xff] }
 0x4ef   : > { %3120 = vmatpush1.msra.mxu1 %v3017_v45  ;;  %v5894_v18 = vunpack.i.l.bf16 %v9935_v56  ;;  %v5914_v44 = vunpack.i.l.bf16 %v9936_v43  ;;  %v9937_v11 = vld [vmem:[#allocation120_spill] sm:$0xff] }
 0x4f0   : > { %v3318_v26 = vpop.permute.xlu1 %3317  ;;  %v8493_v14 = vpop.permute.xlu0 %3829  ;;  %3121 = vmatprep.subr.mxu1 %v3016_v13 }
 0x4f1   : > { %3122 = vmatpush1.msra.mxu1 %v3015_v51  ;;  %v3376_v19 = vsel %vm1290_vm9, %v3318_v26, %v3320_v0  ;;  %v3375_v34 = vsel %vm1290_vm9, %v5899_v17, %v3318_v26  ;;  %v3012_v0 = vsel %vm1084_vm8, %v8251_v22, %v8274_v6  ;;  %v3010_v6 = vsel %vm1084_vm8, %v8152_v35, %v8150_v10  ;;  %v9938_v17 = vld [vmem:[#allocation129_spill] sm:$0xff]  ;;  %v9940_v26 = vld [vmem:[#allocation72_spill] sm:$0xff] }
 0x4f2   : > { %3123 = vmatprep.subr.mxu1 %v3014_v30  ;;  %3437 = vmatprep.subr.mxu0 %v3376_v19  ;;  %v3009_v22 = vsel %vm1084_vm8, %v5884_v15, %v8152_v35  ;;  %v3008_v10 = vsel %vm1084_vm8, %v8030_v38, %v8054_v41  ;;  %v3369_v41 = vsel %vm1290_vm9, %v5905_v40, %v8073_v46  ;;  %v5895_v30 = vunpack.i.h.bf16 %v9935_v56  ;;  %v9943_v15 = vld [vmem:[#allocation68_spill] sm:$0xff]  ;;  %v9955_v56 = vld [vmem:[#allocation99_spill] sm:$0xff] }
 0x4f3   : > { %3124 = vmatpush1.msra.mxu1 %v3013_v3  ;;  %3438 = vmatpush1.msra.mxu0 %v3375_v34  ;;  %v3045_v38 = vsel %vm1084_vm8, %v5889_v21, %v8472_v37  ;;  %v3367_v46 = vsel %vm1290_vm9, %v5909_v53, %v7946_v58  ;;  %v3043_v58 = vsel %vm1084_vm8, %v5890_v8, %v9932_v62  ;;  %v5915_v19 = vunpack.i.h.bf16 %v9936_v43  ;;  %v9941_v3 = vld [vmem:[#allocation105_spill] sm:$0xff]  ;;  %v9947_v21 = vld [vmem:[#allocation106_spill] sm:$0xff]  ;;  %v9956_v43 = vld [vmem:[#allocation79_spill] sm:$0xff] }
 0x4f4   : > { %v8516_v27 = vpop.permute.xlu1 %3831  ;;  %3439 = vmatprep.subr.mxu0 %v3374_v5  ;;  %v8518_v50 = vpop.permute.xlu0 %3271  ;;  %3125 = vmatprep.subr.mxu1 %v3012_v0  ;;  %v3365_v37 = vsel %vm1290_vm9, %v5910_v12, %v9934_v9  ;;  %v3042_v13 = vsel %vm1084_vm8, %v9938_v17, %v9937_v11  ;;  %v3364_v51 = vsel %vm1290_vm9, %v9940_v26, %v9939_v1  ;;  %v9942_v5 = vld [vmem:[#allocation104_spill] sm:$0xff]  ;;  %v9952_v62 = vld [vmem:[#allocation29_spill] sm:$0xff] }
 0x4f5   : > { %3126 = vmatpush1.msra.mxu1 %v3011_v32  ;;  %3440 = vmatpush1.msra.mxu0 %v3373_v16  ;;  %v3041_v59 = vsel %vm1084_vm8, %v5894_v18, %v9938_v17  ;;  %v3363_v42 = vsel %vm1290_vm9, %v5914_v44, %v9940_v26  ;;  %v3040_v0 = vsel %vm1084_vm8, %v9942_v5, %v9941_v3  ;;  %v9945_v16 = vld [vmem:[#allocation58_spill] sm:$0xff]  ;;  %v9957_v44 = vld [vmem:[#allocation108_spill] sm:$0xff] }
 0x4f6   : > { %3127 = vmatprep.subr.mxu1 %v3010_v6  ;;  %3441 = vmatprep.subr.mxu0 %v3372_v57  ;;  %v3362_v32 = vsel %vm1290_vm9, %v9944_v31, %v9943_v15  ;;  %v5919_v6 = vunpack.i.l.bf16 %v9945_v16  ;;  %v3039_v2 = vsel %vm1084_vm8, %v5895_v30, %v9942_v5  ;;  %v3361_v40 = vsel %vm1290_vm9, %v5915_v19, %v9944_v31  ;;  %v9959_v11 = vld [vmem:[#allocation60_spill] sm:$0xff]  ;;  %v9962_v30 = vld [vmem:[#allocation158_spill] sm:$0xff] }
 0x4f7   : > { %3128 = vmatpush1.msra.mxu1 %v3009_v22  ;;  %3442 = vmatpush1.msra.mxu0 %v3371_v54  ;;  %v2759_v22 = vld [vmem:[#allocation13] sm:$0xff]  ;;  %v5929_v17 = vunpack.i.l.bf16 %v9959_v11  ;;  %v9963_v3 = vld [vmem:[#allocation74_spill] sm:$0xff] }
 0x4f8   : > { %v8544_v47 = vpop.permute.xlu1 %4176  ;;  %v8546_v35 = vpop.permute.xlu0 %3825  ;;  %3129 = vmatprep.subr.mxu1 %v3008_v10  ;;  %3443 = vmatprep.subr.mxu0 %v3370_v25  ;;  %v9946_v54 = vld [vmem:[#allocation157_spill] sm:$0xff]  ;;  %v5920_v25 = vunpack.i.h.bf16 %v9945_v16  ;;  %v9965_v15 = vld [vmem:[#allocation144_spill] sm:$0xff] }
 0x4f9   : > { %3130 = vmatpush1.msra.mxu1 %v3007_v33  ;;  %3444 = vmatpush1.msra.mxu0 %v3369_v41  ;;  %v3360_v10 = vsel %vm1290_vm9, %v9946_v54, %v8518_v50  ;;  %v3359_v53 = vsel %vm1290_vm9, %v5919_v6, %v9946_v54  ;;  %v9948_v33 = vld [vmem:[#allocation142_spill] sm:$0xff]  ;;  %v9949_v41 = vld [vmem:[#allocation139_spill] sm:$0xff]  ;;  %v3351_v5 = vsel %vm1290_vm9, %v5929_v17, %v9962_v30  ;;  %v9966_v31 = vld [vmem:[#allocation140_spill] sm:$0xff] }
 0x4fa   : > { %3155 = vmatprep.subr.mxu1 %v3046_v48  ;;  %3445 = vmatprep.subr.mxu0 %v3368_v63  ;;  %v3358_v48 = vsel %vm1290_vm9, %v9949_v41, %v9948_v33  ;;  %v9950_v63 = vld [vmem:[#allocation42_spill] sm:$0xff]  ;;  %v9967_v16 = vld [vmem:[#allocation44_spill] sm:$0xff] }
 0x4fb   : > { %3156 = vmatpush2.msra.mxu1 %v3045_v38  ;;  %3446 = vmatpush1.msra.mxu0 %v3367_v46  ;;  %v5924_v8 = vunpack.i.l.bf16 %v9950_v63  ;;  %v9951_v38 = vld [vmem:[#allocation118_spill] sm:$0xff]  ;;  %v3357_v46 = vsel %vm1290_vm9, %v5920_v25, %v9949_v41  ;;  %v5934_v6 = vunpack.i.l.bf16 %v9967_v16 }
 0x4fc   : > { %v8572_v45 = vpop.permute.xlu1 %4174  ;;  %3157 = vmatprep.subr.mxu1 %v3044_v61  ;;  %3447 = vmatprep.subr.mxu0 %v3366_v29  ;;  %v3248_v34 = vpop.permute.xlu0 %3247  ;;  %v9953_v61 = vld [vmem:[#allocation124_spill] sm:$0xff]  ;;  %v5925_v29 = vunpack.i.h.bf16 %v9950_v63  ;;  %v9970_v54 = vld [vmem:[#allocation126_spill] sm:$0xff] }
 0x4fd   : > { %3158 = vmatpush2.msra.mxu1 %v3043_v58  ;;  %3448 = vmatpush1.msra.mxu0 %v3365_v37  ;;  %v3356_v9 = vsel %vm1290_vm9, %v9954_v36, %v9953_v61  ;;  %v3355_v18 = vsel %vm1290_vm9, %v5924_v8, %v9954_v36  ;;  %v9958_v58 = vld [vmem:[#allocation101_spill] sm:$0xff]  ;;  %v3352_v19 = vsel %vm1290_vm9, %v9962_v30, %v3248_v34  ;;  %v9973_v41 = vld [vmem:[#allocation46_spill] sm:$0xff]  ;;  %v9977_v61 = vld [vmem:[#allocation43_spill] sm:$0xff] }
 0x4fe   : > { %3159 = vmatprep.subr.mxu1 %v3042_v13  ;;  %3449 = vmatprep.subr.mxu0 %v3364_v51  ;;  %v3354_v37 = vsel %vm1290_vm9, %v9958_v58, %v9957_v44  ;;  %v9960_v13 = vld [vmem:[#allocation90_spill] sm:$0xff]  ;;  %v3353_v26 = vsel %vm1290_vm9, %v5925_v29, %v9958_v58  ;;  %v9978_v29 = vld [vmem:[#allocation39_spill] sm:$0xff]  ;;  %v9980_v58 = vld [vmem:[#allocation116_spill] sm:$0xff] }
 0x4ff   : > { %3160 = vmatpush2.msra.mxu1 %v3041_v59  ;;  %3450 = vmatpush1.msra.mxu0 %v3363_v42  ;;  %v9961_v51 = vld [vmem:[#allocation30_spill] sm:$0xff]  ;;  %v5930_v59 = vunpack.i.h.bf16 %v9959_v11  ;;  %v9982_v11 = vld [vmem:[#allocation143_spill] sm:$0xff] }
 0x500   : > { %v8597_v57 = vpop.permute.xlu1 %4170  ;;  %3161 = vmatprep.subr.mxu1 %v3040_v0  ;;  %3451 = vmatprep.subr.mxu0 %v3362_v32  ;;  %v8614_v12 = vpop.permute.xlu0 %6022  ;;  %v9964_v0 = vld [vmem:[#allocation61_spill] sm:$0xff]  ;;  %v3350_v32 = vsel %vm1290_vm9, %v9966_v31, %v9965_v15  ;;  %v9975_v63 = vld [vmem:[#allocation102_spill] sm:$0xff]  ;;  %v9988_v15 = vld [vmem:[#allocation31_spill] sm:$0xff] }
 0x501   : > { %3162 = vmatpush2.msra.mxu1 %v3039_v2  ;;  %3452 = vmatpush1.msra.mxu0 %v3361_v40  ;;  %v9968_v2 = vld [vmem:[#allocation56_spill] sm:$0xff]  ;;  %v3349_v40 = vsel %vm1290_vm9, %v5930_v59, %v9966_v31  ;;  %v9985_v59 = vld [vmem:[#allocation97_spill] sm:$0xff] }
 0x502   : > { %3453 = vmatprep.subr.mxu0 %v3360_v10  ;;  %3576 = vmatprep.subr.mxu1 %v9947_v21  ;;  %v9971_v10 = vld [vmem:[#allocation123_spill] sm:$0xff]  ;;  %v5935_v21 = vunpack.i.h.bf16 %v9967_v16  ;;  %v9990_v16 = vld [vmem:[#allocation112_spill] sm:$0xff] }
 0x503   : > { %3164 = vmatmul.mubr.f32.vlgmr.msra.gmra.mxu1 %v2759_v22  ;;  %3454 = vmatpush1.msra.mxu0 %v3359_v53  ;;  %v9969_v22 = vld [vmem:[#allocation54_spill] sm:$0xff]  ;;  %v3348_v25 = vsel %vm1290_vm9, %v9971_v10, %v9970_v54  ;;  %v3347_v33 = vsel %vm1290_vm9, %v5934_v6, %v9971_v10  ;;  %v9991_v6 = vld [vmem:[#allocation107_spill] sm:$0xff] }
 0x504   : > { %3577 = vmatpush1.msra.mxu1 %v9951_v38  ;;  %v8617_v50 = vpop.permute.xlu1 %3823  ;;  %3455 = vmatprep.subr.mxu0 %v3358_v48  ;;  %v3344_v42 = vpop.permute.xlu0 %3343  ;;  %v9972_v53 = vld [vmem:[#allocation50_spill] sm:$0xff]  ;;  %v9976_v38 = vld [vmem:[#allocation63_spill] sm:$0xff] }
 0x505   : > { %3578 = vmatprep.subr.mxu1 %v9952_v62  ;;  %3456 = vmatpush1.msra.mxu0 %v3357_v46  ;;  %v9974_v48 = vld [vmem:[#allocation110_spill] sm:$0xff]  ;;  %v5939_v46 = vunpack.i.l.bf16 %v9976_v38 }
 0x506   : > { %3579 = vmatpush1.msra.mxu1 %v9955_v56  ;;  %3457 = vmatprep.subr.mxu0 %v3356_v9  ;;  %v3346_v8 = vsel %vm1290_vm9, %v9975_v63, %v9974_v48  ;;  %v3345_v9 = vsel %vm1290_vm9, %v5935_v21, %v9975_v63  ;;  %v9993_v10 = vld [vmem:[#allocation82_spill] sm:$0xff] }
 0x507   : > { %3580 = vmatprep.subr.mxu1 %v9956_v43  ;;  %3458 = vmatpush1.msra.mxu0 %v3355_v18  ;;  %v5940_v18 = vunpack.i.h.bf16 %v9976_v38  ;;  %v9979_v43 = vld [vmem:[#allocation38_spill] sm:$0xff]  ;;  %v2762_v38 = vld [vmem:[#allocation13 + $0x18] sm:$0xff] }
 0x508   : > { %3581 = vmatpush1.msra.mxu1 %v9960_v13  ;;  %v3342_v1 = vpop.permute.xlu1 %3341  ;;  %3459 = vmatprep.subr.mxu0 %v3354_v37  ;;  %v8665_v62 = vpop.permute.xlu0 %4168  ;;  %v9981_v37 = vld [vmem:[#allocation146_spill] sm:$0xff]  ;;  %v9983_v13 = vld [vmem:[#allocation45_spill] sm:$0xff] }
 0x509   : > { %3582 = vmatprep.subr.mxu1 %v9961_v51  ;;  %3460 = vmatpush1.msra.mxu0 %v3353_v26  ;;  %v3384_v56 = vsel %vm1290_vm9, %v3342_v1, %v3344_v42  ;;  %v3383_v44 = vsel %vm1290_vm9, %v5939_v46, %v3342_v1  ;;  %v3382_v17 = vsel %vm1290_vm9, %v9982_v11, %v9981_v37  ;;  %v5944_v26 = vunpack.i.l.bf16 %v9983_v13  ;;  %v9984_v51 = vld [vmem:[#allocation103_spill] sm:$0xff]  ;;  %v9986_v1 = vld [vmem:[#allocation128_spill] sm:$0xff]  ;;  %v10002_v37 = vld [vmem:[#allocation33_spill] sm:$0xff] }
 0x50a   : > { %3583 = vmatpush1.msra.mxu1 %v9963_v3  ;;  %3461 = vmatprep.subr.mxu0 %v3352_v19  ;;  %v3381_v19 = vsel %vm1290_vm9, %v5940_v18, %v9982_v11  ;;  %v9987_v42 = vld [vmem:[#allocation132_spill] sm:$0xff]  ;;  %v2761_v18 = vld [vmem:[#allocation13 + $0x10] sm:$0xff] }
 0x50b   : > { %3584 = vmatprep.subr.mxu1 %v9964_v0  ;;  %3462 = vmatpush1.msra.mxu0 %v3351_v5  ;;  %v3380_v3 = vsel %vm1290_vm9, %v9987_v42, %v9986_v1  ;;  %v5945_v5 = vunpack.i.h.bf16 %v9983_v13  ;;  %v3379_v31 = vsel %vm1290_vm9, %v5944_v26, %v9987_v42  ;;  %v3220_v11 = vld [vmem:[#allocation13 + $0x58] sm:$0xff]  ;;  %v10005_v1 = vld [vmem:[#allocation134_spill] sm:$0xff] }
 0x50c   : > { %3585 = vmatpush1.msra.mxu1 %v9968_v2  ;;  %v3916_v34 = vpop.permute.xlu1 %3915  ;;  %3463 = vmatprep.subr.mxu0 %v3350_v32  ;;  %v8690_v0 = vpop.permute.xlu0 %4252  ;;  %v9989_v32 = vld [vmem:[#allocation83_spill] sm:$0xff]  ;;  %v3378_v2 = vsel %vm1290_vm9, %v9991_v6, %v9990_v16 }
 0x50d   : > { %3586 = vmatprep.subr.mxu1 %v9969_v22  ;;  %3464 = vmatpush1.msra.mxu0 %v3349_v40  ;;  %v3217_v40 = vld [vmem:[#allocation13 + $0x40] sm:$0xff]  ;;  %v9992_v22 = vld [vmem:[#allocation47_spill] sm:$0xff]  ;;  %v3377_v21 = vsel %vm1290_vm9, %v5945_v5, %v9991_v6  ;;  %v2764_v5 = vld [vmem:[#allocation13 + $0x28] sm:$0xff] }
 0x50e   : > { %3587 = vmatpush1.msra.mxu1 %v9972_v53  ;;  %3465 = vmatprep.subr.mxu0 %v3348_v25  ;;  %v5949_v54 = vunpack.i.l.bf16 %v9992_v22  ;;  %v9994_v53 = vld [vmem:[#allocation71_spill] sm:$0xff]  ;;  %v2763_v6 = vld [vmem:[#allocation13 + $0x20] sm:$0xff] }
 0x50f   : > { %3588 = vmatprep.subr.mxu1 %v9973_v41  ;;  %3466 = vmatpush1.msra.mxu0 %v3347_v33  ;;  %v5950_v33 = vunpack.i.h.bf16 %v9992_v22  ;;  %v9995_v41 = vld [vmem:[#allocation32_spill] sm:$0xff]  ;;  %v10010_v22 = vld [vmem:[#allocation34_spill] sm:$0xff] }
 0x510   : > { %3589 = vmatpush1.msra.mxu1 %v9977_v61  ;;  %v3914_v36 = vpop.permute.xlu1 %3913  ;;  %3467 = vmatprep.subr.mxu0 %v3346_v8  ;;  %v3974_v48 = vsel %vm1673_vm10, %v3916_v34, %v5949_v54  ;;  %v9996_v8 = vld [vmem:[#allocation119_spill] sm:$0xff]  ;;  %v8711_v46 = vpop.permute.xlu0 %6027  ;;  %v9997_v61 = vld [vmem:[#allocation113_spill] sm:$0xff] }
 0x511   : > { %3590 = vmatprep.subr.mxu1 %v9978_v29  ;;  %3468 = vmatpush1.msra.mxu0 %v3345_v9  ;;  %v3973_v63 = vsel %vm1673_vm10, %v3914_v36, %v3916_v34  ;;  %v9998_v29 = vld [vmem:[#allocation145_spill] sm:$0xff]  ;;  %v10001_v34 = vld [vmem:[#allocation148_spill] sm:$0xff] }
 0x512   : > { %3591 = vmatpush1.msra.mxu1 %v9979_v43  ;;  %3493 = vmatprep.subr.mxu0 %v3384_v56  ;;  %v3972_v56 = vsel %vm1673_vm10, %v9998_v29, %v5950_v33  ;;  %v9999_v43 = vld [vmem:[#allocation49_spill] sm:$0xff]  ;;  %v3971_v36 = vsel %vm1673_vm10, %v10001_v34, %v9998_v29  ;;  %v10012_v33 = vld [vmem:[#allocation95_spill] sm:$0xff] }
 0x513   : > { %3592 = vmatprep.subr.mxu1 %v9980_v58  ;;  %3494 = vmatpush2.msra.mxu0 %v3383_v44  ;;  %v5959_v44 = vunpack.i.l.bf16 %v9999_v43  ;;  %v10000_v58 = vld [vmem:[#allocation98_spill] sm:$0xff]  ;;  %v5960_v26 = vunpack.i.h.bf16 %v9999_v43  ;;  %v10011_v54 = vld [vmem:[#allocation109_spill] sm:$0xff]  ;;  %v10016_v43 = vld [vmem:[#allocation35_spill] sm:$0xff] }
 0x514   : > { %3593 = vmatpush1.msra.mxu1 %v9984_v51  ;;  %v8681_v30 = vpop.permute.xlu1 %4254  ;;  %3495 = vmatprep.subr.mxu0 %v3382_v17  ;;  %v10003_v17 = vld [vmem:[#allocation130_spill] sm:$0xff] }
 0x515   : > { %3594 = vmatprep.subr.mxu1 %v9985_v59  ;;  %3496 = vmatpush2.msra.mxu0 %v3381_v19  ;;  %v3970_v13 = vsel %vm1673_vm10, %v10003_v17, %v5959_v44  ;;  %v10004_v51 = vld [vmem:[#allocation86_spill] sm:$0xff]  ;;  %v3969_v42 = vsel %vm1673_vm10, %v10005_v1, %v10003_v17  ;;  %v10017_v44 = vld [vmem:[#allocation88_spill] sm:$0xff] }
 0x516   : > { %3595 = vmatpush1.msra.mxu1 %v9988_v15  ;;  %3497 = vmatprep.subr.mxu0 %v3380_v3  ;;  %v3219_v59 = vld [vmem:[#allocation13 + $0x50] sm:$0xff]  ;;  %v10006_v3 = vld [vmem:[#allocation85_spill] sm:$0xff]  ;;  %v8736_v15 = vpop.permute.xlu0 %3937  ;;  %v10019_v17 = vld [vmem:[#allocation100_spill] sm:$0xff] }
 0x517   : > { %3596 = vmatprep.subr.mxu1 %v9989_v32  ;;  %3498 = vmatpush2.msra.mxu0 %v3379_v31  ;;  %v10007_v31 = vld [vmem:[#allocation73_spill] sm:$0xff]  ;;  %v10008_v32 = vld [vmem:[#allocation115_spill] sm:$0xff] }
 0x518   : > { %3597 = vmatpush1.msra.mxu1 %v9993_v10  ;;  %v8701_v25 = vpop.permute.xlu1 %3867  ;;  %3499 = vmatprep.subr.mxu0 %v3378_v2  ;;  %v3968_v16 = vsel %vm1673_vm10, %v10008_v32, %v5960_v26  ;;  %v10009_v2 = vld [vmem:[#allocation52_spill] sm:$0xff]  ;;  %v3967_v10 = vsel %vm1673_vm10, %v10011_v54, %v10008_v32  ;;  %v2765_v34 = vld [vmem:[#allocation13 + $0x30] sm:$0xff] }
 0x519   : > { %3598 = vmatprep.subr.mxu1 %v9994_v53  ;;  %3500 = vmatpush2.msra.mxu0 %v3377_v21  ;;  %v3222_v21 = vld [vmem:[#allocation13 + $0x68] sm:$0xff]  ;;  %v10023_v32 = vld [vmem:[#allocation92_spill] sm:$0xff] }
 0x51a   : > { %3599 = vmatpush1.msra.mxu1 %v9995_v41  ;;  %3502 = vmatmul.mubr.f32.vlgmr.msra.gmra.mxu0 %v3217_v40  ;;  %v5969_v40 = vunpack.i.l.bf16 %v10009_v2 }
 0x51b   : > { %3600 = vmatprep.subr.mxu1 %v9996_v8  ;;  %4035 = vmatprep.subr.mxu0 %v3974_v48  ;;  %v5970_v48 = vunpack.i.h.bf16 %v10009_v2  ;;  %v3221_v8 = vld [vmem:[#allocation13 + $0x60] sm:$0xff]  ;;  %v3557_v2 = vld [vmem:[#allocation13 + $0x88] sm:$0xff] }
 0x51c   : > { %3601 = vmatpush1.msra.mxu1 %v9997_v61  ;;  %4036 = vmatpush1.msra.mxu0 %v3973_v63  ;;  %v8714_v9 = vpop.permute.xlu1 %4206  ;;  %v3966_v41 = vsel %vm1673_vm10, %v10012_v33, %v5969_v40  ;;  %v10013_v63 = vld [vmem:[#allocation122_spill] sm:$0xff]  ;;  %v10015_v61 = vld [vmem:[#allocation93_spill] sm:$0xff] }
 0x51d   : > { %3602 = vmatprep.subr.mxu1 %v10000_v58  ;;  %4037 = vmatprep.subr.mxu0 %v3972_v56  ;;  %v3965_v29 = vsel %vm1673_vm10, %v10015_v61, %v10012_v33  ;;  %v2766_v56 = vld [vmem:[#allocation13 + $0x38] sm:$0xff]  ;;  %v3964_v58 = vsel %vm1673_vm10, %v10017_v44, %v5970_v48 }
 0x51e   : > { %5621 = vmatprep.mubr.msk.f32.mxu1 %vm1084_vm8, %v2762_v38  ;;  %3603 = vmatpush1.msra.mxu1 %v10002_v37  ;;  %v10014_v38 = vld [vmem:[#allocation127_spill] sm:$0xff] }
 0x51f   : > { %4038 = vmatpush1.msra.mxu0 %v3971_v36  ;;  %3170 = vmatmul.mubr.f32.gmra.mxu1 %v2761_v18  ;;  %v8758_v18 = vpop.permute.xlu0 %3933  ;;  %v10018_v37 = vld [vmem:[#allocation55_spill] sm:$0xff] }
 0x520   : > { %3604 = vmatprep.subr.mxu1 %v10004_v51  ;;  %4039 = vmatprep.subr.mxu0 %v3970_v13  ;;  %v8729_v19 = vpop.permute.xlu1 %3843  ;;  %v10020_v13 = vld [vmem:[#allocation81_spill] sm:$0xff]  ;;  %v3224_v51 = vld [vmem:[#allocation13 + $0x78] sm:$0xff] }
 0x521   : > { %5625 = vmatprep.mubr.msk.f32.mxu0 %vm1084_vm8, %v3220_v11  ;;  %3605 = vmatpush1.msra.mxu1 %v10006_v3  ;;  %v5979_v11 = vunpack.i.l.bf16 %v10018_v37  ;;  %v3963_v26 = vsel %vm1673_vm10, %v10020_v13, %v10017_v44  ;;  %v10022_v3 = vld [vmem:[#allocation87_spill] sm:$0xff]  ;;  %v4312_v44 = vsel %vm1879_vm11, %v8690_v0, %v8681_v30  ;;  %v10032_v13 = vld [vmem:[#allocation150_spill] sm:$0xff] }
 0x522   : > { %4040 = vmatpush1.msra.mxu0 %v3969_v42  ;;  %3606 = vmatprep.subr.mxu1 %v10007_v31  ;;  %v5980_v42 = vunpack.i.h.bf16 %v10018_v37  ;;  %v3558_v0 = vld [vmem:[#allocation13 + $0x90] sm:$0xff] }
 0x523   : > { %3508 = vmatmul.mubr.f32.gmra.mxu0 %v3219_v59  ;;  %4041 = vmatprep.subr.mxu0 %v3968_v16  ;;  %v10021_v59 = vld [vmem:[#allocation77_spill] sm:$0xff]  ;;  %v10024_v16 = vld [vmem:[#allocation75_spill] sm:$0xff]  ;;  %v8782_v40 = vpop.permute.xlu0 %6032 }
 0x524   : > { %5622 = vmatprep.mubr.msk.f32.mxu1 %vm1084_vm8, %v2764_v5  ;;  %3607 = vmatpush1.msra.mxu1 %v10010_v22  ;;  %v8747_v53 = vpop.permute.xlu1 %4182  ;;  %v3962_v1 = vsel %vm1673_vm10, %v10021_v59, %v5979_v11  ;;  %v3223_v5 = vld [vmem:[#allocation13 + $0x70] sm:$0xff]  ;;  %v10025_v22 = vld [vmem:[#allocation69_spill] sm:$0xff] }
 0x525   : > { %4042 = vmatpush1.msra.mxu0 %v3967_v10  ;;  %3176 = vmatmul.mubr.f32.gmra.mxu1 %v2763_v6  ;;  %v3961_v6 = vsel %vm1673_vm10, %v10024_v16, %v10021_v59  ;;  %v3960_v54 = vsel %vm1673_vm10, %v10025_v22, %v5980_v42  ;;  %v3556_v10 = vld [vmem:[#allocation13 + $0x80] sm:$0xff]  ;;  %v10031_v11 = vld [vmem:[#allocation147_spill] sm:$0xff] }
 0x526   : > { %3632 = vmatprep.subr.mxu1 %v10013_v63  ;;  %4043 = vmatprep.subr.mxu0 %v3966_v41  ;;  %v10027_v41 = vld [vmem:[#allocation57_spill] sm:$0xff]  ;;  %v10028_v63 = vld [vmem:[#allocation66_spill] sm:$0xff] }
 0x527   : > { %5626 = vmatprep.mubr.msk.f32.mxu0 %vm1084_vm8, %v3222_v21  ;;  %3633 = vmatpush2.msra.mxu1 %v10014_v38  ;;  %v10026_v21 = vld [vmem:[#allocation48_spill] sm:$0xff]  ;;  %v5989_v48 = vunpack.i.l.bf16 %v10027_v41  ;;  %v5990_v61 = vunpack.i.h.bf16 %v10027_v41 }
 0x528   : > { %4044 = vmatpush1.msra.mxu0 %v3965_v29  ;;  %3634 = vmatprep.subr.mxu1 %v10016_v43  ;;  %v8763_v36 = vpop.permute.xlu1 %3939  ;;  %v5954_v33 = vunpack.i.l.bf16 %v10026_v21 }
 0x529   : > { %3514 = vmatmul.mubr.f32.gmra.mxu0 %v3221_v8  ;;  %4045 = vmatprep.subr.mxu0 %v3964_v58  ;;  %v3959_v8 = vsel %vm1673_vm10, %v10028_v63, %v10025_v22  ;;  %v3958_v29 = vsel %vm1673_vm10, %v8701_v25, %v5989_v48  ;;  %v3559_v58 = vld [vmem:[#allocation13 + $0x98] sm:$0xff]  ;;  %v3561_v48 = vld [vmem:[#allocation13 + $0xa8] sm:$0xff] }
 0x52a   : > { %5623 = vmatprep.mubr.msk.f32.mxu1 %vm1084_vm8, %v2766_v56  ;;  %3635 = vmatpush2.msra.mxu1 %v10019_v17  ;;  %v10029_v56 = vld [vmem:[#allocation149_spill] sm:$0xff]  ;;  %v3956_v17 = vsel %vm1673_vm10, %v10031_v11, %v5990_v61  ;;  %v10037_v22 = vld [vmem:[#allocation131_spill] sm:$0xff] }
 0x52b   : > { %4046 = vmatpush1.msra.mxu0 %v3963_v26  ;;  %3182 = vmatmul.mubr.f32.gmra.mxu1 %v2765_v34  ;;  %v3957_v43 = vsel %vm1673_vm10, %v10029_v56, %v8701_v25  ;;  %v10030_v34 = vld [vmem:[#allocation62_spill] sm:$0xff]  ;;  %v10034_v25 = vld [vmem:[#allocation137_spill] sm:$0xff]  ;;  %v10040_v63 = vld [vmem:[#allocation155_spill] sm:$0xff] }
 0x52c   : > { %3636 = vmatprep.subr.mxu1 %v10022_v3  ;;  %4047 = vmatprep.subr.mxu0 %v3962_v1  ;;  %v8775_v31 = vpop.permute.xlu1 %4164  ;;  %v5999_v37 = vunpack.i.l.bf16 %v10030_v34  ;;  %v8814_v1 = vpop.permute.xlu0 %4276  ;;  %v10035_v3 = vld [vmem:[#allocation152_spill] sm:$0xff] }
 0x52d   : > { %5627 = vmatprep.mubr.msk.f32.mxu0 %vm1084_vm8, %v3224_v51  ;;  %3637 = vmatpush2.msra.mxu1 %v10023_v32  ;;  %v10033_v51 = vld [vmem:[#allocation51_spill] sm:$0xff]  ;;  %v10036_v32 = vld [vmem:[#allocation133_spill] sm:$0xff] }
 0x52e   : > { %4048 = vmatpush1.msra.mxu0 %v3961_v6  ;;  %3638 = vmatprep.subr.mxu1 %v7811_v24  ;;  %v5955_v24 = vunpack.i.h.bf16 %v10026_v21  ;;  %v5964_v59 = vunpack.i.l.bf16 %v10033_v51  ;;  %v3954_v16 = vsel %vm1673_vm10, %v10036_v32, %v5999_v37  ;;  %v5965_v6 = vunpack.i.h.bf16 %v10033_v51  ;;  %v3560_v37 = vld [vmem:[#allocation13 + $0xa0] sm:$0xff] }
 0x52f   : > { %3520 = vmatmul.mubr.f32.gmra.mxu0 %v3223_v5  ;;  %4049 = vmatprep.subr.mxu0 %v3960_v54  ;;  %v4310_v5 = vsel %vm1879_vm11, %v10035_v3, %v10032_v13  ;;  %v10047_v3 = vld [vmem:[#allocation94_spill] sm:$0xff] }
 0x530   : > { %3639 = vmatpush2.msra.mxu1 %v7807_v60  ;;  %5628 = vmatprep.mubr.msk.f32.mxu1 %vm1084_vm8, %v3557_v2  ;;  %v8794_v38 = vpop.permute.xlu1 %4162  ;;  %v4313_v60 = vsel %vm1879_vm11, %v8681_v30, %v5954_v33  ;;  %v4311_v26 = vsel %vm1879_vm11, %v10032_v13, %v5955_v24  ;;  %v3955_v30 = vsel %vm1673_vm10, %v10034_v25, %v10031_v11  ;;  %v6000_v2 = vunpack.i.h.bf16 %v10030_v34  ;;  %v10039_v33 = vld [vmem:[#allocation125_spill] sm:$0xff]  ;;  %v10044_v11 = vld [vmem:[#allocation114_spill] sm:$0xff]  ;;  %v8852_v13 = vpop.permute.xlu0 %6037 }
 0x531   : > { %4050 = vmatpush1.msra.mxu0 %v3959_v8  ;;  %3641 = vmatmul.mubr.f32.vlgmr.msra.gmra.mxu1 %v3556_v10  ;;  %v4309_v54 = vsel %vm1879_vm11, %v10037_v22, %v5964_v59  ;;  %v10038_v10 = vld [vmem:[#allocation136_spill] sm:$0xff]  ;;  %v3953_v41 = vsel %vm1673_vm10, %v10039_v33, %v10036_v32  ;;  %v6009_v8 = vunpack.i.l.bf16 %v10040_v63  ;;  %v10041_v24 = vld [vmem:[#allocation117_spill] sm:$0xff]  ;;  %v6019_v59 = vunpack.i.l.bf16 %v8474_v20 }
 0x532   : > { %4051 = vmatprep.subr.mxu0 %v3958_v29  ;;  %4374 = vmatprep.subr.mxu1 %v4313_v60  ;;  %v4308_v21 = vsel %vm1879_vm11, %v10038_v10, %v10037_v22  ;;  %v3952_v61 = vsel %vm1673_vm10, %v10041_v24, %v6000_v2  ;;  %v10042_v29 = vld [vmem:[#allocation111_spill] sm:$0xff]  ;;  %v3951_v34 = vsel %vm1673_vm10, %v8394_v52, %v10041_v24  ;;  %v10045_v52 = vld [vmem:[#allocation96_spill] sm:$0xff]  ;;  %v6020_v33 = vunpack.i.h.bf16 %v8474_v20  ;;  %v10052_v20 = vld [vmem:[#allocation78_spill] sm:$0xff] }
 0x533   : > { %4052 = vmatpush1.msra.mxu0 %v3957_v43  ;;  %4375 = vmatpush1.msra.mxu1 %v4312_v44  ;;  %v4307_v60 = vsel %vm1879_vm11, %v10042_v29, %v5965_v6  ;;  %v10043_v43 = vld [vmem:[#allocation53_spill] sm:$0xff]  ;;  %v3563_v32 = vld [vmem:[#allocation13 + $0xb8] sm:$0xff] }
 0x534   : > { %4053 = vmatprep.subr.mxu0 %v3956_v17  ;;  %4376 = vmatprep.subr.mxu1 %v4311_v26  ;;  %v8819_v42 = vpop.permute.xlu1 %4278  ;;  %v5974_v44 = vunpack.i.l.bf16 %v10043_v43  ;;  %v4306_v17 = vsel %vm1879_vm11, %v10044_v11, %v10042_v29  ;;  %v3950_v26 = vsel %vm1673_vm10, %v8729_v19, %v6009_v8  ;;  %v5975_v51 = vunpack.i.h.bf16 %v10043_v43  ;;  %v10048_v6 = vld [vmem:[#allocation159_spill] sm:$0xff]  ;;  %v10050_v10 = vld [vmem:[#allocation28_spill] sm:$0xff] }
 0x535   : > { %5629 = vmatprep.mubr.msk.f32.mxu1 %vm1084_vm8, %v3559_v58  ;;  %4054 = vmatpush1.msra.mxu0 %v3955_v30  ;;  %v6010_v58 = vunpack.i.h.bf16 %v10040_v63  ;;  %v10046_v30 = vld [vmem:[#allocation156_spill] sm:$0xff]  ;;  %v10049_v22 = vld [vmem:[#allocation91_spill] sm:$0xff]  ;;  %v3946_v8 = vsel %vm1673_vm10, %v8516_v27, %v6019_v59  ;;  %v5985_v24 = vunpack.i.h.bf16 %v10050_v10  ;;  %v6030_v11 = vunpack.i.h.bf16 %v8711_v46 }
 0x536   : > { %4377 = vmatpush1.msra.mxu1 %v4310_v5  ;;  %4055 = vmatprep.subr.mxu0 %v3954_v16  ;;  %v4305_v25 = vsel %vm1879_vm11, %v10045_v52, %v5974_v44  ;;  %v4304_v5 = vsel %vm1879_vm11, %v10047_v3, %v10045_v52  ;;  %v10053_v43 = vld [vmem:[#allocation59_spill] sm:$0xff]  ;;  %v10057_v3 = vld [vmem:[#allocation64_spill] sm:$0xff] }
 0x537   : > { %3647 = vmatmul.mubr.f32.gmra.mxu1 %v3558_v0  ;;  %4378 = vmatprep.subr.mxu1 %v4309_v54  ;;  %v3949_v0 = vsel %vm1673_vm10, %v10046_v30, %v8729_v19  ;;  %v3948_v2 = vsel %vm1673_vm10, %v10048_v6, %v6010_v58  ;;  %v4303_v54 = vsel %vm1879_vm11, %v10049_v22, %v5975_v51  ;;  %v5994_v44 = vunpack.i.l.bf16 %v10053_v43  ;;  %v10055_v51 = vld [vmem:[#allocation70_spill] sm:$0xff] }
 0x538   : > { %4056 = vmatpush1.msra.mxu0 %v3953_v41  ;;  %4379 = vmatpush1.msra.mxu1 %v4308_v21  ;;  %v8842_v56 = vpop.permute.xlu1 %3931  ;;  %v5984_v21 = vunpack.i.l.bf16 %v10050_v10  ;;  %v3947_v19 = vsel %vm1673_vm10, %v8448_v23, %v10048_v6  ;;  %v3562_v41 = vld [vmem:[#allocation13 + $0xb0] sm:$0xff]  ;;  %v3926_v23 = vpop.permute.xlu0 %3925  ;;  %v3945_v58 = vsel %vm1673_vm10, %v8493_v14, %v8516_v27  ;;  %v4299_v59 = vsel %vm1879_vm11, %v10055_v51, %v5985_v24 }
 0x539   : > { %4057 = vmatprep.subr.mxu0 %v3952_v61  ;;  %4380 = vmatprep.subr.mxu1 %v4307_v60  ;;  %v6029_v61 = vunpack.i.l.bf16 %v8711_v46  ;;  %v3943_v14 = vsel %vm1673_vm10, %v8617_v50, %v8546_v35  ;;  %v10056_v27 = vld [vmem:[#allocation67_spill] sm:$0xff]  ;;  %v5995_v52 = vunpack.i.h.bf16 %v10053_v43  ;;  %v4297_v30 = vsel %vm1879_vm11, %v8714_v9, %v5994_v44 }
 0x53a   : > { %5630 = vmatprep.mubr.msk.f32.mxu1 %vm1084_vm8, %v3561_v48  ;;  %4058 = vmatpush1.msra.mxu0 %v3951_v34  ;;  %v10051_v48 = vld [vmem:[#allocation84_spill] sm:$0xff]  ;;  %v4301_v29 = vsel %vm1879_vm11, %v10052_v20, %v5984_v21  ;;  %v4298_v46 = vsel %vm1879_vm11, %v10056_v27, %v10055_v51  ;;  %v3981_v50 = vsel %vm1673_vm10, %v8736_v15, %v8763_v36  ;;  %v6040_v6 = vunpack.i.h.bf16 %v8852_v13 }
 0x53b   : > { %4381 = vmatpush1.msra.mxu1 %v4306_v17  ;;  %4059 = vmatprep.subr.mxu0 %v3950_v26  ;;  %v4302_v63 = vsel %vm1879_vm11, %v10051_v48, %v10049_v22  ;;  %v10054_v34 = vld [vmem:[#allocation36_spill] sm:$0xff]  ;;  %v6039_v17 = vunpack.i.l.bf16 %v8852_v13  ;;  %v3944_v26 = vsel %vm1673_vm10, %v8546_v35, %v6020_v33  ;;  %v6004_v35 = vunpack.i.l.bf16 %v10057_v3  ;;  %v10061_v33 = vld [vmem:[#allocation135_spill] sm:$0xff] }
 0x53c   : > { %3653 = vmatmul.mubr.f32.gmra.mxu1 %v3560_v37  ;;  %4382 = vmatprep.subr.mxu1 %v4305_v25  ;;  %v3928_v16 = vpop.permute.xlu1 %3927  ;;  %v4300_v37 = vsel %vm1879_vm11, %v10054_v34, %v10052_v20  ;;  %v3982_v25 = vsel %vm1673_vm10, %v8763_v36, %v6029_v61  ;;  %v3980_v22 = vsel %vm1673_vm10, %v8758_v18, %v6030_v11 }
 0x53d   : > { %4060 = vmatpush1.msra.mxu0 %v3949_v0  ;;  %4383 = vmatpush1.msra.mxu1 %v4304_v5  ;;  %v10058_v5 = vld [vmem:[#allocation151_spill] sm:$0xff]  ;;  %v3978_v21 = vsel %vm1673_vm10, %v3928_v16, %v6039_v17  ;;  %v3979_v15 = vsel %vm1673_vm10, %v8842_v56, %v8758_v18  ;;  %v3977_v13 = vsel %vm1673_vm10, %v3926_v23, %v3928_v16  ;;  %v3696_v56 = vld [vmem:[#allocation13 + $0xc8] sm:$0xff]  ;;  %v6014_v16 = vunpack.i.l.bf16 %v8396_v28 }
 0x53e   : > { %4061 = vmatprep.subr.mxu0 %v3948_v2  ;;  %4384 = vmatprep.subr.mxu1 %v4303_v54  ;;  %v3922_v2 = vpop.permute.xlu0 %3921  ;;  %v10059_v54 = vld [vmem:[#allocation153_spill] sm:$0xff]  ;;  %v4290_v20 = vsel %vm1879_vm11, %v8434_v7, %v8415_v55  ;;  %v4288_v34 = vsel %vm1879_vm11, %v8450_v49, %v8747_v53  ;;  %v3698_v7 = vld [vmem:[#allocation13 + $0xd8] sm:$0xff]  ;;  %v4286_v11 = vsel %vm1879_vm11, %v8572_v45, %v8544_v47  ;;  %v6025_v17 = vunpack.i.h.bf16 %v8614_v12 }
 0x53f   : > { %5631 = vmatprep.mubr.msk.f32.mxu1 %vm1084_vm8, %v3563_v32  ;;  %4062 = vmatpush1.msra.mxu0 %v3947_v19  ;;  %v4296_v32 = vsel %vm1879_vm11, %v10058_v5, %v8714_v9  ;;  %v4295_v10 = vsel %vm1879_vm11, %v10059_v54, %v5995_v52  ;;  %v10060_v9 = vld [vmem:[#allocation138_spill] sm:$0xff]  ;;  %v6005_v19 = vunpack.i.h.bf16 %v10057_v3  ;;  %v3976_v24 = vsel %vm1673_vm10, %v3922_v2, %v6040_v6 }
 0x540   : > { %4385 = vmatpush1.msra.mxu1 %v4302_v63  ;;  %4063 = vmatprep.subr.mxu0 %v3946_v8  ;;  %v8886_v60 = vpop.permute.xlu1 %4272  ;;  %v4294_v36 = vsel %vm1879_vm11, %v10060_v9, %v10059_v54  ;;  %v10062_v63 = vld [vmem:[#allocation154_spill] sm:$0xff]  ;;  %v6015_v8 = vunpack.i.h.bf16 %v8396_v28  ;;  %v4289_v28 = vsel %vm1879_vm11, %v8747_v53, %v6014_v16  ;;  %v6034_v49 = vunpack.i.l.bf16 %v8782_v40 }
 0x541   : > { %3659 = vmatmul.mubr.f32.gmra.mxu1 %v3562_v41  ;;  %4386 = vmatprep.subr.mxu1 %v4301_v29  ;;  %v4293_v41 = vsel %vm1879_vm11, %v10061_v33, %v6004_v35  ;;  %v4292_v18 = vsel %vm1879_vm11, %v10062_v63, %v10061_v33  ;;  %v4291_v61 = vsel %vm1879_vm11, %v8415_v55, %v6005_v19  ;;  %v4155_v23 = vld [vmem:[#allocation13 + $0x108] sm:$0xff]  ;;  %v6024_v29 = vunpack.i.l.bf16 %v8614_v12  ;;  %v4160_v54 = vld [vmem:[#allocation13 + $0x130] sm:$0xff] }
 0x542   : > { %4064 = vmatpush1.msra.mxu0 %v3945_v58  ;;  %4387 = vmatpush1.msra.mxu1 %v4300_v37  ;;  %v6043_v43 = vpop.permute.xlu0 %6042  ;;  %v3695_v58 = vld [vmem:[#allocation13 + $0xc0] sm:$0xff]  ;;  %v4287_v37 = vsel %vm1879_vm11, %v8544_v47, %v6015_v8  ;;  %v4284_v51 = vsel %vm1879_vm11, %v8665_v62, %v8597_v57  ;;  %v4283_v45 = vsel %vm1879_vm11, %v8775_v31, %v6025_v17  ;;  %v10063_v5 = vmov 0.0   ;;  %v4159_v6 = vld [vmem:[#allocation13 + $0x128] sm:$0xff] }
 0x543   : > { %4065 = vmatprep.subr.mxu0 %v3944_v26  ;;  %4388 = vmatprep.subr.mxu1 %v4299_v59  ;;  %v4285_v53 = vsel %vm1879_vm11, %v8597_v57, %v6024_v29  ;;  %v3697_v26 = vld [vmem:[#allocation13 + $0xd0] sm:$0xff]  ;;  %v3700_v59 = vld [vmem:[#allocation13 + $0xe8] sm:$0xff]  ;;  %v4282_v12 = vsel %vm1879_vm11, %v8794_v38, %v8775_v31  ;;  %v6044_v27 = vunpack.i.l.bf16 %v6043_v43  ;;  %v4321_v57 = vsel %vm1879_vm11, %v8819_v42, %v6034_v49  ;;  %v3699_v62 = vld [vmem:[#allocation13 + $0xe0] sm:$0xff] }
 0x544   : > { %4066 = vmatpush1.msra.mxu0 %v3943_v14  ;;  %4389 = vmatpush1.msra.mxu1 %v4298_v46  ;;  %v8912_v0 = vpop.permute.xlu1 %4270  ;;  %v6035_v14 = vunpack.i.h.bf16 %v8782_v40  ;;  %v4320_v46 = vsel %vm1879_vm11, %v8814_v1, %v8819_v42  ;;  %v6045_v31 = vunpack.i.h.bf16 %v6043_v43  ;;  %v3701_v42 = vld [vmem:[#allocation13 + $0xf0] sm:$0xff] }
 0x545   : > { %4091 = vmatprep.subr.mxu0 %v3982_v25  ;;  %4390 = vmatprep.subr.mxu1 %v4297_v30  ;;  %v3702_v25 = vld [vmem:[#allocation13 + $0xf8] sm:$0xff]  ;;  %v4318_v38 = vsel %vm1879_vm11, %v8912_v0, %v8886_v60 }
 0x546   : > { %4092 = vmatpush2.msra.mxu0 %v3981_v50  ;;  %4391 = vmatpush1.msra.mxu1 %v4296_v32  ;;  %v4265_v47 = vpop.permute.xlu0 %4264  ;;  %v4319_v40 = vsel %vm1879_vm11, %v8886_v60, %v6035_v14  ;;  %v4154_v60 = vld [vmem:[#allocation13 + $0x100] sm:$0xff]  ;;  %v4157_v0 = vld [vmem:[#allocation13 + $0x118] sm:$0xff]  ;;  %v4156_v32 = vld [vmem:[#allocation13 + $0x110] sm:$0xff] }
 0x547   : > { %4093 = vmatprep.subr.mxu0 %v3980_v22  ;;  %4392 = vmatprep.subr.mxu1 %v4295_v10  ;;  %v4161_v22 = vld [vmem:[#allocation13 + $0x138] sm:$0xff] }
 0x548   : > { %4094 = vmatpush2.msra.mxu0 %v3979_v15  ;;  %4393 = vmatpush1.msra.mxu1 %v4294_v36  ;;  %v8937_v48 = vpop.permute.xlu1 %4266 }
 0x549   : > { %4095 = vmatprep.subr.mxu0 %v3978_v21  ;;  %4394 = vmatprep.subr.mxu1 %v4293_v41  ;;  %v4317_v3 = vsel %vm1879_vm11, %v8937_v48, %v6044_v27  ;;  %v4316_v35 = vsel %vm1879_vm11, %v4265_v47, %v8937_v48 }
 0x54a   : > { %4096 = vmatpush2.msra.mxu0 %v3977_v13  ;;  %4395 = vmatpush1.msra.mxu1 %v4292_v18  ;;  %v4259_v30 = vpop.permute.xlu0 %4258 }
 0x54b   : > { %4097 = vmatprep.subr.mxu0 %v3976_v24  ;;  %4396 = vmatprep.subr.mxu1 %v4291_v61 }
 0x54c   : > { %4397 = vmatpush1.msra.mxu1 %v4290_v20  ;;  %v3920_v44 = vpop.permute.xlu1 %3919  ;;  %5632 = vmatprep.mubr.msk.f32.mxu0 %vm1084_vm8, %v3696_v56 }
 0x54d   : > { %4398 = vmatprep.subr.mxu1 %v4289_v28  ;;  %v3975_v55 = vsel %vm1673_vm10, %v3920_v44, %v3922_v2  ;;  %5636 = vmatprep.mubr.msk.f32.mxu1 %vm1084_vm8, %v4155_v23  ;;  %v4158_v2 = vld [vmem:[#allocation13 + $0x120] sm:$0xff] }
 0x54e   : > { %4399 = vmatpush1.msra.mxu1 %v4288_v34  ;;  %4098 = vmatpush2.msra.mxu0 %v3975_v55  ;;  %v9001_v10 = vpop.permute.xlu0 %4504 }
 0x54f   : > { %4400 = vmatprep.subr.mxu1 %v4287_v37  ;;  %4100 = vmatmul.mubr.f32.vlgmr.msra.gmra.mxu0 %v3695_v58 }
 0x550   : > { %4401 = vmatpush1.msra.mxu1 %v4286_v11  ;;  %5633 = vmatprep.mubr.msk.f32.mxu0 %vm1084_vm8, %v3698_v7  ;;  %v4261_v52 = vpop.permute.xlu1 %4260  ;;  %v3527_v11 = vld [vmem:[#allocation14 + $0x2] sm:$0x3] }
 0x551   : > { %4402 = vmatprep.subr.mxu1 %v4285_v53  ;;  %v4315_v1 = vsel %vm1879_vm11, %v4261_v52, %v6045_v31  ;;  %v4314_v50 = vsel %vm1879_vm11, %v4259_v30, %v4261_v52  ;;  %v3188_v53 = vld [vmem:[#allocation14] sm:$0x3]  ;;  %v9052_v14 = vrot.slane %v3527_v11, %v6498_v4  ;;  %v4464_v31 = vld [vmem:[#allocation14 + $0x8] sm:$0x3] }
 0x552   : > { %4403 = vmatpush1.msra.mxu1 %v4284_v51  ;;  %v9005_v15 = vpop.permute.xlu0 %4494  ;;  %v9044_v51 = vrot.slane %v3527_v11, %v9931_v39 }
 0x553   : > { %4404 = vmatprep.subr.mxu1 %v4283_v45  ;;  %4106 = vmatmul.mubr.f32.gmra.mxu0 %v3697_v26  ;;  %v3666_v26 = vld [vmem:[#allocation14 + $0x4] sm:$0x3]  ;;  %v4125_v45 = vld [vmem:[#allocation14 + $0x6] sm:$0x3] }
 0x554   : > { %4405 = vmatpush1.msra.mxu1 %v4282_v12  ;;  %5634 = vmatprep.mubr.msk.f32.mxu0 %vm1084_vm8, %v3700_v59  ;;  %v9049_v12 = vrot.slane %v3188_v53, %v9931_v39  ;;  %v9055_v27 = vrot.slane %v3666_v26, %v9931_v39  ;;  %v9065_v52 = vrot.slane %v4125_v45, %v9931_v39 }
 0x555   : > { %4430 = vmatprep.subr.mxu1 %v4321_v57  ;;  %v9058_v57 = vrot.slane %v3188_v53, %v6498_v4 }
 0x556   : > { %4431 = vmatpush2.msra.mxu1 %v4320_v46  ;;  %v9009_v36 = vpop.permute.xlu0 %4703  ;;  %v9062_v46 = vrot.slane %v3666_v26, %v6498_v4 }
 0x557   : > { %4432 = vmatprep.subr.mxu1 %v4319_v40  ;;  %4112 = vmatmul.mubr.f32.gmra.mxu0 %v3699_v62  ;;  %v4711_v19 = vmul.f32 0.0, %v9009_v36 }
 0x558   : > { %4433 = vmatpush2.msra.mxu1 %v4318_v38  ;;  %5635 = vmatprep.mubr.msk.f32.mxu0 %vm1084_vm8, %v3702_v25 }
 0x559   : > { %4434 = vmatprep.subr.mxu1 %v4317_v3  ;;  %4749 = vrot.lane.b32.xlu0 %v4711_v19, %s6298_s23 }
 0x55a   : > { %4435 = vmatpush2.msra.mxu1 %v4316_v35  ;;  %4755 = vrot.lane.b32.xlu1 %v4711_v19, %s6298_s23 }
 0x55b   : > { %4436 = vmatprep.subr.mxu1 %v4315_v1  ;;  %4118 = vmatmul.mubr.f32.gmra.mxu0 %v3701_v42  ;;  %v9073_v1 = vrot.slane %v4125_v45, %v6498_v4 }
 0x55c   : > { %4437 = vmatpush2.msra.mxu1 %v4314_v50  ;;  %5042 = vmatprep.mubr.f32.mxu0 %v10063_v5  ;;  %v9078_v50 = vrot.slane %v4464_v31, %v9931_v39 }
 0x55d   : > { %4439 = vmatmul.mubr.f32.vlgmr.msra.gmra.mxu1 %v4154_v60  ;;  %v9003_v21 = vpop.permute.xlu1 %4509  ;;  %4737 = vrot.lane.b32.xlu0 %v4711_v19, %s6298_s23 }
 0x55e   : > { %5637 = vmatprep.mubr.msk.f32.mxu1 %vm1084_vm8, %v4157_v0  ;;  %4743 = vrot.lane.b32.xlu1 %v4711_v19, %s6298_s23 }
 0x561   : > { %4445 = vmatmul.mubr.f32.gmra.mxu1 %v4156_v32  ;;  %v9007_v9 = vpop.permute.xlu1 %4499 }
 0x562   : > { %5638 = vmatprep.mubr.msk.f32.mxu1 %vm1084_vm8, %v4159_v6 }
 0x565   : > { %4451 = vmatmul.mubr.f32.gmra.mxu1 %v4158_v2  ;;  %v9011_v13 = vpop.permute.xlu1 %4701 }
 0x566   : > { %5639 = vmatprep.mubr.msk.f32.mxu1 %vm1084_vm8, %v4161_v22 }
 0x569   : > { %4457 = vmatmul.mubr.f32.gmra.mxu1 %v4160_v54  ;;  %v9016_v33 = vpop.permute.xlu1 %4582  ;;  %v9086_v54 = vrot.slane %v4464_v31, %v6498_v4 }
 0x56a   : > { %5419 = vmatprep.mubr.f32.mxu1 %v10063_v5  ;;  %v4590_v41 = vmul.f32 0.0, %v9016_v33 }
 0x56c   : > { %4626 = vrot.lane.b32.xlu0 %v4590_v41, %s6297_s17  ;;  %4632 = vrot.lane.b32.xlu1 %v4590_v41, %s6297_s17 }
 0x570   : > { %4614 = vrot.lane.b32.xlu0 %v4590_v41, %s6297_s17  ;;  %4620 = vrot.lane.b32.xlu1 %v4590_v41, %s6297_s17 }
 0x574   : > { %6047 = vrot.lane.b32.xlu1 %v10063_v5, %s6303_s24  ;;  %6052 = vrot.lane.b32.xlu0 %v10063_v5, %s6303_s24 }
 0x578   : > { %6057 = vrot.lane.b32.xlu1 %v10063_v5, %s6303_s24 }
 0x5c3   : > { %v3165_v48 = vpop.f32.mrf.mxu1 }
 0x5c4   : > { %v3200_v38 = vmul.f32 %v9049_v12, %v3165_v48 }
 0x5c5   : > { %v3167_v63 = vpop.f32.mrf.mxu1 }
 0x5c6   : > { %v3201_v60 = vmul.f32 %v9058_v57, %v3167_v63 }
 0x5da   : > { %v3503_v24 = vpop.f32.mrf.mxu0 }
 0x5db   : > { %v3539_v62 = vmul.f32 %v9044_v51, %v3503_v24 }
 0x5dc   : > { %v3505_v23 = vpop.f32.mrf.mxu0 }
 0x5dd   : > { %v3540_v30 = vmul.f32 %v9052_v14, %v3505_v23  ;;  %v3547_v0 = vadd.f32 %v3539_v62, %v3200_v38 }
 0x5df   : > { %v3171_v18 = vpop.f32.mrf.mxu1  ;;  %v3548_v19 = vadd.f32 %v3540_v30, %v3201_v60 }
 0x5e0   : > { %v3202_v42 = vmul.f32 %v9049_v12, %v3171_v18 }
 0x5e1   : > { %v3173_v56 = vpop.f32.mrf.mxu1 }
 0x5e2   : > { %v3203_v24 = vmul.f32 %v9058_v57, %v3173_v56 }
 0x5e3   : > { %v3509_v29 = vpop.f32.mrf.mxu0 }
 0x5e4   : > { %v3541_v35 = vmul.f32 %v9044_v51, %v3509_v29 }
 0x5e5   : > { %v3177_v8 = vpop.f32.mrf.mxu1  ;;  %v3511_v28 = vpop.f32.mrf.mxu0 }
 0x5e6   : > { %v3549_v63 = vadd.f32 %v3541_v35, %v3202_v42  ;;  %v3542_v23 = vmul.f32 %v9052_v14, %v3511_v28 }
 0x5e7   : > { %v9031_v16 = vpop.f32.mrf.mxu1 }
 0x5e8   : > { %v3550_v38 = vadd.f32 %v3542_v23, %v3203_v24 }
 0x5e9   : > { %v3515_v58 = vpop.f32.mrf.mxu0 }
 0x5ea   : > { %v3543_v45 = vmul.f32 %v9044_v51, %v3515_v58 }
 0x5eb   : > { %v9033_v61 = vpop.f32.mrf.mxu1  ;;  %v9037_v55 = vpop.f32.mrf.mxu0 }
 0x5ed   : > { %v9035_v20 = vpop.f32.mrf.mxu1 }
 0x5ef   : > { %v9039_v37 = vpop.f32.mrf.mxu0 }
 0x5f1   : > { %v3642_v43 = vpop.f32.mrf.mxu1  ;;  %v9041_v49 = vpop.f32.mrf.mxu0 }
 0x5f2   : > { %v3678_v3 = vmul.f32 %v9055_v27, %v3642_v43 }
 0x5f3   : > { %v3644_v44 = vpop.f32.mrf.mxu1 }
 0x5f4   : > { %v3679_v32 = vmul.f32 %v9062_v46, %v3644_v44  ;;  %v3686_v41 = vadd.f32 %v3678_v3, %v3547_v0 }
 0x5f6   : > { %v3687_v43 = vadd.f32 %v3679_v32, %v3548_v19 }
 0x5f7   : > { %v3648_v34 = vpop.f32.mrf.mxu1 }
 0x5f8   : > { %v3680_v48 = vmul.f32 %v9055_v27, %v3648_v34 }
 0x5f9   : > { %v3650_v7 = vpop.f32.mrf.mxu1 }
 0x5fa   : > { %v3681_v34 = vmul.f32 %v9062_v46, %v3650_v7 }
 0x5fc   : > { %v3654_v17 = vpop.f32.mrf.mxu1  ;;  %v3689_v32 = vadd.f32 %v3681_v34, %v3550_v38 }
 0x5fd   : > { %v3682_v30 = vmul.f32 %v9055_v27, %v3654_v17 }
 0x5fe   : > { %v9046_v47 = vpop.f32.mrf.mxu1 }
 0x601   : > { %v9067_v40 = vpop.f32.mrf.mxu1 }
 0x603   : > { %v9083_v22 = vpop.f32.mrf.mxu1 }
 0x60f   : > { %v4101_v59 = vpop.f32.mrf.mxu0 }
 0x610   : > { %v4137_v6 = vmul.f32 %v9065_v52, %v4101_v59  ;;  %v3204_v59 = vmul.f32 %v9049_v12, %v3177_v8 }
 0x611   : > { %v4103_v25 = vpop.f32.mrf.mxu0 }
 0x612   : > { %v4138_v18 = vmul.f32 %v9073_v1, %v4103_v25  ;;  %v4145_v44 = vadd.f32 %v4137_v6, %v3686_v41  ;;  %v3688_v25 = vadd.f32 %v3680_v48, %v3549_v63  ;;  %v3551_v7 = vadd.f32 %v3543_v45, %v3204_v59  ;;  %v9102_v6 = vpop.permute.xlu0 %4584 }
 0x613   : > { %v4107_v2 = vpop.f32.mrf.mxu0  ;;  %v3205_v59 = vmul.f32 %v9058_v57, %v9031_v16 }
 0x614   : > { %v4139_v11 = vmul.f32 %v9065_v52, %v4107_v2  ;;  %v4146_v56 = vadd.f32 %v4138_v18, %v3687_v43  ;;  %v3690_v23 = vadd.f32 %v3682_v30, %v3551_v7 }
 0x615   : > { %v4109_v26 = vpop.f32.mrf.mxu0 }
 0x616   : > { %v4140_v3 = vmul.f32 %v9073_v1, %v4109_v26  ;;  %v4147_v35 = vadd.f32 %v4139_v11, %v3688_v25  ;;  %v9133_v25 = vsel %vm655_vm3, %v9011_v13, %v9009_v36  ;;  %v3545_v36 = vmul.f32 %v9044_v51, %v9039_v37 }
 0x617   : > { %v4113_v0 = vpop.f32.mrf.mxu0 }
 0x618   : > { %v4148_v18 = vadd.f32 %v4140_v3, %v3689_v32  ;;  %v4141_v24 = vmul.f32 %v9065_v52, %v4113_v0 }
 0x619   : > { %v4115_v34 = vpop.f32.mrf.mxu0 }
 0x61a   : > { %v4149_v45 = vadd.f32 %v4141_v24, %v3690_v23  ;;  %v4142_v3 = vmul.f32 %v9073_v1, %v4115_v34 }
 0x61d   : > { %v4440_v29 = vpop.f32.mrf.mxu1 }
 0x61e   : > { %v4476_v53 = vmul.f32 %v9078_v50, %v4440_v29  ;;  %v9112_v29 = vsel %vm638_vm2, %v9016_v33, %v9102_v6  ;;  %v3544_v33 = vmul.f32 %v9052_v14, %v9037_v55 }
 0x61f   : > { %v4442_v62 = vpop.f32.mrf.mxu1 }
 0x620   : > { %v4484_v31 = vadd.f32 %v4476_v53, %v4145_v44  ;;  %v4477_v28 = vmul.f32 %v9086_v54, %v4442_v62  ;;  %v3683_v62 = vmul.f32 %v9062_v46, %v9046_v47  ;;  %v3206_v47 = vmul.f32 %v9049_v12, %v9033_v61 }
 0x621   : > { %v4446_v42 = vpop.f32.mrf.mxu1  ;;  %v3552_v30 = vadd.f32 %v3544_v33, %v3205_v59 }
 0x622   : > { %v4512_v60 = vadd.f32 %v9005_v15, %v4484_v31  ;;  %v4485_v8 = vadd.f32 %v4477_v28, %v4146_v56  ;;  %v4478_v58 = vmul.f32 %v9078_v50, %v4446_v42  ;;  %v3684_v42 = vmul.f32 %v9055_v27, %v9067_v40 }
 0x623   : > { %v4448_v2 = vpop.f32.mrf.mxu1  ;;  %v3553_v12 = vadd.f32 %v3545_v36, %v3206_v47 }
 0x624   : > { %v9104_v19 = vmax.f32 %v4512_v60, 0.0  ;;  %v4513_v41 = vadd.f32 %v9005_v15, %v4485_v8  ;;  %v4486_v17 = vadd.f32 %v4478_v58, %v4147_v35  ;;  %v4479_v48 = vmul.f32 %v9086_v54, %v4448_v2  ;;  %v4119_v35 = vpop.f32.mrf.mxu0 }
 0x625   : > { %v4452_v63 = vpop.f32.mrf.mxu1  ;;  %v4143_v7 = vmul.f32 %v9065_v52, %v4119_v35  ;;  %v3692_v27 = vadd.f32 %v3684_v42, %v3553_v12  ;;  %v3546_v52 = vmul.f32 %v9052_v14, %v9041_v49 }
 0x626   : > { %v9114_v43 = vmax.f32 %v4513_v41, 0.0  ;;  %v4514_v44 = vadd.f32 %v9007_v9, %v4486_v17  ;;  %v4487_v11 = vadd.f32 %v4479_v48, %v4148_v18  ;;  %v4480_v15 = vmul.f32 %v9078_v50, %v4452_v63  ;;  %v4121_v24 = vpop.f32.mrf.mxu0 }
 0x627   : > { %v4709_v53 = vmul.f32 %v9011_v13, %v9104_v19  ;;  %v4591_v26 = vmul.f32 %v9112_v29, %v9104_v19  ;;  %v4454_v55 = vpop.f32.mrf.mxu1  ;;  %v3207_v48 = vmul.f32 %v9058_v57, %v9035_v20  ;;  %v4151_v18 = vadd.f32 %v4143_v7, %v3692_v27 }
 0x628   : > { %v9135_v56 = vmax.f32 %v4514_v44, 0.0  ;;  %v4515_v16 = vadd.f32 %v9007_v9, %v4487_v11  ;;  %v4488_v31 = vadd.f32 %v4480_v15, %v4149_v45  ;;  %v4710_v28 = vmul.f32 %v9133_v25, %v9114_v43 }
 0x629   : > { %4733 = vrot.lane.b32.xlu0 %v4709_v53, %s6298_s23  ;;  %4616 = vrot.lane.b32.xlu1 %v4591_v26, %s6297_s17  ;;  %v4592_v38 = vmul.f32 %v9102_v6, %v9114_v43  ;;  %v3691_v9 = vadd.f32 %v3683_v62, %v3552_v30  ;;  %v4481_v60 = vmul.f32 %v9086_v54, %v4454_v55  ;;  %v4458_v58 = vpop.f32.mrf.mxu1  ;;  %v4750_v62 = vpop.permute.xlu0 %4749 }
 0x62a   : > { %v9152_v8 = vmax.f32 %v4515_v16, 0.0  ;;  %v4516_v61 = vadd.f32 %v9001_v10, %v4488_v31  ;;  %v4712_v37 = vmul.f32 %v9011_v13, %v9135_v56  ;;  %v4594_v51 = vmul.f32 %v9112_v29, %v9135_v56 }
 0x62b   : > { %v4150_v0 = vadd.f32 %v4142_v3, %v3691_v9  ;;  %v4482_v2 = vmul.f32 %v9078_v50, %v4458_v58  ;;  %v3685_v50 = vmul.f32 %v9062_v46, %v9083_v22  ;;  %v3554_v11 = vadd.f32 %v3546_v52, %v3207_v48  ;;  %v4460_v20 = vpop.f32.mrf.mxu1 }
 0x62c   : > { %v9162_v32 = vmax.f32 %v4516_v61, 0.0  ;;  %v4713_v41 = vmul.f32 %v9133_v25, %v9152_v8  ;;  %v4595_v17 = vmul.f32 %v9102_v6, %v9152_v8  ;;  %v4144_v57 = vmul.f32 %v9073_v1, %v4121_v24 }
 0x62d   : > { %4735 = vrot.lane.b32.xlu1 %v4710_v28, %s6298_s23  ;;  %4618 = vrot.lane.b32.xlu0 %v4592_v38, %s6297_s17  ;;  %v4489_v40 = vadd.f32 %v4481_v60, %v4150_v0  ;;  %v4490_v23 = vadd.f32 %v4482_v2, %v4151_v18  ;;  %v3693_v49 = vadd.f32 %v3685_v50, %v3554_v11  ;;  %v4738_v16 = vpop.permute.xlu0 %4737 }
 0x62e   : > { %v4597_v44 = vmul.f32 %v9112_v29, %v9162_v32  ;;  %v4715_v22 = vmul.f32 %v9011_v13, %v9162_v32 }
 0x62f   : > { %v4517_v63 = vadd.f32 %v9001_v10, %v4489_v40  ;;  %v4518_v46 = vadd.f32 %v9003_v21, %v4490_v23  ;;  %v4483_v10 = vmul.f32 %v9086_v54, %v4460_v20  ;;  %v4152_v15 = vadd.f32 %v4144_v57, %v3693_v49 }
 0x631   : > { %4739 = vrot.lane.b32.xlu1 %v4712_v37, %s6298_s23  ;;  %4622 = vrot.lane.b32.xlu0 %v4594_v51, %s6297_s17  ;;  %v9184_v14 = vmax.f32 %v4517_v63, 0.0  ;;  %v9193_v1 = vmax.f32 %v4518_v46, 0.0  ;;  %v4491_v53 = vadd.f32 %v4483_v10, %v4152_v15 }
 0x633   : > { %v4716_v26 = vmul.f32 %v9133_v25, %v9184_v14  ;;  %v4598_v59 = vmul.f32 %v9102_v6, %v9184_v14  ;;  %v4519_v54 = vadd.f32 %v9003_v21, %v4491_v53  ;;  %v4600_v33 = vmul.f32 %v9112_v29, %v9193_v1  ;;  %v4756_v29 = vpop.permute.xlu1 %4755 }
 0x634   : > { %v4718_v34 = vmul.f32 %v9011_v13, %v9193_v1 }
 0x635   : > { %4741 = vrot.lane.b32.xlu0 %v4713_v41, %s6298_s23  ;;  %4624 = vrot.lane.b32.xlu1 %v4595_v17, %s6297_s17  ;;  %v9207_v45 = vmax.f32 %v4519_v54, 0.0 }
 0x637   : > { %v4719_v21 = vmul.f32 %v9133_v25, %v9207_v45  ;;  %v4601_v13 = vmul.f32 %v9102_v6, %v9207_v45  ;;  %v4744_v25 = vpop.permute.xlu1 %4743  ;;  %v4627_v6 = vpop.permute.xlu0 %4626 }
 0x639   : > { %4893 = vrot.lane.b32.xlu0 %v9162_v32, %s6303_s24  ;;  %4628 = vrot.lane.b32.xlu1 %v4597_v44, %s6297_s17 }
 0x63b   : > { %v4633_v31 = vpop.permute.xlu1 %4632  ;;  %v4615_v38 = vpop.permute.xlu0 %4614 }
 0x63d   : > { %4745 = vrot.lane.b32.xlu0 %v4715_v22, %s6298_s23  ;;  %4895 = vrot.lane.b32.xlu1 %v9184_v14, %s6303_s24 }
 0x63f   : > { %v4621_v55 = vpop.permute.xlu1 %4620  ;;  %v9242_v30 = vpop.permute.xlu0 %6052 }
 0x641   : > { %4747 = vrot.lane.b32.xlu1 %v4716_v26, %s6298_s23  ;;  %4630 = vrot.lane.b32.xlu0 %v4598_v59, %s6297_s17 }
 0x643   : > { %v9238_v28 = vpop.permute.xlu1 %6047 }
 0x644   : > { %v6050_v39 = vunpack.i.h.bf16 %v9238_v28 }
 0x645   : > { %4899 = vrot.lane.b32.xlu1 %v9193_v1, %s6303_s24  ;;  %4634 = vrot.lane.b32.xlu0 %v4600_v33, %s6297_s17 }
 0x647   : > { %v9240_v47 = vpop.permute.xlu1 %6057 }
 0x649   : > { %4751 = vrot.lane.b32.xlu1 %v4718_v34, %s6298_s23  ;;  %4901 = vrot.lane.b32.xlu0 %v9207_v45, %s6303_s24 }
 0x64d   : > { %4889 = vrot.lane.b32.xlu1 %v9152_v8, %s6303_s24  ;;  %4753 = vrot.lane.b32.xlu0 %v4719_v21, %s6298_s23  ;;  %s491_s23 = sand.u32 1, %s6274_s26  }
 0x64e   : > { %s5455_s20 = scalar_lea.sflag [#allocation10], %s491_s23 }
 0x651   : > { %4881 = vrot.lane.b32.xlu1 %v9104_v19, %s6303_s24  ;;  %4887 = vrot.lane.b32.xlu0 %v9135_v56, %s6303_s24 }
 0x655   : > { %6067 = vrot.lane.b32.xlu1 %v10063_v5, %s6303_s24  ;;  %6062 = vrot.lane.b32.xlu0 %v10063_v5, %s6303_s24 }
 0x659   : > { %4883 = vrot.lane.b32.xlu0 %v9114_v43, %s6303_s24  ;;  %4636 = vrot.lane.b32.xlu1 %v4601_v13, %s6297_s17 }
 0x65d   : > { %6072 = vrot.lane.b32.xlu0 %v10063_v5, %s6303_s24  ;;  %6082 = vrot.lane.b32.xlu1 %v10063_v5, %s6304_s19 }
 0x661   : > { %6077 = vrot.lane.b32.xlu0 %v10063_v5, %s6304_s19 }
 0x69b   : > { %v4734_v36 = vpop.permute.xlu0 %4733  ;;  %v4617_v3 = vpop.permute.xlu1 %4616 }
 0x69c   : > { %v9245_v9 = vsel %vm655_vm3, %v4615_v38, %v4617_v3 }
 0x69d   : > { %10064 = vst [vmem:[#allocation37_spill] sm:$0xff] %v9245_v9  ;;  %4857 = vrot.lane.b32.xlu1 %v9245_v9, %s6303_s24 }
 0x69f   : > { %v4736_v42 = vpop.permute.xlu1 %4735  ;;  %v4619_v35 = vpop.permute.xlu0 %4618 }
 0x6a0   : > { %v9250_v60 = vsel %vm638_vm2, %v4734_v36, %v4736_v42  ;;  %v9253_v61 = vsel %vm638_vm2, %v4736_v42, %v4738_v16  ;;  %v9260_v12 = vsel %vm655_vm3, %v4617_v3, %v4619_v35 }
 0x6a1   : > { %4907 = vrot.lane.b32.xlu0 %v9253_v61, %s6303_s24  ;;  %4905 = vrot.lane.b32.xlu1 %v9250_v60, %s6303_s24  ;;  %10065 = vst [vmem:[#allocation141_spill] sm:$0xff] %v9260_v12 }
 0x6a3   : > { %v4740_v37 = vpop.permute.xlu1 %4739  ;;  %v4623_v51 = vpop.permute.xlu0 %4622 }
 0x6a4   : > { %v9265_v7 = vsel %vm655_vm3, %v4621_v55, %v4623_v51 }
 0x6a5   : > { %4859 = vrot.lane.b32.xlu0 %v9260_v12, %s6303_s24  ;;  %10066 = vst [vmem:[#allocation89_spill] sm:$0xff] %v9265_v7 }
 0x6a7   : > { %v4742_v0 = vpop.permute.xlu0 %4741  ;;  %v4625_v58 = vpop.permute.xlu1 %4624 }
 0x6a8   : > { %v9268_v27 = vsel %vm638_vm2, %v4742_v0, %v4744_v25  ;;  %v9277_v41 = vsel %vm638_vm2, %v4740_v37, %v4742_v0  ;;  %v9280_v17 = vsel %vm655_vm3, %v4623_v51, %v4625_v58 }
 0x6a9   : > { %4863 = vrot.lane.b32.xlu0 %v9265_v7, %s6303_s24  ;;  %4913 = vrot.lane.b32.xlu1 %v9268_v27, %s6303_s24  ;;  %10067 = vst [vmem:[#allocation80_spill] sm:$0xff] %v9280_v17 }
 0x6ab   : > { %v9274_v40 = vpop.permute.xlu0 %4893  ;;  %v4629_v2 = vpop.permute.xlu1 %4628 }
 0x6ac   : > { %v9293_v63 = vsel %vm655_vm3, %v4627_v6, %v4629_v2 }
 0x6ad   : > { %4911 = vrot.lane.b32.xlu0 %v9277_v41, %s6303_s24  ;;  %4865 = vrot.lane.b32.xlu1 %v9280_v17, %s6303_s24  ;;  %10068 = vst [vmem:[#allocation40_spill] sm:$0xff] %v9293_v63 }
 0x6af   : > { %v4746_v48 = vpop.permute.xlu0 %4745  ;;  %v4896_v52 = vpop.permute.xlu1 %4895 }
 0x6b0   : > { %v9288_v18 = vsel %vm1290_vm9, %v9274_v40, %v4896_v52 }
 0x6b1   : > { %5288 = vrot.lane.b32.xlu0 %v9268_v27, %s6304_s19 }
 0x6b3   : > { %v4748_v50 = vpop.permute.xlu1 %4747  ;;  %v4631_v24 = vpop.permute.xlu0 %4630 }
 0x6b4   : > { %v9296_v23 = vsel %vm638_vm2, %v4748_v50, %v4750_v62  ;;  %v9305_v20 = vsel %vm638_vm2, %v4746_v48, %v4748_v50  ;;  %v9308_v57 = vsel %vm655_vm3, %v4629_v2, %v4631_v24  ;;  %v4781_v62 = vld [vmem:[%s9646_s10] sm:$0xff] }
 0x6b5   : > { %4869 = vrot.lane.b32.xlu0 %v9293_v63, %s6303_s24  ;;  %4919 = vrot.lane.b32.xlu1 %v9296_v23, %s6303_s24 }
 0x6b7   : > { %v9302_v44 = vpop.permute.xlu1 %4899  ;;  %v4635_v11 = vpop.permute.xlu0 %4634 }
 0x6b8   : > { %v9323_v53 = vsel %vm655_vm3, %v4633_v31, %v4635_v11 }
 0x6b9   : > { %4917 = vrot.lane.b32.xlu0 %v9305_v20, %s6303_s24  ;;  %4871 = vrot.lane.b32.xlu1 %v9308_v57, %s6303_s24 }
 0x6bb   : > { %v4752_v49 = vpop.permute.xlu1 %4751  ;;  %v4902_v46 = vpop.permute.xlu0 %4901 }
 0x6bc   : > { %v9316_v10 = vsel %vm1290_vm9, %v9302_v44, %v4902_v46 }
 0x6bd   : > { %5294 = vrot.lane.b32.xlu0 %v9296_v23, %s6304_s19  ;;  %5292 = vrot.lane.b32.xlu1 %v9305_v20, %s6304_s19 }
 0x6bf   : > { %v4890_v22 = vpop.permute.xlu1 %4889  ;;  %v4754_v15 = vpop.permute.xlu0 %4753 }
 0x6c0   : > { %v9326_v26 = vsel %vm638_vm2, %v4754_v15, %v4756_v29  ;;  %v9337_v33 = vsel %vm638_vm2, %v4752_v49, %v4754_v15 }
 0x6c1   : > { %4925 = vrot.lane.b32.xlu0 %v9326_v26, %s6303_s24  ;;  %4875 = vrot.lane.b32.xlu1 %v9323_v53, %s6303_s24 }
 0x6c3   : > { %v9332_v59 = vpop.permute.xlu1 %4881  ;;  %v9334_v54 = vpop.permute.xlu0 %4887 }
 0x6c4   : > { %v9341_v34 = vsel %vm1290_vm9, %v9334_v54, %v4890_v22  ;;  %v6049_v22 = vunpack.i.l.bf16 %v9238_v28 }
 0x6c5   : > { %5286 = vrot.lane.b32.xlu0 %v9277_v41, %s6304_s19  ;;  %4923 = vrot.lane.b32.xlu1 %v9337_v33, %s6303_s24 }
 0x6c7   : > { %v9347_v21 = vpop.permute.xlu1 %6067  ;;  %v9405_v25 = vpop.permute.xlu0 %6062 }
 0x6c9   : > { %5280 = vrot.lane.b32.xlu0 %v9250_v60, %s6304_s19  ;;  %5282 = vrot.lane.b32.xlu1 %v9253_v61, %s6304_s19 }
 0x6cb   : > { %v4637_v13 = vpop.permute.xlu1 %4636  ;;  %v9407_v16 = vpop.permute.xlu0 %4883 }
 0x6cc   : > { %v9358_v29 = vsel %vm655_vm3, %v4635_v11, %v4637_v13 }
 0x6cd   : > { %6087 = vrot.lane.b32.xlu0 %v10063_v5, %s6304_s19  ;;  %5276 = vrot.lane.b32.xlu1 %v9207_v45, %s6304_s19 }
 0x6cf   : > { %v9409_v31 = vpop.permute.xlu0 %6072  ;;  %v9411_v6 = vpop.permute.xlu1 %6082 }
 0x6d1   : > { %5274 = vrot.lane.b32.xlu1 %v9193_v1, %s6304_s19  ;;  %4877 = vrot.lane.b32.xlu0 %v9358_v29, %s6303_s24  ;;  %s5581_s24 = sshll.u32 %s491_s23, 4 }
 0x6d2   : > { %s493_s21 = scalar_lea.vmem [#allocation16], %s5581_s24 }
 0x6d3   : > { %v9413_v55 = vpop.permute.xlu0 %6077  ;;  %s5469_s22 = sshll.u32 %s493_s21, 4  ;;  %s5470_s22 = int_to_ptr.vmem [resolvable:$true] %s5469_s22 }
 0x6d4   : > { %s6210_s25 = scalar_lea.vmem %s5470_s22, 256 }
 0x6d5   : > { %5268 = vrot.lane.b32.xlu1 %v9162_v32, %s6304_s19  ;;  %5270 = vrot.lane.b32.xlu0 %v9184_v14, %s6304_s19  ;;  %p6211_p10 = scmp.ne.s32.totalorder %s5470_s22, %s6210_s25 }
 0x6d7   : > { %p6212_p12 = pnand %p6211_p10, %p6417_p5 }
 0x6d9   : > { %6092 = vrot.lane.b32.xlu1 %v10063_v5, %s6304_s19  ;;  %5264 = vrot.lane.b32.xlu0 %v9152_v8, %s6304_s19  ;;  %p6213_p13 = pneg %p6212_p12 }
 0x6dd   : > { %5300 = vrot.lane.b32.xlu1 %v9326_v26, %s6304_s19  ;;  %5262 = vrot.lane.b32.xlu0 %v9135_v56, %s6304_s19 }
 0x6e1   : > { %5298 = vrot.lane.b32.xlu1 %v9337_v33, %s6304_s19  ;;  %5256 = vrot.lane.b32.xlu0 %v9104_v19, %s6304_s19 }
 0x6e5   : > { %5258 = vrot.lane.b32.xlu1 %v9114_v43, %s6304_s19  ;;  %6097 = vrot.lane.b32.xlu0 %v10063_v5, %s6304_s19 }
 0x6e9   : > { %5250 = vrot.lane.b32.xlu1 %v9323_v53, %s6304_s19  ;;  %5246 = vrot.lane.b32.xlu0 %v9308_v57, %s6304_s19 }
 0x6ed   : > { %5244 = vrot.lane.b32.xlu1 %v9293_v63, %s6304_s19  ;;  %5240 = vrot.lane.b32.xlu0 %v9280_v17, %s6304_s19 }
 0x6f1   : > { %5252 = vrot.lane.b32.xlu1 %v9358_v29, %s6304_s19  ;;  %5238 = vrot.lane.b32.xlu0 %v9265_v7, %s6304_s19 }
 0x6f5   : > { %6102 = vrot.lane.b32.xlu1 %v10063_v5, %s6304_s19  ;;  %5232 = vrot.lane.b32.xlu0 %v9245_v9, %s6304_s19 }
 0x6f9   : > { %5234 = vrot.lane.b32.xlu1 %v9260_v12, %s6304_s19  ;;  %v6054_v12 = vunpack.i.l.bf16 %v9242_v30  ;;  %s5653_s19 = sshll.u32 %s6400_s29, 8  ;;  %s6214_s29 = sshll.u32 %s6308_s14, 4  ;;  %s6215_s29 = int_to_ptr.vmem [resolvable:$false] %s6214_s29 }
 0x6fa   : > { %s5467_s30 = scalar_lea.hbm %s9649_s13, %s5653_s19  ;;  %s6216_s16 = scalar_lea.vmem %s6215_s29, 512 }
 0x6fb   : > { %p6217_p4 = scmp.lt.s32.totalorder %s5470_s22, %s6215_s29  ;;  %p6218_p7 = scmp.lt.s32.totalorder %s6216_s16, %s6210_s25 }
 0x6fd   : > { %5445 = vperm.xlu1 %5845, %v4781_v62   ;;  %p6219_p8 = por %p6218_p7, %p6217_p4 }
 0x6ff   : > { %p6220_p11 = pnand %p6219_p8, %p6213_p13 }
 0x70f   : > { %v9415_v38 = vpop.permute.xlu1 %4857 }
 0x713   : > { %v4908_v36 = vpop.permute.xlu0 %4907  ;;  %v4906_v42 = vpop.permute.xlu1 %4905 }
 0x717   : > { %v9417_v3 = vpop.permute.xlu0 %4859 }
 0x71b   : > { %v9419_v35 = vpop.permute.xlu0 %4863  ;;  %v4914_v37 = vpop.permute.xlu1 %4913 }
 0x71f   : > { %v4912_v51 = vpop.permute.xlu0 %4911  ;;  %v9421_v0 = vpop.permute.xlu1 %4865 }
 0x720   : > { %v4945_v28 = vsel %vm1290_vm9, %v6054_v12, %v4912_v51  ;;  %v6064_v12 = vunpack.i.l.bf16 %v9405_v25 }
 0x723   : > { %v9423_v58 = vpop.permute.xlu0 %5288 }
 0x727   : > { %v9425_v2 = vpop.permute.xlu0 %4869  ;;  %v4920_v48 = vpop.permute.xlu1 %4919 }
 0x72b   : > { %v4918_v52 = vpop.permute.xlu0 %4917  ;;  %v4872_v50 = vpop.permute.xlu1 %4871 }
 0x72c   : > { %v4948_v9 = vsel %vm1290_vm9, %v4918_v52, %v4920_v48  ;;  %v4947_v7 = vsel %vm1290_vm9, %v6050_v39, %v4918_v52  ;;  %v6059_v48 = vunpack.i.l.bf16 %v9240_v47 }
 0x72f   : > { %v9427_v24 = vpop.permute.xlu0 %5294  ;;  %v9429_v11 = vpop.permute.xlu1 %5292 }
 0x733   : > { %v4926_v49 = vpop.permute.xlu0 %4925  ;;  %v4876_v46 = vpop.permute.xlu1 %4875 }
 0x737   : > { %v9432_v15 = vpop.permute.xlu0 %5286  ;;  %v4924_v13 = vpop.permute.xlu1 %4923 }
 0x738   : > { %v4949_v62 = vsel %vm1290_vm9, %v6049_v22, %v4924_v13  ;;  %v4950_v4 = vsel %vm1290_vm9, %v4924_v13, %v4926_v49  ;;  %v4946_v22 = vsel %vm1290_vm9, %v4912_v51, %v4914_v37  ;;  %v6055_v49 = vunpack.i.h.bf16 %v9242_v30 }
 0x739   : > { %4986 = vmatprep.subr.mxu0 %v4950_v4  ;;  %v4944_v4 = vsel %vm1290_vm9, %v4906_v42, %v4908_v36  ;;  %v4941_v30 = vsel %vm1290_vm9, %v6059_v48, %v9302_v44  ;;  %v4936_v44 = vsel %vm1290_vm9, %v9332_v59, %v9407_v16  ;;  %v4932_v16 = vsel %vm1290_vm9, %v9425_v2, %v4872_v50 }
 0x73a   : > { %4987 = vmatpush1.msra.mxu0 %v4949_v62  ;;  %v4943_v39 = vsel %vm1290_vm9, %v6055_v49, %v4906_v42  ;;  %v6065_v42 = vunpack.i.h.bf16 %v9405_v25  ;;  %v6075_v62 = vunpack.i.h.bf16 %v9409_v31 }
 0x73b   : > { %v9440_v17 = vpop.permute.xlu0 %5280  ;;  %4988 = vmatprep.subr.mxu0 %v4948_v9  ;;  %v9442_v63 = vpop.permute.xlu1 %5282 }
 0x73c   : > { %4989 = vmatpush1.msra.mxu0 %v4947_v7  ;;  %v6060_v7 = vunpack.i.h.bf16 %v9240_v47  ;;  %v4937_v47 = vsel %vm1290_vm9, %v6064_v12, %v9334_v54  ;;  %v6070_v54 = vunpack.i.h.bf16 %v9347_v21 }
 0x73d   : > { %4990 = vmatprep.subr.mxu0 %v4946_v22  ;;  %v6074_v22 = vunpack.i.l.bf16 %v9409_v31  ;;  %v4928_v31 = vsel %vm1290_vm9, %v9415_v38, %v9417_v3  ;;  %v6080_v3 = vunpack.i.h.bf16 %v9413_v55 }
 0x73e   : > { %4991 = vmatpush1.msra.mxu0 %v4945_v28  ;;  %v4939_v36 = vsel %vm1290_vm9, %v6060_v7, %v9274_v40  ;;  %v6069_v40 = vunpack.i.l.bf16 %v9347_v21  ;;  %v4931_v49 = vsel %vm1290_vm9, %v6070_v54, %v9425_v2  ;;  %v4930_v21 = vsel %vm1290_vm9, %v9419_v35, %v9421_v0  ;;  %v4782_v0 = vld [vmem:[%s9645_s9] sm:$0xff] }
 0x73f   : > { %v9450_v52 = vpop.permute.xlu0 %6087  ;;  %4992 = vmatprep.subr.mxu0 %v4944_v4  ;;  %v9452_v9 = vpop.permute.xlu1 %5276  ;;  %v4929_v50 = vsel %vm1290_vm9, %v6074_v22, %v9419_v35  ;;  %v4927_v2 = vsel %vm1290_vm9, %v6075_v62, %v9415_v38 }
 0x740   : > { %4993 = vmatpush1.msra.mxu0 %v4943_v39  ;;  %v4933_v13 = vsel %vm1290_vm9, %v6069_v40, %v4876_v46 }
 0x741   : > { %4994 = vmatprep.subr.mxu0 %v9316_v10 }
 0x742   : > { %4995 = vmatpush1.msra.mxu0 %v4941_v30  ;;  %v6084_v30 = vunpack.i.l.bf16 %v9411_v6 }
 0x743   : > { %v4878_v37 = vpop.permute.xlu0 %4877  ;;  %4996 = vmatprep.subr.mxu0 %v9288_v18  ;;  %v9463_v51 = vpop.permute.xlu1 %5274  ;;  %v4935_v18 = vsel %vm1290_vm9, %v6065_v42, %v9332_v59 }
 0x744   : > { %4997 = vmatpush1.msra.mxu0 %v4939_v36  ;;  %v5323_v12 = vsel %vm1673_vm10, %v9423_v58, %v6084_v30  ;;  %v5322_v36 = vsel %vm1673_vm10, %v9432_v15, %v9423_v58 }
 0x745   : > { %4998 = vmatprep.subr.mxu0 %v9341_v34  ;;  %v4934_v34 = vsel %vm1290_vm9, %v4876_v46, %v4878_v37  ;;  %v6079_v46 = vunpack.i.l.bf16 %v9413_v55 }
 0x746   : > { %4999 = vmatpush1.msra.mxu0 %v4937_v47  ;;  %v10070_v47 = vld [vmem:[#allocation80_spill] sm:$0xff] }
 0x747   : > { %v9472_v10 = vpop.permute.xlu0 %5270  ;;  %5000 = vmatprep.subr.mxu0 %v4936_v44  ;;  %v9474_v25 = vpop.permute.xlu1 %5268 }
 0x748   : > { %5001 = vmatpush1.msra.mxu0 %v4935_v18  ;;  %v10073_v18 = vld [vmem:[#allocation37_spill] sm:$0xff] }
 0x749   : > { %5002 = vmatprep.subr.mxu0 %v4934_v34 }
 0x74a   : > { %5003 = vmatpush1.msra.mxu0 %v4933_v13 }
 0x74b   : > { %v9487_v59 = vpop.permute.xlu0 %5264  ;;  %5004 = vmatprep.subr.mxu0 %v4932_v16  ;;  %v9489_v28 = vpop.permute.xlu1 %6092 }
 0x74c   : > { %5005 = vmatpush1.msra.mxu0 %v4931_v49  ;;  %v6094_v58 = vunpack.i.l.bf16 %v9489_v28 }
 0x74d   : > { %5006 = vmatprep.subr.mxu0 %v4930_v21  ;;  %v5644_v21 = vld [vmem:[%s9648_s12 + $0x2] sm:$0x3] }
 0x74e   : > { %5007 = vmatpush1.msra.mxu0 %v4929_v50  ;;  %v5049_v50 = vld [vmem:[%s9648_s12] sm:$0x3] }
 0x74f   : > { %v5263_v4 = vpop.permute.xlu0 %5262  ;;  %5008 = vmatprep.subr.mxu0 %v4928_v31  ;;  %v5301_v48 = vpop.permute.xlu1 %5300  ;;  %v10074_v31 = vld [vmem:[#allocation26_spill] sm:$0xff] }
 0x750   : > { %5009 = vmatpush1.msra.mxu0 %v4927_v2  ;;  %v5327_v35 = vsel %vm1673_vm10, %v5301_v48, %v6079_v46  ;;  %v5314_v15 = vsel %vm1673_vm10, %v5263_v4, %v9487_v59  ;;  %v5147_v2 = vrot.slane %v5644_v21, %v10074_v31  ;;  %v5647_v4 = vld [vmem:[%s9648_s12 + $0x4] sm:$0x3] }
 0x751   : > { %5078 = vmatprep.subr.mxu0 %v9326_v26  ;;  %5363 = vmatprep.subr.mxu1 %v5327_v35  ;;  %v5325_v26 = vsel %vm1673_vm10, %v9427_v24, %v6080_v3  ;;  %v10075_v35 = vld [vmem:[#allocation27_spill] sm:$0xff]  ;;  %v5432_v30 = vrot.slane %v5647_v4, %v10074_v31 }
 0x752   : > { %5641 = vmatmul.mubr.msk.f32.vlgmr.msra.gmra.mxu0 %vm1879_vm11, %v4782_v0  ;;  %v5151_v3 = vrot.slane %v5644_v21, %v10075_v35 }
 0x753   : > { %5079 = vmatpush1.msra.mxu0 %v9337_v33  ;;  %v5257_v38 = vpop.permute.xlu0 %5256  ;;  %v5299_v39 = vpop.permute.xlu1 %5298  ;;  %5134 = vmatprep.mubr.f32.mxu0 %v10063_v5  ;;  %v5324_v33 = vsel %vm1673_vm10, %v9429_v11, %v9427_v24  ;;  %v6085_v5 = vunpack.i.h.bf16 %v9411_v6  ;;  %v5320_v6 = vsel %vm1673_vm10, %v9440_v17, %v9442_v63  ;;  %v5318_v11 = vsel %vm1673_vm10, %v9463_v51, %v9452_v9  ;;  %v10069_v51 = vld [vmem:[#allocation40_spill] sm:$0xff] }
 0x754   : > { %5080 = vmatprep.subr.mxu0 %v9296_v23  ;;  %v5326_v7 = vsel %vm1673_vm10, %v5299_v39, %v5301_v48  ;;  %v6089_v23 = vunpack.i.l.bf16 %v9450_v52  ;;  %v6095_v17 = vunpack.i.h.bf16 %v9489_v28  ;;  %v5054_v48 = vrot.slane %v5049_v50, %v10074_v31 }
 0x755   : > { %5081 = vmatpush1.msra.mxu0 %v9305_v20  ;;  %5364 = vmatpush1.msra.mxu1 %v5326_v7 }
 0x756   : > { %5082 = vmatprep.subr.mxu0 %v9268_v27  ;;  %5365 = vmatprep.subr.mxu1 %v5325_v26  ;;  %v6090_v27 = vunpack.i.h.bf16 %v9450_v52 }
 0x757   : > { %5083 = vmatpush1.msra.mxu0 %v9277_v41  ;;  %v6098_v55 = vpop.permute.xlu0 %6097  ;;  %5366 = vmatpush1.msra.mxu1 %v5324_v33  ;;  %v5259_v20 = vpop.permute.xlu1 %5258  ;;  %v5321_v41 = vsel %vm1673_vm10, %v9442_v63, %v6085_v5  ;;  %v5436_v5 = vrot.slane %v5647_v4, %v10075_v35 }
 0x758   : > { %5084 = vmatprep.subr.mxu0 %v9253_v61  ;;  %5367 = vmatprep.subr.mxu1 %v5323_v12  ;;  %v6100_v52 = vunpack.i.h.bf16 %v6098_v55 }
 0x759   : > { %5085 = vmatpush1.msra.mxu0 %v9250_v60  ;;  %5368 = vmatpush1.msra.mxu1 %v5322_v36  ;;  %v5319_v60 = vsel %vm1673_vm10, %v9452_v9, %v6089_v23  ;;  %v6099_v9 = vunpack.i.l.bf16 %v6098_v55 }
 0x75a   : > { %5086 = vmatprep.subr.mxu0 %v9207_v45  ;;  %5369 = vmatprep.subr.mxu1 %v5321_v41  ;;  %v5317_v45 = vsel %vm1673_vm10, %v9472_v10, %v6090_v27 }
 0x75b   : > { %5087 = vmatpush1.msra.mxu0 %v9193_v1  ;;  %v5247_v61 = vpop.permute.xlu0 %5246  ;;  %v5251_v24 = vpop.permute.xlu1 %5250  ;;  %5370 = vmatpush1.msra.mxu1 %v5320_v6  ;;  %v5316_v1 = vsel %vm1673_vm10, %v9474_v25, %v9472_v10  ;;  %v10072_v10 = vld [vmem:[#allocation141_spill] sm:$0xff] }
 0x75c   : > { %5088 = vmatprep.subr.mxu0 %v9184_v14  ;;  %5371 = vmatprep.subr.mxu1 %v5319_v60 }
 0x75d   : > { %5089 = vmatpush1.msra.mxu0 %v9162_v32  ;;  %5372 = vmatpush1.msra.mxu1 %v5318_v11  ;;  %v5315_v32 = vsel %vm1673_vm10, %v9487_v59, %v6094_v58  ;;  %v5645_v59 = vld [vmem:[%s9645_s9 + $0x10] sm:$0xff] }
 0x75e   : > { %5090 = vmatprep.subr.mxu0 %v9152_v8  ;;  %5373 = vmatprep.subr.mxu1 %v5317_v45  ;;  %v5313_v8 = vsel %vm1673_vm10, %v5259_v20, %v6095_v17 }
 0x75f   : > { %5091 = vmatpush1.msra.mxu0 %v9135_v56  ;;  %v5241_v63 = vpop.permute.xlu0 %5240  ;;  %v5245_v14 = vpop.permute.xlu1 %5244  ;;  %5374 = vmatpush1.msra.mxu1 %v5316_v1  ;;  %v5312_v56 = vsel %vm1673_vm10, %v5257_v38, %v5259_v20  ;;  %v5058_v38 = vrot.slane %v5049_v50, %v10075_v35 }
 0x760   : > { %5092 = vmatprep.subr.mxu0 %v9114_v43  ;;  %5375 = vmatprep.subr.mxu1 %v5315_v32  ;;  %v5308_v44 = vsel %vm1673_vm10, %v5245_v14, %v5247_v61 }
 0x761   : > { %5093 = vmatpush1.msra.mxu0 %v9104_v19  ;;  %5376 = vmatpush1.msra.mxu1 %v5314_v15 }
 0x762   : > { %5094 = vmatprep.subr.mxu0 %v9358_v29  ;;  %5377 = vmatprep.subr.mxu1 %v5313_v8  ;;  %v5309_v29 = vsel %vm1673_vm10, %v5247_v61, %v6100_v52 }
 0x763   : > { %5095 = vmatpush1.msra.mxu0 %v9323_v53  ;;  %v5253_v42 = vpop.permute.xlu1 %5252  ;;  %5378 = vmatpush1.msra.mxu1 %v5312_v56  ;;  %v5239_v37 = vpop.permute.xlu0 %5238  ;;  %v10071_v53 = vld [vmem:[#allocation89_spill] sm:$0xff] }
 0x764   : > { %5096 = vmatprep.subr.mxu0 %v9308_v57  ;;  %v5310_v43 = vsel %vm1673_vm10, %v5251_v24, %v5253_v42  ;;  %v5311_v19 = vsel %vm1673_vm10, %v5253_v42, %v6099_v9  ;;  %v5642_v57 = vld [vmem:[%s9645_s9 + $0x8] sm:$0xff]  ;;  %v5306_v13 = vsel %vm1673_vm10, %v5239_v37, %v5241_v63 }
 0x765   : > { %5097 = vmatpush1.msra.mxu0 %v10069_v51  ;;  %5379 = vmatprep.subr.mxu1 %v5311_v19 }
 0x766   : > { %5098 = vmatprep.subr.mxu0 %v10070_v47  ;;  %5380 = vmatpush1.msra.mxu1 %v5310_v43 }
 0x767   : > { %5099 = vmatpush1.msra.mxu0 %v10071_v53  ;;  %v6103_v40 = vpop.permute.xlu1 %6102  ;;  %5381 = vmatprep.subr.mxu1 %v5309_v29  ;;  %v5233_v16 = vpop.permute.xlu0 %5232 }
 0x768   : > { %5100 = vmatprep.subr.mxu0 %v10072_v10  ;;  %v6104_v25 = vunpack.i.l.bf16 %v6103_v40  ;;  %5382 = vmatpush1.msra.mxu1 %v5308_v44  ;;  %v6105_v34 = vunpack.i.h.bf16 %v6103_v40 }
 0x769   : > { %5101 = vmatpush1.msra.mxu0 %v10073_v18 }
 0x76a   : > { %5643 = vmatmul.mubr.msk.f32.vlgmr.msra.gmra.mxu0 %vm1879_vm11, %v5642_v57  ;;  %v5307_v54 = vsel %vm1673_vm10, %v5241_v63, %v6104_v25 }
 0x76b   : > { %v5235_v62 = vpop.permute.xlu1 %5234  ;;  %5383 = vmatprep.subr.mxu1 %v5307_v54 }
 0x76c   : > { %v5304_v22 = vsel %vm1673_vm10, %v5233_v16, %v5235_v62  ;;  %5384 = vmatpush1.msra.mxu1 %v5306_v13  ;;  %v5305_v49 = vsel %vm1673_vm10, %v5235_v62, %v6105_v34 }
 0x76d   : > { %5385 = vmatprep.subr.mxu1 %v5305_v49 }
 0x76e   : > { %5386 = vmatpush1.msra.mxu1 %v5304_v22 }
 0x76f   : > { %5646 = vmatmul.mubr.msk.f32.vlgmr.msra.gmra.mxu1 %vm1879_vm11, %v5645_v59 }
 0x778   : > { %v5446_v58 = vpop.permute.xlu1 %5445 }
 0x812   : > { %v5044_v28 = vpop.f32.mrf.mxu0 }
 0x813   : > { %v5061_v26 = vmul.f32 %v5054_v48, %v5044_v28 }
 0x814   : > { %v5046_v46 = vpop.f32.mrf.mxu0 }
 0x815   : > { %v5062_v55 = vmul.f32 %v5058_v38, %v5046_v46 }
 0x82a   : > { %v5136_v0 = vpop.f32.mrf.mxu0 }
 0x82b   : > { %v5154_v39 = vmul.f32 %v5147_v2, %v5136_v0 }
 0x82c   : > { %v5138_v7 = vpop.f32.mrf.mxu0 }
 0x82d   : > { %v5155_v33 = vmul.f32 %v5151_v3, %v5138_v7  ;;  %v5156_v20 = vadd.f32 %v5154_v39, %v5061_v26 }
 0x82f   : > { %v5421_v23 = vpop.f32.mrf.mxu1  ;;  %v5157_v27 = vadd.f32 %v5155_v33, %v5062_v55 }
 0x830   : > { %v5439_v12 = vmul.f32 %v5432_v30, %v5421_v23 }
 0x831   : > { %v5423_v36 = vpop.f32.mrf.mxu1 }
 0x832   : > { %v5441_v41 = vadd.f32 %v5439_v12, %v5156_v20  ;;  %v5440_v6 = vmul.f32 %v5436_v5, %v5423_v36 }
 0x834   : > { %v5448_v61 = vadd.f32 %v5446_v58, %v5441_v41  ;;  %v5442_v24 = vadd.f32 %v5440_v6, %v5157_v27 }
 0x836   : > { %v5450_v60 = vmax.f32 %v5448_v61, 0.0  ;;  %v5449_v11 = vadd.f32 %v5446_v58, %v5442_v24 }
 0x838   : > { %v5451_v45 = vmax.f32 %v5449_v11, 0.0  ;;  %5452 = vst [vmem:[%s493_s21] sm:$0xff] %v5450_v60 }
 0x83a   : > { %5453 = vst [vmem:[%s493_s21 + $0x8] sm:$0xff] %v5451_v45 }
 0x83b   : > { %6223 = shalt.err (!%p6220_p11)
}
 0x83c   : > { %s6224_s17 = scalar_lea.hbm %s5467_s30, 256  ;;  %s6228_s19 = scalar_lea.hbm %s9649_s13, 512 }
 0x83d   : > { %p6225_p0 = scmp.ne.s32.totalorder %s5467_s30, %s6224_s17  ;;  %p6229_p3 = scmp.lt.s32.totalorder %s5467_s30, %s9649_s13 }
 0x83e   : > { %p6230_p9 = scmp.lt.s32.totalorder %s6228_s19, %s6224_s17 }
 0x83f   : > { %p6226_p1 = pnand %p6225_p0, %p6417_p5 }
 0x840   : > { %p6231_p10 = por %p6230_p9, %p6229_p3 }
 0x841   : > { %p6227_p2 = pneg %p6226_p1 }
 0x843   : > { %p6232_p12 = pnand %p6231_p10, %p6227_p2 }
 0x845   : > { %6235 = shalt.err (!%p6232_p12)
}
 0x846   : > { %5670 = dma.vmem_to_hbm [thread:$0]  (%p6417_p5), %s5470_s22, 256, %s5467_s30, %s5455_s20  }
 0x847 PF: > { %s10076_s15 = sld [smem:[#allocation21_spill]]  ;;  %p5697_p13 = scmp.ge.s32.totalorder %s6282_s28, 2 }
 0x849   : > { %p5686_p4 = pnand %p5697_p13, %p6421_p6 }
 0x84b   : > { %p5687_p7 = pneg %p5686_p4 }
 0x84d   : > { %s5481_s14 = sand.u32 1, %s10076_s15  }
 0x84e   : > { %s5482_s29 = scalar_lea.sflag [#allocation10], %s5481_s14 }
 0x84f   : > { %6265 = dma.done.wait (%p5687_p7), %s5482_s29, 256  }
 0x850   : > { %6267 = vsyncadd (%p5687_p7), %s5482_s29, 4294967040  ;;  %s10078_s28 = sld [smem:[#allocation23_spill]]  ;;  %s10081_s25 = smov %s6274_s26 }
 0x851   : > { %s10079_s16 = sld [smem:[#allocation22_spill]] }
 0x852   : > { %s10080_s27 = sld [smem:[#allocation24_spill]] }
 0x856   : > { %p26_p8 = scmp.ge.s32.totalorder %s10078_s28, 4  }
 0x857   : > { %s10082_s26 = smov %s10079_s16 }
 0x858   :  { %28 = sbr.rel (!%p26_p8) target bundleno = 6 (0x6), region = 157 }
 0x85d   :  { %5487 = vsyncpa [#allocation9], 1 }
 0x85e   :  { %5489 = vsyncpa [#allocation9 + $0x1], 1 }
 0x85f   :  { %5490 = vsyncpa [#allocation12], 1 }
 0x860   :  { %5491 = vsyncpa [#allocation15], 1 }
 0x861   :  { %5492 = vsyncpa [#allocation10], 1 }
 0x862   :  { %5494 = vsyncpa [#allocation10 + $0x1], 1 }

</bundles_post_ra>
